<compile_context>
chip_gen: v7x
topology: tpu7x:2x2x1
jax: 0.10.0
libtpu: 0.0.40
codegen_flags: <defaults>
</compile_context>

<pallas_src>
import math

import jax
import jax.numpy as jnp
from jax import lax
from jax.experimental import pallas as pl
from jax.experimental.pallas import tpu as pltpu

# ---------------- scaled-down BERT config ----------------
HIDDEN = 64          # (768 in bert-base-chinese)
N_HEADS = 4          # (12)
HEAD_DIM = HIDDEN // N_HEADS
FFN = 4 * HIDDEN     # (3072)
N_LAYERS = 2         # (12)
N_CLASSES = 2
VOCAB = 128
TYPE_VOCAB = 2
MAX_POS = 32
SEQ = 8
BATCH = 2
TOKENS = BATCH * SEQ
LANE = 128           # padded classifier width -> lane-dense output store
LN_EPS = 1e-12


# ---------------- in-kernel helpers (f32 elementwise) ----------------
def _layernorm(x, gamma, beta):
    mean = jnp.mean(x, axis=-1, keepdims=True)
    var = jnp.mean((x - mean) ** 2, axis=-1, keepdims=True)
    return (x - mean) * lax.rsqrt(var + LN_EPS) * gamma + beta


def _gelu(x):
    # TODO(synk): HF BERT uses the exact erf-GELU; tanh approximation used here.
    return 0.5 * x * (1.0 + jnp.tanh(0.7978845608028654 * (x + 0.044715 * x * x * x)))


# ---------------- fused Pallas kernel ----------------
def _bert_fused_kernel(emb_ref, mask_ref, eg_ref, eb_ref,
                       wq_ref, bq_ref, wk_ref, bk_ref, wv_ref, bv_ref,
                       wo_ref, bo_ref, ln1g_ref, ln1b_ref,
                       w1_ref, b1_ref, w2_ref, b2_ref, ln2g_ref, ln2b_ref,
                       wp_ref, bp_ref, wc_ref, bc_ref, o_ref):
    # embeddings LayerNorm
    x = _layernorm(emb_ref[...], eg_ref[...], eb_ref[...])      # (T, H) f32
    mask = mask_ref[...]                                         # (T, T) additive
    scale = 1.0 / math.sqrt(HEAD_DIM)

    for l in range(N_LAYERS):        # unrolled; whole model resident in VMEM
        xb = x.astype(jnp.bfloat16)
        q = jnp.dot(xb, wq_ref[l], preferred_element_type=jnp.float32) + bq_ref[l]
        k = jnp.dot(xb, wk_ref[l], preferred_element_type=jnp.float32) + bk_ref[l]
        v = jnp.dot(xb, wv_ref[l], preferred_element_type=jnp.float32) + bv_ref[l]
        wo_l = wo_ref[l]

        attn = jnp.zeros((TOKENS, HIDDEN), jnp.float32)
        for h in range(N_HEADS):     # unrolled; no concatenate — fold through Wo rows
            sl = slice(h * HEAD_DIM, (h + 1) * HEAD_DIM)
            qh = q[:, sl].astype(jnp.bfloat16)
            kh = k[:, sl].astype(jnp.bfloat16)
            vh = v[:, sl].astype(jnp.bfloat16)
            # scores over all B*S rows; block-diagonal mask keeps sequences apart
            scores = lax.dot_general(
                qh, kh, (((1,), (1,)), ((), ())),
                preferred_element_type=jnp.float32) * scale + mask
            scores = scores - jnp.max(scores, axis=-1, keepdims=True)
            p = jnp.exp(scores)
            p = p * pl.reciprocal(jnp.sum(p, axis=-1, keepdims=True), approx=True)
            ctx = jnp.dot(p.astype(jnp.bfloat16), vh,
                          preferred_element_type=jnp.float32)            # (T, hd)
            attn = attn + jnp.dot(ctx.astype(jnp.bfloat16), wo_l[sl, :],
                                  preferred_element_type=jnp.float32)    # (T, H)
        attn = attn + bo_ref[l]
        h1 = _layernorm(x + attn, ln1g_ref[l], ln1b_ref[l])

        inter = jnp.dot(h1.astype(jnp.bfloat16), w1_ref[l],
                        preferred_element_type=jnp.float32) + b1_ref[l]
        inter = _gelu(inter)
        ffn = jnp.dot(inter.astype(jnp.bfloat16), w2_ref[l],
                      preferred_element_type=jnp.float32) + b2_ref[l]
        x = _layernorm(h1 + ffn, ln2g_ref[l], ln2b_ref[l])

    # pooler (tanh dense) + padded classifier applied to every token row so the
    # output store is fully lane/sublane dense; CLS rows are picked outside.
    pooled = jnp.tanh(jnp.dot(x.astype(jnp.bfloat16), wp_ref[...],
                              preferred_element_type=jnp.float32) + bp_ref[...])
    o_ref[...] = jnp.dot(pooled.astype(jnp.bfloat16), wc_ref[...],
                         preferred_element_type=jnp.float32) + bc_ref[...]


# ---------------- pallas_call wrapper ----------------
def _fused_call(emb, add_mask, p):
    args = (emb, add_mask, p["emb_ln_g"], p["emb_ln_b"],
            p["wq"], p["bq"], p["wk"], p["bk"], p["wv"], p["bv"],
            p["wo"], p["bo"], p["ln1_g"], p["ln1_b"],
            p["w1"], p["b1"], p["w2"], p["b2"], p["ln2_g"], p["ln2_b"],
            p["pooler_w"], p["pooler_b"], p["cls_w"], p["cls_b"])
    vmem = lambda: pl.BlockSpec(memory_space=pltpu.MemorySpace.VMEM)
    return pl.pallas_call(
        _bert_fused_kernel,
        out_shape=jax.ShapeDtypeStruct((TOKENS, LANE), jnp.float32),
        in_specs=[vmem() for _ in args],
        out_specs=vmem(),
    )(*args)


# ---------------- parameters (synthetic, deterministic) ----------------
def init_params(key):
    keys = iter(jax.random.split(key, 32))

    def nrm(shape, dtype=jnp.float32):
        return (0.02 * jax.random.normal(next(keys), shape, jnp.float32)).astype(dtype)

    # classifier padded to LANE=128 output columns (zeros beyond N_CLASSES)
    cls_w = jnp.zeros((HIDDEN, LANE), jnp.float32)
    cls_w = cls_w.at[:, :N_CLASSES].set(
        0.02 * jax.random.normal(next(keys), (HIDDEN, N_CLASSES), jnp.float32))

    params = dict(
        # embedding tables stay f32 (gathered in plain JAX)
        word_emb=nrm((VOCAB, HIDDEN)),
        pos_emb=nrm((MAX_POS, HIDDEN)),
        type_emb=nrm((TYPE_VOCAB, HIDDEN)),
        emb_ln_g=jnp.ones((1, HIDDEN), jnp.float32),
        emb_ln_b=jnp.zeros((1, HIDDEN), jnp.float32),
        # encoder-layer matmul weights stacked on a leading layer axis, bf16
        wq=nrm((N_LAYERS, HIDDEN, HIDDEN), jnp.bfloat16),
        bq=jnp.zeros((N_LAYERS, 1, HIDDEN), jnp.float32),
        wk=nrm((N_LAYERS, HIDDEN, HIDDEN), jnp.bfloat16),
        bk=jnp.zeros((N_LAYERS, 1, HIDDEN), jnp.float32),
        wv=nrm((N_LAYERS, HIDDEN, HIDDEN), jnp.bfloat16),
        bv=jnp.zeros((N_LAYERS, 1, HIDDEN), jnp.float32),
        wo=nrm((N_LAYERS, HIDDEN, HIDDEN), jnp.bfloat16),
        bo=jnp.zeros((N_LAYERS, 1, HIDDEN), jnp.float32),
        ln1_g=jnp.ones((N_LAYERS, 1, HIDDEN), jnp.float32),
        ln1_b=jnp.zeros((N_LAYERS, 1, HIDDEN), jnp.float32),
        w1=nrm((N_LAYERS, HIDDEN, FFN), jnp.bfloat16),
        b1=jnp.zeros((N_LAYERS, 1, FFN), jnp.float32),
        w2=nrm((N_LAYERS, FFN, HIDDEN), jnp.bfloat16),
        b2=jnp.zeros((N_LAYERS, 1, HIDDEN), jnp.float32),
        ln2_g=jnp.ones((N_LAYERS, 1, HIDDEN), jnp.float32),
        ln2_b=jnp.zeros((N_LAYERS, 1, HIDDEN), jnp.float32),
        pooler_w=nrm((HIDDEN, HIDDEN), jnp.bfloat16),
        pooler_b=jnp.zeros((1, HIDDEN), jnp.float32),
        cls_w=cls_w.astype(jnp.bfloat16),
        cls_b=jnp.zeros((1, LANE), jnp.float32),
    )
    return params


# ---------------- forward (== BertClassificationModel.forward) ----------------
def bert_classifier_forward(params, input_ids, token_type_ids, attention_mask):
    B, S = input_ids.shape
    T = B * S
    # Embedding gathers: plain-JAX glue (tiny), summed then fed to the fused kernel.
    emb = (params["word_emb"][input_ids]
           + params["pos_emb"][jnp.arange(S)][None, :, :]
           + params["type_emb"][token_type_ids]).reshape(T, HIDDEN)

    # Combined additive attention mask over the flattened token axis:
    # -10000 where the key token is padding OR belongs to a different sequence.
    batch_idx = jnp.repeat(jnp.arange(B), S)
    same_seq = (batch_idx[:, None] == batch_idx[None, :]).astype(jnp.float32)
    key_keep = attention_mask.reshape(T).astype(jnp.float32)[None, :]
    add_mask = (1.0 - same_seq * key_keep) * -10000.0            # (T, T)

    logits_all = _fused_call(emb, add_mask, params)              # (T, 128)
    # pooler+classifier were applied to every token row; take each sequence's
    # CLS row and the real class columns.
    return logits_all.reshape(B, S, LANE)[:, 0, :N_CLASSES]


if __name__ == "__main__":
    key = jax.random.PRNGKey(0)
    pkey, ikey = jax.random.split(key)
    params = init_params(pkey)

    input_ids = jax.random.randint(ikey, (BATCH, SEQ), 0, VOCAB, dtype=jnp.int32)
    token_type_ids = jnp.zeros((BATCH, SEQ), jnp.int32)
    attention_mask = jnp.ones((BATCH, SEQ), jnp.int32)

    logits = bert_classifier_forward(params, input_ids, token_type_ids, attention_mask)
    jax.block_until_ready(logits)
    assert logits.shape == (BATCH, N_CLASSES) and logits.dtype == jnp.float32
    print("KERNEL_OK")
</pallas_src>

<mosaic_0001>
module attributes {stable_mosaic.version = 11 : i64} {
  func.func @_bert_fused_kernel(%arg0: memref<16x64xf32, #tpu.memory_space<vmem>>, %arg1: memref<16x16xf32, #tpu.memory_space<vmem>>, %arg2: memref<1x64xf32, #tpu.memory_space<vmem>>, %arg3: memref<1x64xf32, #tpu.memory_space<vmem>>, %arg4: memref<2x64x64xbf16, #tpu.memory_space<vmem>>, %arg5: memref<2x1x64xf32, #tpu.memory_space<vmem>>, %arg6: memref<2x64x64xbf16, #tpu.memory_space<vmem>>, %arg7: memref<2x1x64xf32, #tpu.memory_space<vmem>>, %arg8: memref<2x64x64xbf16, #tpu.memory_space<vmem>>, %arg9: memref<2x1x64xf32, #tpu.memory_space<vmem>>, %arg10: memref<2x64x64xbf16, #tpu.memory_space<vmem>>, %arg11: memref<2x1x64xf32, #tpu.memory_space<vmem>>, %arg12: memref<2x1x64xf32, #tpu.memory_space<vmem>>, %arg13: memref<2x1x64xf32, #tpu.memory_space<vmem>>, %arg14: memref<2x64x256xbf16, #tpu.memory_space<vmem>>, %arg15: memref<2x1x256xf32, #tpu.memory_space<vmem>>, %arg16: memref<2x256x64xbf16, #tpu.memory_space<vmem>>, %arg17: memref<2x1x64xf32, #tpu.memory_space<vmem>>, %arg18: memref<2x1x64xf32, #tpu.memory_space<vmem>>, %arg19: memref<2x1x64xf32, #tpu.memory_space<vmem>>, %arg20: memref<64x64xbf16, #tpu.memory_space<vmem>>, %arg21: memref<1x64xf32, #tpu.memory_space<vmem>>, %arg22: memref<64x128xbf16, #tpu.memory_space<vmem>>, %arg23: memref<1x128xf32, #tpu.memory_space<vmem>>, %arg24: memref<16x128xf32, #tpu.memory_space<vmem>>) attributes {dimension_semantics = [], scalar_prefetch = 0 : i64, scratch_operands = 0 : i64, tpu.core_type = #tpu.core_type<tc>} {
    %c0 = arith.constant 0 : index
    %c0_0 = arith.constant 0 : index
    %0 = vector.load %arg0[%c0, %c0_0] : memref<16x64xf32, #tpu.memory_space<vmem>>, vector<16x64xf32>
    %c0_1 = arith.constant 0 : index
    %c0_2 = arith.constant 0 : index
    %1 = vector.load %arg2[%c0_1, %c0_2] : memref<1x64xf32, #tpu.memory_space<vmem>>, vector<1x64xf32>
    %c0_3 = arith.constant 0 : index
    %c0_4 = arith.constant 0 : index
    %2 = vector.load %arg3[%c0_3, %c0_4] : memref<1x64xf32, #tpu.memory_space<vmem>>, vector<1x64xf32>
    %cst = arith.constant dense<0.000000e+00> : vector<16xf32>
    %3 = vector.multi_reduction <add>, %0, %cst [1] : vector<16x64xf32> to vector<16xf32>
    %4 = vector.shape_cast %3 : vector<16xf32> to vector<16x1xf32>
    %cst_5 = arith.constant 6.400000e+01 : f32
    %5 = vector.broadcast %cst_5 : f32 to vector<16x1xf32>
    %6 = arith.divf %4, %5 : vector<16x1xf32>
    %7 = vector.broadcast %6 : vector<16x1xf32> to vector<16x64xf32>
    %8 = arith.subf %0, %7 : vector<16x64xf32>
    %9 = arith.mulf %8, %8 : vector<16x64xf32>
    %cst_6 = arith.constant dense<0.000000e+00> : vector<16xf32>
    %10 = vector.multi_reduction <add>, %9, %cst_6 [1] : vector<16x64xf32> to vector<16xf32>
    %11 = vector.shape_cast %10 : vector<16xf32> to vector<16x1xf32>
    %cst_7 = arith.constant 6.400000e+01 : f32
    %12 = vector.broadcast %cst_7 : f32 to vector<16x1xf32>
    %13 = arith.divf %11, %12 : vector<16x1xf32>
    %14 = vector.broadcast %6 : vector<16x1xf32> to vector<16x64xf32>
    %15 = arith.subf %0, %14 : vector<16x64xf32>
    %cst_8 = arith.constant 9.99999996E-13 : f32
    %16 = vector.broadcast %cst_8 : f32 to vector<16x1xf32>
    %17 = arith.addf %13, %16 : vector<16x1xf32>
    %18 = math.rsqrt %17 : vector<16x1xf32>
    %19 = vector.broadcast %18 : vector<16x1xf32> to vector<16x64xf32>
    %20 = arith.mulf %15, %19 : vector<16x64xf32>
    %21 = vector.broadcast %1 : vector<1x64xf32> to vector<16x64xf32>
    %22 = arith.mulf %20, %21 : vector<16x64xf32>
    %23 = vector.broadcast %2 : vector<1x64xf32> to vector<16x64xf32>
    %24 = arith.addf %22, %23 : vector<16x64xf32>
    %c0_9 = arith.constant 0 : index
    %c0_10 = arith.constant 0 : index
    %25 = vector.load %arg1[%c0_9, %c0_10] : memref<16x16xf32, #tpu.memory_space<vmem>>, vector<16x16xf32>
    %26 = arith.truncf %24 : vector<16x64xf32> to vector<16x64xbf16>
    %c0_11 = arith.constant 0 : index
    %c0_12 = arith.constant 0 : index
    %c0_13 = arith.constant 0 : index
    %27 = vector.load %arg4[%c0_11, %c0_12, %c0_13] : memref<2x64x64xbf16, #tpu.memory_space<vmem>>, vector<1x64x64xbf16>
    %28 = vector.shape_cast %27 : vector<1x64x64xbf16> to vector<64x64xbf16>
    %cst_14 = arith.constant dense<0.000000e+00> : vector<16x64xf32>
    %29 = tpu.matmul %26, %28, %cst_14 {dimension_numbers = #tpu.dot_dimension_numbers<[1], [0], [0], [1], [0, 0, 1, 1], [], []>} : vector<16x64xbf16>, vector<64x64xbf16>, vector<16x64xf32> -> vector<16x64xf32>
    %c0_15 = arith.constant 0 : index
    %c0_16 = arith.constant 0 : index
    %c0_17 = arith.constant 0 : index
    %30 = vector.load %arg5[%c0_15, %c0_16, %c0_17] : memref<2x1x64xf32, #tpu.memory_space<vmem>>, vector<1x1x64xf32>
    %31 = vector.shape_cast %30 : vector<1x1x64xf32> to vector<1x64xf32>
    %32 = vector.broadcast %31 : vector<1x64xf32> to vector<16x64xf32>
    %33 = arith.addf %29, %32 : vector<16x64xf32>
    %c0_18 = arith.constant 0 : index
    %c0_19 = arith.constant 0 : index
    %c0_20 = arith.constant 0 : index
    %34 = vector.load %arg6[%c0_18, %c0_19, %c0_20] : memref<2x64x64xbf16, #tpu.memory_space<vmem>>, vector<1x64x64xbf16>
    %35 = vector.shape_cast %34 : vector<1x64x64xbf16> to vector<64x64xbf16>
    %cst_21 = arith.constant dense<0.000000e+00> : vector<16x64xf32>
    %36 = tpu.matmul %26, %35, %cst_21 {dimension_numbers = #tpu.dot_dimension_numbers<[1], [0], [0], [1], [0, 0, 1, 1], [], []>} : vector<16x64xbf16>, vector<64x64xbf16>, vector<16x64xf32> -> vector<16x64xf32>
    %c0_22 = arith.constant 0 : index
    %c0_23 = arith.constant 0 : index
    %c0_24 = arith.constant 0 : index
    %37 = vector.load %arg7[%c0_22, %c0_23, %c0_24] : memref<2x1x64xf32, #tpu.memory_space<vmem>>, vector<1x1x64xf32>
    %38 = vector.shape_cast %37 : vector<1x1x64xf32> to vector<1x64xf32>
    %39 = vector.broadcast %38 : vector<1x64xf32> to vector<16x64xf32>
    %40 = arith.addf %36, %39 : vector<16x64xf32>
    %c0_25 = arith.constant 0 : index
    %c0_26 = arith.constant 0 : index
    %c0_27 = arith.constant 0 : index
    %41 = vector.load %arg8[%c0_25, %c0_26, %c0_27] : memref<2x64x64xbf16, #tpu.memory_space<vmem>>, vector<1x64x64xbf16>
    %42 = vector.shape_cast %41 : vector<1x64x64xbf16> to vector<64x64xbf16>
    %cst_28 = arith.constant dense<0.000000e+00> : vector<16x64xf32>
    %43 = tpu.matmul %26, %42, %cst_28 {dimension_numbers = #tpu.dot_dimension_numbers<[1], [0], [0], [1], [0, 0, 1, 1], [], []>} : vector<16x64xbf16>, vector<64x64xbf16>, vector<16x64xf32> -> vector<16x64xf32>
    %c0_29 = arith.constant 0 : index
    %c0_30 = arith.constant 0 : index
    %c0_31 = arith.constant 0 : index
    %44 = vector.load %arg9[%c0_29, %c0_30, %c0_31] : memref<2x1x64xf32, #tpu.memory_space<vmem>>, vector<1x1x64xf32>
    %45 = vector.shape_cast %44 : vector<1x1x64xf32> to vector<1x64xf32>
    %46 = vector.broadcast %45 : vector<1x64xf32> to vector<16x64xf32>
    %47 = arith.addf %43, %46 : vector<16x64xf32>
    %c0_32 = arith.constant 0 : index
    %c0_33 = arith.constant 0 : index
    %c0_34 = arith.constant 0 : index
    %48 = vector.load %arg10[%c0_32, %c0_33, %c0_34] : memref<2x64x64xbf16, #tpu.memory_space<vmem>>, vector<1x64x64xbf16>
    %49 = vector.shape_cast %48 : vector<1x64x64xbf16> to vector<64x64xbf16>
    %cst_35 = arith.constant 0.000000e+00 : f32
    %50 = vector.broadcast %cst_35 : f32 to vector<16x64xf32>
    %51 = vector.extract_strided_slice %33 {offsets = [0, 0], sizes = [16, 16], strides = [1, 1]} : vector<16x64xf32> to vector<16x16xf32>
    %52 = arith.truncf %51 : vector<16x16xf32> to vector<16x16xbf16>
    %53 = vector.extract_strided_slice %40 {offsets = [0, 0], sizes = [16, 16], strides = [1, 1]} : vector<16x64xf32> to vector<16x16xf32>
    %54 = arith.truncf %53 : vector<16x16xf32> to vector<16x16xbf16>
    %55 = vector.extract_strided_slice %47 {offsets = [0, 0], sizes = [16, 16], strides = [1, 1]} : vector<16x64xf32> to vector<16x16xf32>
    %56 = arith.truncf %55 : vector<16x16xf32> to vector<16x16xbf16>
    %cst_36 = arith.constant dense<0.000000e+00> : vector<16x16xf32>
    %57 = tpu.matmul %52, %54, %cst_36 {dimension_numbers = #tpu.dot_dimension_numbers<[1], [1], [0], [0], [0, 0, 1, 0], [], []>} : vector<16x16xbf16>, vector<16x16xbf16>, vector<16x16xf32> -> vector<16x16xf32>
    %cst_37 = arith.constant 2.500000e-01 : f32
    %58 = vector.broadcast %cst_37 : f32 to vector<16x16xf32>
    %59 = arith.mulf %57, %58 : vector<16x16xf32>
    %60 = arith.addf %59, %25 : vector<16x16xf32>
    %cst_38 = arith.constant dense<0xFF800000> : vector<16xf32>
    %61 = vector.multi_reduction <maximumf>, %60, %cst_38 [1] : vector<16x16xf32> to vector<16xf32>
    %62 = vector.shape_cast %61 : vector<16xf32> to vector<16x1xf32>
    %63 = vector.broadcast %62 : vector<16x1xf32> to vector<16x16xf32>
    %64 = arith.subf %60, %63 : vector<16x16xf32>
    %65 = math.exp %64 : vector<16x16xf32>
    %cst_39 = arith.constant dense<0.000000e+00> : vector<16xf32>
    %66 = vector.multi_reduction <add>, %65, %cst_39 [1] : vector<16x16xf32> to vector<16xf32>
    %67 = vector.shape_cast %66 : vector<16xf32> to vector<16x1xf32>
    %68 = tpu.reciprocal %67 {approx = true} : vector<16x1xf32> -> vector<16x1xf32>
    %69 = vector.broadcast %68 : vector<16x1xf32> to vector<16x16xf32>
    %70 = arith.mulf %65, %69 : vector<16x16xf32>
    %71 = arith.truncf %70 : vector<16x16xf32> to vector<16x16xbf16>
    %cst_40 = arith.constant dense<0.000000e+00> : vector<16x16xf32>
    %72 = tpu.matmul %71, %56, %cst_40 {dimension_numbers = #tpu.dot_dimension_numbers<[1], [0], [0], [1], [0, 0, 1, 1], [], []>} : vector<16x16xbf16>, vector<16x16xbf16>, vector<16x16xf32> -> vector<16x16xf32>
    %73 = arith.truncf %72 : vector<16x16xf32> to vector<16x16xbf16>
    %74 = vector.extract_strided_slice %49 {offsets = [0, 0], sizes = [16, 64], strides = [1, 1]} : vector<64x64xbf16> to vector<16x64xbf16>
    %cst_41 = arith.constant dense<0.000000e+00> : vector<16x64xf32>
    %75 = tpu.matmul %73, %74, %cst_41 {dimension_numbers = #tpu.dot_dimension_numbers<[1], [0], [0], [1], [0, 0, 1, 1], [], []>} : vector<16x16xbf16>, vector<16x64xbf16>, vector<16x64xf32> -> vector<16x64xf32>
    %76 = arith.addf %50, %75 : vector<16x64xf32>
    %77 = vector.extract_strided_slice %33 {offsets = [0, 16], sizes = [16, 16], strides = [1, 1]} : vector<16x64xf32> to vector<16x16xf32>
    %78 = arith.truncf %77 : vector<16x16xf32> to vector<16x16xbf16>
    %79 = vector.extract_strided_slice %40 {offsets = [0, 16], sizes = [16, 16], strides = [1, 1]} : vector<16x64xf32> to vector<16x16xf32>
    %80 = arith.truncf %79 : vector<16x16xf32> to vector<16x16xbf16>
    %81 = vector.extract_strided_slice %47 {offsets = [0, 16], sizes = [16, 16], strides = [1, 1]} : vector<16x64xf32> to vector<16x16xf32>
    %82 = arith.truncf %81 : vector<16x16xf32> to vector<16x16xbf16>
    %cst_42 = arith.constant dense<0.000000e+00> : vector<16x16xf32>
    %83 = tpu.matmul %78, %80, %cst_42 {dimension_numbers = #tpu.dot_dimension_numbers<[1], [1], [0], [0], [0, 0, 1, 0], [], []>} : vector<16x16xbf16>, vector<16x16xbf16>, vector<16x16xf32> -> vector<16x16xf32>
    %cst_43 = arith.constant 2.500000e-01 : f32
    %84 = vector.broadcast %cst_43 : f32 to vector<16x16xf32>
    %85 = arith.mulf %83, %84 : vector<16x16xf32>
    %86 = arith.addf %85, %25 : vector<16x16xf32>
    %cst_44 = arith.constant dense<0xFF800000> : vector<16xf32>
    %87 = vector.multi_reduction <maximumf>, %86, %cst_44 [1] : vector<16x16xf32> to vector<16xf32>
    %88 = vector.shape_cast %87 : vector<16xf32> to vector<16x1xf32>
    %89 = vector.broadcast %88 : vector<16x1xf32> to vector<16x16xf32>
    %90 = arith.subf %86, %89 : vector<16x16xf32>
    %91 = math.exp %90 : vector<16x16xf32>
    %cst_45 = arith.constant dense<0.000000e+00> : vector<16xf32>
    %92 = vector.multi_reduction <add>, %91, %cst_45 [1] : vector<16x16xf32> to vector<16xf32>
    %93 = vector.shape_cast %92 : vector<16xf32> to vector<16x1xf32>
    %94 = tpu.reciprocal %93 {approx = true} : vector<16x1xf32> -> vector<16x1xf32>
    %95 = vector.broadcast %94 : vector<16x1xf32> to vector<16x16xf32>
    %96 = arith.mulf %91, %95 : vector<16x16xf32>
    %97 = arith.truncf %96 : vector<16x16xf32> to vector<16x16xbf16>
    %cst_46 = arith.constant dense<0.000000e+00> : vector<16x16xf32>
    %98 = tpu.matmul %97, %82, %cst_46 {dimension_numbers = #tpu.dot_dimension_numbers<[1], [0], [0], [1], [0, 0, 1, 1], [], []>} : vector<16x16xbf16>, vector<16x16xbf16>, vector<16x16xf32> -> vector<16x16xf32>
    %99 = arith.truncf %98 : vector<16x16xf32> to vector<16x16xbf16>
    %100 = vector.extract_strided_slice %49 {offsets = [16, 0], sizes = [16, 64], strides = [1, 1]} : vector<64x64xbf16> to vector<16x64xbf16>
    %cst_47 = arith.constant dense<0.000000e+00> : vector<16x64xf32>
    %101 = tpu.matmul %99, %100, %cst_47 {dimension_numbers = #tpu.dot_dimension_numbers<[1], [0], [0], [1], [0, 0, 1, 1], [], []>} : vector<16x16xbf16>, vector<16x64xbf16>, vector<16x64xf32> -> vector<16x64xf32>
    %102 = arith.addf %76, %101 : vector<16x64xf32>
    %103 = vector.extract_strided_slice %33 {offsets = [0, 32], sizes = [16, 16], strides = [1, 1]} : vector<16x64xf32> to vector<16x16xf32>
    %104 = arith.truncf %103 : vector<16x16xf32> to vector<16x16xbf16>
    %105 = vector.extract_strided_slice %40 {offsets = [0, 32], sizes = [16, 16], strides = [1, 1]} : vector<16x64xf32> to vector<16x16xf32>
    %106 = arith.truncf %105 : vector<16x16xf32> to vector<16x16xbf16>
    %107 = vector.extract_strided_slice %47 {offsets = [0, 32], sizes = [16, 16], strides = [1, 1]} : vector<16x64xf32> to vector<16x16xf32>
    %108 = arith.truncf %107 : vector<16x16xf32> to vector<16x16xbf16>
    %cst_48 = arith.constant dense<0.000000e+00> : vector<16x16xf32>
    %109 = tpu.matmul %104, %106, %cst_48 {dimension_numbers = #tpu.dot_dimension_numbers<[1], [1], [0], [0], [0, 0, 1, 0], [], []>} : vector<16x16xbf16>, vector<16x16xbf16>, vector<16x16xf32> -> vector<16x16xf32>
    %cst_49 = arith.constant 2.500000e-01 : f32
    %110 = vector.broadcast %cst_49 : f32 to vector<16x16xf32>
    %111 = arith.mulf %109, %110 : vector<16x16xf32>
    %112 = arith.addf %111, %25 : vector<16x16xf32>
    %cst_50 = arith.constant dense<0xFF800000> : vector<16xf32>
    %113 = vector.multi_reduction <maximumf>, %112, %cst_50 [1] : vector<16x16xf32> to vector<16xf32>
    %114 = vector.shape_cast %113 : vector<16xf32> to vector<16x1xf32>
    %115 = vector.broadcast %114 : vector<16x1xf32> to vector<16x16xf32>
    %116 = arith.subf %112, %115 : vector<16x16xf32>
    %117 = math.exp %116 : vector<16x16xf32>
    %cst_51 = arith.constant dense<0.000000e+00> : vector<16xf32>
    %118 = vector.multi_reduction <add>, %117, %cst_51 [1] : vector<16x16xf32> to vector<16xf32>
    %119 = vector.shape_cast %118 : vector<16xf32> to vector<16x1xf32>
    %120 = tpu.reciprocal %119 {approx = true} : vector<16x1xf32> -> vector<16x1xf32>
    %121 = vector.broadcast %120 : vector<16x1xf32> to vector<16x16xf32>
    %122 = arith.mulf %117, %121 : vector<16x16xf32>
    %123 = arith.truncf %122 : vector<16x16xf32> to vector<16x16xbf16>
    %cst_52 = arith.constant dense<0.000000e+00> : vector<16x16xf32>
    %124 = tpu.matmul %123, %108, %cst_52 {dimension_numbers = #tpu.dot_dimension_numbers<[1], [0], [0], [1], [0, 0, 1, 1], [], []>} : vector<16x16xbf16>, vector<16x16xbf16>, vector<16x16xf32> -> vector<16x16xf32>
    %125 = arith.truncf %124 : vector<16x16xf32> to vector<16x16xbf16>
    %126 = vector.extract_strided_slice %49 {offsets = [32, 0], sizes = [16, 64], strides = [1, 1]} : vector<64x64xbf16> to vector<16x64xbf16>
    %cst_53 = arith.constant dense<0.000000e+00> : vector<16x64xf32>
    %127 = tpu.matmul %125, %126, %cst_53 {dimension_numbers = #tpu.dot_dimension_numbers<[1], [0], [0], [1], [0, 0, 1, 1], [], []>} : vector<16x16xbf16>, vector<16x64xbf16>, vector<16x64xf32> -> vector<16x64xf32>
    %128 = arith.addf %102, %127 : vector<16x64xf32>
    %129 = vector.extract_strided_slice %33 {offsets = [0, 48], sizes = [16, 16], strides = [1, 1]} : vector<16x64xf32> to vector<16x16xf32>
    %130 = arith.truncf %129 : vector<16x16xf32> to vector<16x16xbf16>
    %131 = vector.extract_strided_slice %40 {offsets = [0, 48], sizes = [16, 16], strides = [1, 1]} : vector<16x64xf32> to vector<16x16xf32>
    %132 = arith.truncf %131 : vector<16x16xf32> to vector<16x16xbf16>
    %133 = vector.extract_strided_slice %47 {offsets = [0, 48], sizes = [16, 16], strides = [1, 1]} : vector<16x64xf32> to vector<16x16xf32>
    %134 = arith.truncf %133 : vector<16x16xf32> to vector<16x16xbf16>
    %cst_54 = arith.constant dense<0.000000e+00> : vector<16x16xf32>
    %135 = tpu.matmul %130, %132, %cst_54 {dimension_numbers = #tpu.dot_dimension_numbers<[1], [1], [0], [0], [0, 0, 1, 0], [], []>} : vector<16x16xbf16>, vector<16x16xbf16>, vector<16x16xf32> -> vector<16x16xf32>
    %cst_55 = arith.constant 2.500000e-01 : f32
    %136 = vector.broadcast %cst_55 : f32 to vector<16x16xf32>
    %137 = arith.mulf %135, %136 : vector<16x16xf32>
    %138 = arith.addf %137, %25 : vector<16x16xf32>
    %cst_56 = arith.constant dense<0xFF800000> : vector<16xf32>
    %139 = vector.multi_reduction <maximumf>, %138, %cst_56 [1] : vector<16x16xf32> to vector<16xf32>
    %140 = vector.shape_cast %139 : vector<16xf32> to vector<16x1xf32>
    %141 = vector.broadcast %140 : vector<16x1xf32> to vector<16x16xf32>
    %142 = arith.subf %138, %141 : vector<16x16xf32>
    %143 = math.exp %142 : vector<16x16xf32>
    %cst_57 = arith.constant dense<0.000000e+00> : vector<16xf32>
    %144 = vector.multi_reduction <add>, %143, %cst_57 [1] : vector<16x16xf32> to vector<16xf32>
    %145 = vector.shape_cast %144 : vector<16xf32> to vector<16x1xf32>
    %146 = tpu.reciprocal %145 {approx = true} : vector<16x1xf32> -> vector<16x1xf32>
    %147 = vector.broadcast %146 : vector<16x1xf32> to vector<16x16xf32>
    %148 = arith.mulf %143, %147 : vector<16x16xf32>
    %149 = arith.truncf %148 : vector<16x16xf32> to vector<16x16xbf16>
    %cst_58 = arith.constant dense<0.000000e+00> : vector<16x16xf32>
    %150 = tpu.matmul %149, %134, %cst_58 {dimension_numbers = #tpu.dot_dimension_numbers<[1], [0], [0], [1], [0, 0, 1, 1], [], []>} : vector<16x16xbf16>, vector<16x16xbf16>, vector<16x16xf32> -> vector<16x16xf32>
    %151 = arith.truncf %150 : vector<16x16xf32> to vector<16x16xbf16>
    %152 = vector.extract_strided_slice %49 {offsets = [48, 0], sizes = [16, 64], strides = [1, 1]} : vector<64x64xbf16> to vector<16x64xbf16>
    %cst_59 = arith.constant dense<0.000000e+00> : vector<16x64xf32>
    %153 = tpu.matmul %151, %152, %cst_59 {dimension_numbers = #tpu.dot_dimension_numbers<[1], [0], [0], [1], [0, 0, 1, 1], [], []>} : vector<16x16xbf16>, vector<16x64xbf16>, vector<16x64xf32> -> vector<16x64xf32>
    %154 = arith.addf %128, %153 : vector<16x64xf32>
    %c0_60 = arith.constant 0 : index
    %c0_61 = arith.constant 0 : index
    %c0_62 = arith.constant 0 : index
    %155 = vector.load %arg11[%c0_60, %c0_61, %c0_62] : memref<2x1x64xf32, #tpu.memory_space<vmem>>, vector<1x1x64xf32>
    %156 = vector.shape_cast %155 : vector<1x1x64xf32> to vector<1x64xf32>
    %157 = vector.broadcast %156 : vector<1x64xf32> to vector<16x64xf32>
    %158 = arith.addf %154, %157 : vector<16x64xf32>
    %159 = arith.addf %24, %158 : vector<16x64xf32>
    %c0_63 = arith.constant 0 : index
    %c0_64 = arith.constant 0 : index
    %c0_65 = arith.constant 0 : index
    %160 = vector.load %arg12[%c0_63, %c0_64, %c0_65] : memref<2x1x64xf32, #tpu.memory_space<vmem>>, vector<1x1x64xf32>
    %161 = vector.shape_cast %160 : vector<1x1x64xf32> to vector<1x64xf32>
    %c0_66 = arith.constant 0 : index
    %c0_67 = arith.constant 0 : index
    %c0_68 = arith.constant 0 : index
    %162 = vector.load %arg13[%c0_66, %c0_67, %c0_68] : memref<2x1x64xf32, #tpu.memory_space<vmem>>, vector<1x1x64xf32>
    %163 = vector.shape_cast %162 : vector<1x1x64xf32> to vector<1x64xf32>
    %cst_69 = arith.constant dense<0.000000e+00> : vector<16xf32>
    %164 = vector.multi_reduction <add>, %159, %cst_69 [1] : vector<16x64xf32> to vector<16xf32>
    %165 = vector.shape_cast %164 : vector<16xf32> to vector<16x1xf32>
    %cst_70 = arith.constant 6.400000e+01 : f32
    %166 = vector.broadcast %cst_70 : f32 to vector<16x1xf32>
    %167 = arith.divf %165, %166 : vector<16x1xf32>
    %168 = vector.broadcast %167 : vector<16x1xf32> to vector<16x64xf32>
    %169 = arith.subf %159, %168 : vector<16x64xf32>
    %170 = arith.mulf %169, %169 : vector<16x64xf32>
    %cst_71 = arith.constant dense<0.000000e+00> : vector<16xf32>
    %171 = vector.multi_reduction <add>, %170, %cst_71 [1] : vector<16x64xf32> to vector<16xf32>
    %172 = vector.shape_cast %171 : vector<16xf32> to vector<16x1xf32>
    %cst_72 = arith.constant 6.400000e+01 : f32
    %173 = vector.broadcast %cst_72 : f32 to vector<16x1xf32>
    %174 = arith.divf %172, %173 : vector<16x1xf32>
    %175 = vector.broadcast %167 : vector<16x1xf32> to vector<16x64xf32>
    %176 = arith.subf %159, %175 : vector<16x64xf32>
    %cst_73 = arith.constant 9.99999996E-13 : f32
    %177 = vector.broadcast %cst_73 : f32 to vector<16x1xf32>
    %178 = arith.addf %174, %177 : vector<16x1xf32>
    %179 = math.rsqrt %178 : vector<16x1xf32>
    %180 = vector.broadcast %179 : vector<16x1xf32> to vector<16x64xf32>
    %181 = arith.mulf %176, %180 : vector<16x64xf32>
    %182 = vector.broadcast %161 : vector<1x64xf32> to vector<16x64xf32>
    %183 = arith.mulf %181, %182 : vector<16x64xf32>
    %184 = vector.broadcast %163 : vector<1x64xf32> to vector<16x64xf32>
    %185 = arith.addf %183, %184 : vector<16x64xf32>
    %186 = arith.truncf %185 : vector<16x64xf32> to vector<16x64xbf16>
    %c0_74 = arith.constant 0 : index
    %c0_75 = arith.constant 0 : index
    %c0_76 = arith.constant 0 : index
    %187 = vector.load %arg14[%c0_74, %c0_75, %c0_76] : memref<2x64x256xbf16, #tpu.memory_space<vmem>>, vector<1x64x256xbf16>
    %188 = vector.shape_cast %187 : vector<1x64x256xbf16> to vector<64x256xbf16>
    %cst_77 = arith.constant dense<0.000000e+00> : vector<16x256xf32>
    %189 = tpu.matmul %186, %188, %cst_77 {dimension_numbers = #tpu.dot_dimension_numbers<[1], [0], [0], [1], [0, 0, 1, 1], [], []>} : vector<16x64xbf16>, vector<64x256xbf16>, vector<16x256xf32> -> vector<16x256xf32>
    %c0_78 = arith.constant 0 : index
    %c0_79 = arith.constant 0 : index
    %c0_80 = arith.constant 0 : index
    %190 = vector.load %arg15[%c0_78, %c0_79, %c0_80] : memref<2x1x256xf32, #tpu.memory_space<vmem>>, vector<1x1x256xf32>
    %191 = vector.shape_cast %190 : vector<1x1x256xf32> to vector<1x256xf32>
    %192 = vector.broadcast %191 : vector<1x256xf32> to vector<16x256xf32>
    %193 = arith.addf %189, %192 : vector<16x256xf32>
    %cst_81 = arith.constant 5.000000e-01 : f32
    %194 = vector.broadcast %cst_81 : f32 to vector<16x256xf32>
    %195 = arith.mulf %194, %193 : vector<16x256xf32>
    %cst_82 = arith.constant 4.471500e-02 : f32
    %196 = vector.broadcast %cst_82 : f32 to vector<16x256xf32>
    %197 = arith.mulf %196, %193 : vector<16x256xf32>
    %198 = arith.mulf %197, %193 : vector<16x256xf32>
    %199 = arith.mulf %198, %193 : vector<16x256xf32>
    %200 = arith.addf %193, %199 : vector<16x256xf32>
    %cst_83 = arith.constant 0.797884583 : f32
    %201 = vector.broadcast %cst_83 : f32 to vector<16x256xf32>
    %202 = arith.mulf %201, %200 : vector<16x256xf32>
    %203 = math.tanh %202 : vector<16x256xf32>
    %cst_84 = arith.constant 1.000000e+00 : f32
    %204 = vector.broadcast %cst_84 : f32 to vector<16x256xf32>
    %205 = arith.addf %204, %203 : vector<16x256xf32>
    %206 = arith.mulf %195, %205 : vector<16x256xf32>
    %207 = arith.truncf %206 : vector<16x256xf32> to vector<16x256xbf16>
    %c0_85 = arith.constant 0 : index
    %c0_86 = arith.constant 0 : index
    %c0_87 = arith.constant 0 : index
    %208 = vector.load %arg16[%c0_85, %c0_86, %c0_87] : memref<2x256x64xbf16, #tpu.memory_space<vmem>>, vector<1x256x64xbf16>
    %209 = vector.shape_cast %208 : vector<1x256x64xbf16> to vector<256x64xbf16>
    %cst_88 = arith.constant dense<0.000000e+00> : vector<16x64xf32>
    %210 = tpu.matmul %207, %209, %cst_88 {dimension_numbers = #tpu.dot_dimension_numbers<[1], [0], [0], [1], [0, 0, 1, 1], [], []>} : vector<16x256xbf16>, vector<256x64xbf16>, vector<16x64xf32> -> vector<16x64xf32>
    %c0_89 = arith.constant 0 : index
    %c0_90 = arith.constant 0 : index
    %c0_91 = arith.constant 0 : index
    %211 = vector.load %arg17[%c0_89, %c0_90, %c0_91] : memref<2x1x64xf32, #tpu.memory_space<vmem>>, vector<1x1x64xf32>
    %212 = vector.shape_cast %211 : vector<1x1x64xf32> to vector<1x64xf32>
    %213 = vector.broadcast %212 : vector<1x64xf32> to vector<16x64xf32>
    %214 = arith.addf %210, %213 : vector<16x64xf32>
    %215 = arith.addf %185, %214 : vector<16x64xf32>
    %c0_92 = arith.constant 0 : index
    %c0_93 = arith.constant 0 : index
    %c0_94 = arith.constant 0 : index
    %216 = vector.load %arg18[%c0_92, %c0_93, %c0_94] : memref<2x1x64xf32, #tpu.memory_space<vmem>>, vector<1x1x64xf32>
    %217 = vector.shape_cast %216 : vector<1x1x64xf32> to vector<1x64xf32>
    %c0_95 = arith.constant 0 : index
    %c0_96 = arith.constant 0 : index
    %c0_97 = arith.constant 0 : index
    %218 = vector.load %arg19[%c0_95, %c0_96, %c0_97] : memref<2x1x64xf32, #tpu.memory_space<vmem>>, vector<1x1x64xf32>
    %219 = vector.shape_cast %218 : vector<1x1x64xf32> to vector<1x64xf32>
    %cst_98 = arith.constant dense<0.000000e+00> : vector<16xf32>
    %220 = vector.multi_reduction <add>, %215, %cst_98 [1] : vector<16x64xf32> to vector<16xf32>
    %221 = vector.shape_cast %220 : vector<16xf32> to vector<16x1xf32>
    %cst_99 = arith.constant 6.400000e+01 : f32
    %222 = vector.broadcast %cst_99 : f32 to vector<16x1xf32>
    %223 = arith.divf %221, %222 : vector<16x1xf32>
    %224 = vector.broadcast %223 : vector<16x1xf32> to vector<16x64xf32>
    %225 = arith.subf %215, %224 : vector<16x64xf32>
    %226 = arith.mulf %225, %225 : vector<16x64xf32>
    %cst_100 = arith.constant dense<0.000000e+00> : vector<16xf32>
    %227 = vector.multi_reduction <add>, %226, %cst_100 [1] : vector<16x64xf32> to vector<16xf32>
    %228 = vector.shape_cast %227 : vector<16xf32> to vector<16x1xf32>
    %cst_101 = arith.constant 6.400000e+01 : f32
    %229 = vector.broadcast %cst_101 : f32 to vector<16x1xf32>
    %230 = arith.divf %228, %229 : vector<16x1xf32>
    %231 = vector.broadcast %223 : vector<16x1xf32> to vector<16x64xf32>
    %232 = arith.subf %215, %231 : vector<16x64xf32>
    %cst_102 = arith.constant 9.99999996E-13 : f32
    %233 = vector.broadcast %cst_102 : f32 to vector<16x1xf32>
    %234 = arith.addf %230, %233 : vector<16x1xf32>
    %235 = math.rsqrt %234 : vector<16x1xf32>
    %236 = vector.broadcast %235 : vector<16x1xf32> to vector<16x64xf32>
    %237 = arith.mulf %232, %236 : vector<16x64xf32>
    %238 = vector.broadcast %217 : vector<1x64xf32> to vector<16x64xf32>
    %239 = arith.mulf %237, %238 : vector<16x64xf32>
    %240 = vector.broadcast %219 : vector<1x64xf32> to vector<16x64xf32>
    %241 = arith.addf %239, %240 : vector<16x64xf32>
    %242 = arith.truncf %241 : vector<16x64xf32> to vector<16x64xbf16>
    %c1 = arith.constant 1 : index
    %c0_103 = arith.constant 0 : index
    %c0_104 = arith.constant 0 : index
    %243 = vector.load %arg4[%c1, %c0_103, %c0_104] : memref<2x64x64xbf16, #tpu.memory_space<vmem>>, vector<1x64x64xbf16>
    %244 = vector.shape_cast %243 : vector<1x64x64xbf16> to vector<64x64xbf16>
    %cst_105 = arith.constant dense<0.000000e+00> : vector<16x64xf32>
    %245 = tpu.matmul %242, %244, %cst_105 {dimension_numbers = #tpu.dot_dimension_numbers<[1], [0], [0], [1], [0, 0, 1, 1], [], []>} : vector<16x64xbf16>, vector<64x64xbf16>, vector<16x64xf32> -> vector<16x64xf32>
    %c1_106 = arith.constant 1 : index
    %c0_107 = arith.constant 0 : index
    %c0_108 = arith.constant 0 : index
    %246 = vector.load %arg5[%c1_106, %c0_107, %c0_108] : memref<2x1x64xf32, #tpu.memory_space<vmem>>, vector<1x1x64xf32>
    %247 = vector.shape_cast %246 : vector<1x1x64xf32> to vector<1x64xf32>
    %248 = vector.broadcast %247 : vector<1x64xf32> to vector<16x64xf32>
    %249 = arith.addf %245, %248 : vector<16x64xf32>
    %c1_109 = arith.constant 1 : index
    %c0_110 = arith.constant 0 : index
    %c0_111 = arith.constant 0 : index
    %250 = vector.load %arg6[%c1_109, %c0_110, %c0_111] : memref<2x64x64xbf16, #tpu.memory_space<vmem>>, vector<1x64x64xbf16>
    %251 = vector.shape_cast %250 : vector<1x64x64xbf16> to vector<64x64xbf16>
    %cst_112 = arith.constant dense<0.000000e+00> : vector<16x64xf32>
    %252 = tpu.matmul %242, %251, %cst_112 {dimension_numbers = #tpu.dot_dimension_numbers<[1], [0], [0], [1], [0, 0, 1, 1], [], []>} : vector<16x64xbf16>, vector<64x64xbf16>, vector<16x64xf32> -> vector<16x64xf32>
    %c1_113 = arith.constant 1 : index
    %c0_114 = arith.constant 0 : index
    %c0_115 = arith.constant 0 : index
    %253 = vector.load %arg7[%c1_113, %c0_114, %c0_115] : memref<2x1x64xf32, #tpu.memory_space<vmem>>, vector<1x1x64xf32>
    %254 = vector.shape_cast %253 : vector<1x1x64xf32> to vector<1x64xf32>
    %255 = vector.broadcast %254 : vector<1x64xf32> to vector<16x64xf32>
    %256 = arith.addf %252, %255 : vector<16x64xf32>
    %c1_116 = arith.constant 1 : index
    %c0_117 = arith.constant 0 : index
    %c0_118 = arith.constant 0 : index
    %257 = vector.load %arg8[%c1_116, %c0_117, %c0_118] : memref<2x64x64xbf16, #tpu.memory_space<vmem>>, vector<1x64x64xbf16>
    %258 = vector.shape_cast %257 : vector<1x64x64xbf16> to vector<64x64xbf16>
    %cst_119 = arith.constant dense<0.000000e+00> : vector<16x64xf32>
    %259 = tpu.matmul %242, %258, %cst_119 {dimension_numbers = #tpu.dot_dimension_numbers<[1], [0], [0], [1], [0, 0, 1, 1], [], []>} : vector<16x64xbf16>, vector<64x64xbf16>, vector<16x64xf32> -> vector<16x64xf32>
    %c1_120 = arith.constant 1 : index
    %c0_121 = arith.constant 0 : index
    %c0_122 = arith.constant 0 : index
    %260 = vector.load %arg9[%c1_120, %c0_121, %c0_122] : memref<2x1x64xf32, #tpu.memory_space<vmem>>, vector<1x1x64xf32>
    %261 = vector.shape_cast %260 : vector<1x1x64xf32> to vector<1x64xf32>
    %262 = vector.broadcast %261 : vector<1x64xf32> to vector<16x64xf32>
    %263 = arith.addf %259, %262 : vector<16x64xf32>
    %c1_123 = arith.constant 1 : index
    %c0_124 = arith.constant 0 : index
    %c0_125 = arith.constant 0 : index
    %264 = vector.load %arg10[%c1_123, %c0_124, %c0_125] : memref<2x64x64xbf16, #tpu.memory_space<vmem>>, vector<1x64x64xbf16>
    %265 = vector.shape_cast %264 : vector<1x64x64xbf16> to vector<64x64xbf16>
    %cst_126 = arith.constant 0.000000e+00 : f32
    %266 = vector.broadcast %cst_126 : f32 to vector<16x64xf32>
    %267 = vector.extract_strided_slice %249 {offsets = [0, 0], sizes = [16, 16], strides = [1, 1]} : vector<16x64xf32> to vector<16x16xf32>
    %268 = arith.truncf %267 : vector<16x16xf32> to vector<16x16xbf16>
    %269 = vector.extract_strided_slice %256 {offsets = [0, 0], sizes = [16, 16], strides = [1, 1]} : vector<16x64xf32> to vector<16x16xf32>
    %270 = arith.truncf %269 : vector<16x16xf32> to vector<16x16xbf16>
    %271 = vector.extract_strided_slice %263 {offsets = [0, 0], sizes = [16, 16], strides = [1, 1]} : vector<16x64xf32> to vector<16x16xf32>
    %272 = arith.truncf %271 : vector<16x16xf32> to vector<16x16xbf16>
    %cst_127 = arith.constant dense<0.000000e+00> : vector<16x16xf32>
    %273 = tpu.matmul %268, %270, %cst_127 {dimension_numbers = #tpu.dot_dimension_numbers<[1], [1], [0], [0], [0, 0, 1, 0], [], []>} : vector<16x16xbf16>, vector<16x16xbf16>, vector<16x16xf32> -> vector<16x16xf32>
    %cst_128 = arith.constant 2.500000e-01 : f32
    %274 = vector.broadcast %cst_128 : f32 to vector<16x16xf32>
    %275 = arith.mulf %273, %274 : vector<16x16xf32>
    %276 = arith.addf %275, %25 : vector<16x16xf32>
    %cst_129 = arith.constant dense<0xFF800000> : vector<16xf32>
    %277 = vector.multi_reduction <maximumf>, %276, %cst_129 [1] : vector<16x16xf32> to vector<16xf32>
    %278 = vector.shape_cast %277 : vector<16xf32> to vector<16x1xf32>
    %279 = vector.broadcast %278 : vector<16x1xf32> to vector<16x16xf32>
    %280 = arith.subf %276, %279 : vector<16x16xf32>
    %281 = math.exp %280 : vector<16x16xf32>
    %cst_130 = arith.constant dense<0.000000e+00> : vector<16xf32>
    %282 = vector.multi_reduction <add>, %281, %cst_130 [1] : vector<16x16xf32> to vector<16xf32>
    %283 = vector.shape_cast %282 : vector<16xf32> to vector<16x1xf32>
    %284 = tpu.reciprocal %283 {approx = true} : vector<16x1xf32> -> vector<16x1xf32>
    %285 = vector.broadcast %284 : vector<16x1xf32> to vector<16x16xf32>
    %286 = arith.mulf %281, %285 : vector<16x16xf32>
    %287 = arith.truncf %286 : vector<16x16xf32> to vector<16x16xbf16>
    %cst_131 = arith.constant dense<0.000000e+00> : vector<16x16xf32>
    %288 = tpu.matmul %287, %272, %cst_131 {dimension_numbers = #tpu.dot_dimension_numbers<[1], [0], [0], [1], [0, 0, 1, 1], [], []>} : vector<16x16xbf16>, vector<16x16xbf16>, vector<16x16xf32> -> vector<16x16xf32>
    %289 = arith.truncf %288 : vector<16x16xf32> to vector<16x16xbf16>
    %290 = vector.extract_strided_slice %265 {offsets = [0, 0], sizes = [16, 64], strides = [1, 1]} : vector<64x64xbf16> to vector<16x64xbf16>
    %cst_132 = arith.constant dense<0.000000e+00> : vector<16x64xf32>
    %291 = tpu.matmul %289, %290, %cst_132 {dimension_numbers = #tpu.dot_dimension_numbers<[1], [0], [0], [1], [0, 0, 1, 1], [], []>} : vector<16x16xbf16>, vector<16x64xbf16>, vector<16x64xf32> -> vector<16x64xf32>
    %292 = arith.addf %266, %291 : vector<16x64xf32>
    %293 = vector.extract_strided_slice %249 {offsets = [0, 16], sizes = [16, 16], strides = [1, 1]} : vector<16x64xf32> to vector<16x16xf32>
    %294 = arith.truncf %293 : vector<16x16xf32> to vector<16x16xbf16>
    %295 = vector.extract_strided_slice %256 {offsets = [0, 16], sizes = [16, 16], strides = [1, 1]} : vector<16x64xf32> to vector<16x16xf32>
    %296 = arith.truncf %295 : vector<16x16xf32> to vector<16x16xbf16>
    %297 = vector.extract_strided_slice %263 {offsets = [0, 16], sizes = [16, 16], strides = [1, 1]} : vector<16x64xf32> to vector<16x16xf32>
    %298 = arith.truncf %297 : vector<16x16xf32> to vector<16x16xbf16>
    %cst_133 = arith.constant dense<0.000000e+00> : vector<16x16xf32>
    %299 = tpu.matmul %294, %296, %cst_133 {dimension_numbers = #tpu.dot_dimension_numbers<[1], [1], [0], [0], [0, 0, 1, 0], [], []>} : vector<16x16xbf16>, vector<16x16xbf16>, vector<16x16xf32> -> vector<16x16xf32>
    %cst_134 = arith.constant 2.500000e-01 : f32
    %300 = vector.broadcast %cst_134 : f32 to vector<16x16xf32>
    %301 = arith.mulf %299, %300 : vector<16x16xf32>
    %302 = arith.addf %301, %25 : vector<16x16xf32>
    %cst_135 = arith.constant dense<0xFF800000> : vector<16xf32>
    %303 = vector.multi_reduction <maximumf>, %302, %cst_135 [1] : vector<16x16xf32> to vector<16xf32>
    %304 = vector.shape_cast %303 : vector<16xf32> to vector<16x1xf32>
    %305 = vector.broadcast %304 : vector<16x1xf32> to vector<16x16xf32>
    %306 = arith.subf %302, %305 : vector<16x16xf32>
    %307 = math.exp %306 : vector<16x16xf32>
    %cst_136 = arith.constant dense<0.000000e+00> : vector<16xf32>
    %308 = vector.multi_reduction <add>, %307, %cst_136 [1] : vector<16x16xf32> to vector<16xf32>
    %309 = vector.shape_cast %308 : vector<16xf32> to vector<16x1xf32>
    %310 = tpu.reciprocal %309 {approx = true} : vector<16x1xf32> -> vector<16x1xf32>
    %311 = vector.broadcast %310 : vector<16x1xf32> to vector<16x16xf32>
    %312 = arith.mulf %307, %311 : vector<16x16xf32>
    %313 = arith.truncf %312 : vector<16x16xf32> to vector<16x16xbf16>
    %cst_137 = arith.constant dense<0.000000e+00> : vector<16x16xf32>
    %314 = tpu.matmul %313, %298, %cst_137 {dimension_numbers = #tpu.dot_dimension_numbers<[1], [0], [0], [1], [0, 0, 1, 1], [], []>} : vector<16x16xbf16>, vector<16x16xbf16>, vector<16x16xf32> -> vector<16x16xf32>
    %315 = arith.truncf %314 : vector<16x16xf32> to vector<16x16xbf16>
    %316 = vector.extract_strided_slice %265 {offsets = [16, 0], sizes = [16, 64], strides = [1, 1]} : vector<64x64xbf16> to vector<16x64xbf16>
    %cst_138 = arith.constant dense<0.000000e+00> : vector<16x64xf32>
    %317 = tpu.matmul %315, %316, %cst_138 {dimension_numbers = #tpu.dot_dimension_numbers<[1], [0], [0], [1], [0, 0, 1, 1], [], []>} : vector<16x16xbf16>, vector<16x64xbf16>, vector<16x64xf32> -> vector<16x64xf32>
    %318 = arith.addf %292, %317 : vector<16x64xf32>
    %319 = vector.extract_strided_slice %249 {offsets = [0, 32], sizes = [16, 16], strides = [1, 1]} : vector<16x64xf32> to vector<16x16xf32>
    %320 = arith.truncf %319 : vector<16x16xf32> to vector<16x16xbf16>
    %321 = vector.extract_strided_slice %256 {offsets = [0, 32], sizes = [16, 16], strides = [1, 1]} : vector<16x64xf32> to vector<16x16xf32>
    %322 = arith.truncf %321 : vector<16x16xf32> to vector<16x16xbf16>
    %323 = vector.extract_strided_slice %263 {offsets = [0, 32], sizes = [16, 16], strides = [1, 1]} : vector<16x64xf32> to vector<16x16xf32>
    %324 = arith.truncf %323 : vector<16x16xf32> to vector<16x16xbf16>
    %cst_139 = arith.constant dense<0.000000e+00> : vector<16x16xf32>
    %325 = tpu.matmul %320, %322, %cst_139 {dimension_numbers = #tpu.dot_dimension_numbers<[1], [1], [0], [0], [0, 0, 1, 0], [], []>} : vector<16x16xbf16>, vector<16x16xbf16>, vector<16x16xf32> -> vector<16x16xf32>
    %cst_140 = arith.constant 2.500000e-01 : f32
    %326 = vector.broadcast %cst_140 : f32 to vector<16x16xf32>
    %327 = arith.mulf %325, %326 : vector<16x16xf32>
    %328 = arith.addf %327, %25 : vector<16x16xf32>
    %cst_141 = arith.constant dense<0xFF800000> : vector<16xf32>
    %329 = vector.multi_reduction <maximumf>, %328, %cst_141 [1] : vector<16x16xf32> to vector<16xf32>
    %330 = vector.shape_cast %329 : vector<16xf32> to vector<16x1xf32>
    %331 = vector.broadcast %330 : vector<16x1xf32> to vector<16x16xf32>
    %332 = arith.subf %328, %331 : vector<16x16xf32>
    %333 = math.exp %332 : vector<16x16xf32>
    %cst_142 = arith.constant dense<0.000000e+00> : vector<16xf32>
    %334 = vector.multi_reduction <add>, %333, %cst_142 [1] : vector<16x16xf32> to vector<16xf32>
    %335 = vector.shape_cast %334 : vector<16xf32> to vector<16x1xf32>
    %336 = tpu.reciprocal %335 {approx = true} : vector<16x1xf32> -> vector<16x1xf32>
    %337 = vector.broadcast %336 : vector<16x1xf32> to vector<16x16xf32>
    %338 = arith.mulf %333, %337 : vector<16x16xf32>
    %339 = arith.truncf %338 : vector<16x16xf32> to vector<16x16xbf16>
    %cst_143 = arith.constant dense<0.000000e+00> : vector<16x16xf32>
    %340 = tpu.matmul %339, %324, %cst_143 {dimension_numbers = #tpu.dot_dimension_numbers<[1], [0], [0], [1], [0, 0, 1, 1], [], []>} : vector<16x16xbf16>, vector<16x16xbf16>, vector<16x16xf32> -> vector<16x16xf32>
    %341 = arith.truncf %340 : vector<16x16xf32> to vector<16x16xbf16>
    %342 = vector.extract_strided_slice %265 {offsets = [32, 0], sizes = [16, 64], strides = [1, 1]} : vector<64x64xbf16> to vector<16x64xbf16>
    %cst_144 = arith.constant dense<0.000000e+00> : vector<16x64xf32>
    %343 = tpu.matmul %341, %342, %cst_144 {dimension_numbers = #tpu.dot_dimension_numbers<[1], [0], [0], [1], [0, 0, 1, 1], [], []>} : vector<16x16xbf16>, vector<16x64xbf16>, vector<16x64xf32> -> vector<16x64xf32>
    %344 = arith.addf %318, %343 : vector<16x64xf32>
    %345 = vector.extract_strided_slice %249 {offsets = [0, 48], sizes = [16, 16], strides = [1, 1]} : vector<16x64xf32> to vector<16x16xf32>
    %346 = arith.truncf %345 : vector<16x16xf32> to vector<16x16xbf16>
    %347 = vector.extract_strided_slice %256 {offsets = [0, 48], sizes = [16, 16], strides = [1, 1]} : vector<16x64xf32> to vector<16x16xf32>
    %348 = arith.truncf %347 : vector<16x16xf32> to vector<16x16xbf16>
    %349 = vector.extract_strided_slice %263 {offsets = [0, 48], sizes = [16, 16], strides = [1, 1]} : vector<16x64xf32> to vector<16x16xf32>
    %350 = arith.truncf %349 : vector<16x16xf32> to vector<16x16xbf16>
    %cst_145 = arith.constant dense<0.000000e+00> : vector<16x16xf32>
    %351 = tpu.matmul %346, %348, %cst_145 {dimension_numbers = #tpu.dot_dimension_numbers<[1], [1], [0], [0], [0, 0, 1, 0], [], []>} : vector<16x16xbf16>, vector<16x16xbf16>, vector<16x16xf32> -> vector<16x16xf32>
    %cst_146 = arith.constant 2.500000e-01 : f32
    %352 = vector.broadcast %cst_146 : f32 to vector<16x16xf32>
    %353 = arith.mulf %351, %352 : vector<16x16xf32>
    %354 = arith.addf %353, %25 : vector<16x16xf32>
    %cst_147 = arith.constant dense<0xFF800000> : vector<16xf32>
    %355 = vector.multi_reduction <maximumf>, %354, %cst_147 [1] : vector<16x16xf32> to vector<16xf32>
    %356 = vector.shape_cast %355 : vector<16xf32> to vector<16x1xf32>
    %357 = vector.broadcast %356 : vector<16x1xf32> to vector<16x16xf32>
    %358 = arith.subf %354, %357 : vector<16x16xf32>
    %359 = math.exp %358 : vector<16x16xf32>
    %cst_148 = arith.constant dense<0.000000e+00> : vector<16xf32>
    %360 = vector.multi_reduction <add>, %359, %cst_148 [1] : vector<16x16xf32> to vector<16xf32>
    %361 = vector.shape_cast %360 : vector<16xf32> to vector<16x1xf32>
    %362 = tpu.reciprocal %361 {approx = true} : vector<16x1xf32> -> vector<16x1xf32>
    %363 = vector.broadcast %362 : vector<16x1xf32> to vector<16x16xf32>
    %364 = arith.mulf %359, %363 : vector<16x16xf32>
    %365 = arith.truncf %364 : vector<16x16xf32> to vector<16x16xbf16>
    %cst_149 = arith.constant dense<0.000000e+00> : vector<16x16xf32>
    %366 = tpu.matmul %365, %350, %cst_149 {dimension_numbers = #tpu.dot_dimension_numbers<[1], [0], [0], [1], [0, 0, 1, 1], [], []>} : vector<16x16xbf16>, vector<16x16xbf16>, vector<16x16xf32> -> vector<16x16xf32>
    %367 = arith.truncf %366 : vector<16x16xf32> to vector<16x16xbf16>
    %368 = vector.extract_strided_slice %265 {offsets = [48, 0], sizes = [16, 64], strides = [1, 1]} : vector<64x64xbf16> to vector<16x64xbf16>
    %cst_150 = arith.constant dense<0.000000e+00> : vector<16x64xf32>
    %369 = tpu.matmul %367, %368, %cst_150 {dimension_numbers = #tpu.dot_dimension_numbers<[1], [0], [0], [1], [0, 0, 1, 1], [], []>} : vector<16x16xbf16>, vector<16x64xbf16>, vector<16x64xf32> -> vector<16x64xf32>
    %370 = arith.addf %344, %369 : vector<16x64xf32>
    %c1_151 = arith.constant 1 : index
    %c0_152 = arith.constant 0 : index
    %c0_153 = arith.constant 0 : index
    %371 = vector.load %arg11[%c1_151, %c0_152, %c0_153] : memref<2x1x64xf32, #tpu.memory_space<vmem>>, vector<1x1x64xf32>
    %372 = vector.shape_cast %371 : vector<1x1x64xf32> to vector<1x64xf32>
    %373 = vector.broadcast %372 : vector<1x64xf32> to vector<16x64xf32>
    %374 = arith.addf %370, %373 : vector<16x64xf32>
    %375 = arith.addf %241, %374 : vector<16x64xf32>
    %c1_154 = arith.constant 1 : index
    %c0_155 = arith.constant 0 : index
    %c0_156 = arith.constant 0 : index
    %376 = vector.load %arg12[%c1_154, %c0_155, %c0_156] : memref<2x1x64xf32, #tpu.memory_space<vmem>>, vector<1x1x64xf32>
    %377 = vector.shape_cast %376 : vector<1x1x64xf32> to vector<1x64xf32>
    %c1_157 = arith.constant 1 : index
    %c0_158 = arith.constant 0 : index
    %c0_159 = arith.constant 0 : index
    %378 = vector.load %arg13[%c1_157, %c0_158, %c0_159] : memref<2x1x64xf32, #tpu.memory_space<vmem>>, vector<1x1x64xf32>
    %379 = vector.shape_cast %378 : vector<1x1x64xf32> to vector<1x64xf32>
    %cst_160 = arith.constant dense<0.000000e+00> : vector<16xf32>
    %380 = vector.multi_reduction <add>, %375, %cst_160 [1] : vector<16x64xf32> to vector<16xf32>
    %381 = vector.shape_cast %380 : vector<16xf32> to vector<16x1xf32>
    %cst_161 = arith.constant 6.400000e+01 : f32
    %382 = vector.broadcast %cst_161 : f32 to vector<16x1xf32>
    %383 = arith.divf %381, %382 : vector<16x1xf32>
    %384 = vector.broadcast %383 : vector<16x1xf32> to vector<16x64xf32>
    %385 = arith.subf %375, %384 : vector<16x64xf32>
    %386 = arith.mulf %385, %385 : vector<16x64xf32>
    %cst_162 = arith.constant dense<0.000000e+00> : vector<16xf32>
    %387 = vector.multi_reduction <add>, %386, %cst_162 [1] : vector<16x64xf32> to vector<16xf32>
    %388 = vector.shape_cast %387 : vector<16xf32> to vector<16x1xf32>
    %cst_163 = arith.constant 6.400000e+01 : f32
    %389 = vector.broadcast %cst_163 : f32 to vector<16x1xf32>
    %390 = arith.divf %388, %389 : vector<16x1xf32>
    %391 = vector.broadcast %383 : vector<16x1xf32> to vector<16x64xf32>
    %392 = arith.subf %375, %391 : vector<16x64xf32>
    %cst_164 = arith.constant 9.99999996E-13 : f32
    %393 = vector.broadcast %cst_164 : f32 to vector<16x1xf32>
    %394 = arith.addf %390, %393 : vector<16x1xf32>
    %395 = math.rsqrt %394 : vector<16x1xf32>
    %396 = vector.broadcast %395 : vector<16x1xf32> to vector<16x64xf32>
    %397 = arith.mulf %392, %396 : vector<16x64xf32>
    %398 = vector.broadcast %377 : vector<1x64xf32> to vector<16x64xf32>
    %399 = arith.mulf %397, %398 : vector<16x64xf32>
    %400 = vector.broadcast %379 : vector<1x64xf32> to vector<16x64xf32>
    %401 = arith.addf %399, %400 : vector<16x64xf32>
    %402 = arith.truncf %401 : vector<16x64xf32> to vector<16x64xbf16>
    %c1_165 = arith.constant 1 : index
    %c0_166 = arith.constant 0 : index
    %c0_167 = arith.constant 0 : index
    %403 = vector.load %arg14[%c1_165, %c0_166, %c0_167] : memref<2x64x256xbf16, #tpu.memory_space<vmem>>, vector<1x64x256xbf16>
    %404 = vector.shape_cast %403 : vector<1x64x256xbf16> to vector<64x256xbf16>
    %cst_168 = arith.constant dense<0.000000e+00> : vector<16x256xf32>
    %405 = tpu.matmul %402, %404, %cst_168 {dimension_numbers = #tpu.dot_dimension_numbers<[1], [0], [0], [1], [0, 0, 1, 1], [], []>} : vector<16x64xbf16>, vector<64x256xbf16>, vector<16x256xf32> -> vector<16x256xf32>
    %c1_169 = arith.constant 1 : index
    %c0_170 = arith.constant 0 : index
    %c0_171 = arith.constant 0 : index
    %406 = vector.load %arg15[%c1_169, %c0_170, %c0_171] : memref<2x1x256xf32, #tpu.memory_space<vmem>>, vector<1x1x256xf32>
    %407 = vector.shape_cast %406 : vector<1x1x256xf32> to vector<1x256xf32>
    %408 = vector.broadcast %407 : vector<1x256xf32> to vector<16x256xf32>
    %409 = arith.addf %405, %408 : vector<16x256xf32>
    %cst_172 = arith.constant 5.000000e-01 : f32
    %410 = vector.broadcast %cst_172 : f32 to vector<16x256xf32>
    %411 = arith.mulf %410, %409 : vector<16x256xf32>
    %cst_173 = arith.constant 4.471500e-02 : f32
    %412 = vector.broadcast %cst_173 : f32 to vector<16x256xf32>
    %413 = arith.mulf %412, %409 : vector<16x256xf32>
    %414 = arith.mulf %413, %409 : vector<16x256xf32>
    %415 = arith.mulf %414, %409 : vector<16x256xf32>
    %416 = arith.addf %409, %415 : vector<16x256xf32>
    %cst_174 = arith.constant 0.797884583 : f32
    %417 = vector.broadcast %cst_174 : f32 to vector<16x256xf32>
    %418 = arith.mulf %417, %416 : vector<16x256xf32>
    %419 = math.tanh %418 : vector<16x256xf32>
    %cst_175 = arith.constant 1.000000e+00 : f32
    %420 = vector.broadcast %cst_175 : f32 to vector<16x256xf32>
    %421 = arith.addf %420, %419 : vector<16x256xf32>
    %422 = arith.mulf %411, %421 : vector<16x256xf32>
    %423 = arith.truncf %422 : vector<16x256xf32> to vector<16x256xbf16>
    %c1_176 = arith.constant 1 : index
    %c0_177 = arith.constant 0 : index
    %c0_178 = arith.constant 0 : index
    %424 = vector.load %arg16[%c1_176, %c0_177, %c0_178] : memref<2x256x64xbf16, #tpu.memory_space<vmem>>, vector<1x256x64xbf16>
    %425 = vector.shape_cast %424 : vector<1x256x64xbf16> to vector<256x64xbf16>
    %cst_179 = arith.constant dense<0.000000e+00> : vector<16x64xf32>
    %426 = tpu.matmul %423, %425, %cst_179 {dimension_numbers = #tpu.dot_dimension_numbers<[1], [0], [0], [1], [0, 0, 1, 1], [], []>} : vector<16x256xbf16>, vector<256x64xbf16>, vector<16x64xf32> -> vector<16x64xf32>
    %c1_180 = arith.constant 1 : index
    %c0_181 = arith.constant 0 : index
    %c0_182 = arith.constant 0 : index
    %427 = vector.load %arg17[%c1_180, %c0_181, %c0_182] : memref<2x1x64xf32, #tpu.memory_space<vmem>>, vector<1x1x64xf32>
    %428 = vector.shape_cast %427 : vector<1x1x64xf32> to vector<1x64xf32>
    %429 = vector.broadcast %428 : vector<1x64xf32> to vector<16x64xf32>
    %430 = arith.addf %426, %429 : vector<16x64xf32>
    %431 = arith.addf %401, %430 : vector<16x64xf32>
    %c1_183 = arith.constant 1 : index
    %c0_184 = arith.constant 0 : index
    %c0_185 = arith.constant 0 : index
    %432 = vector.load %arg18[%c1_183, %c0_184, %c0_185] : memref<2x1x64xf32, #tpu.memory_space<vmem>>, vector<1x1x64xf32>
    %433 = vector.shape_cast %432 : vector<1x1x64xf32> to vector<1x64xf32>
    %c1_186 = arith.constant 1 : index
    %c0_187 = arith.constant 0 : index
    %c0_188 = arith.constant 0 : index
    %434 = vector.load %arg19[%c1_186, %c0_187, %c0_188] : memref<2x1x64xf32, #tpu.memory_space<vmem>>, vector<1x1x64xf32>
    %435 = vector.shape_cast %434 : vector<1x1x64xf32> to vector<1x64xf32>
    %cst_189 = arith.constant dense<0.000000e+00> : vector<16xf32>
    %436 = vector.multi_reduction <add>, %431, %cst_189 [1] : vector<16x64xf32> to vector<16xf32>
    %437 = vector.shape_cast %436 : vector<16xf32> to vector<16x1xf32>
    %cst_190 = arith.constant 6.400000e+01 : f32
    %438 = vector.broadcast %cst_190 : f32 to vector<16x1xf32>
    %439 = arith.divf %437, %438 : vector<16x1xf32>
    %440 = vector.broadcast %439 : vector<16x1xf32> to vector<16x64xf32>
    %441 = arith.subf %431, %440 : vector<16x64xf32>
    %442 = arith.mulf %441, %441 : vector<16x64xf32>
    %cst_191 = arith.constant dense<0.000000e+00> : vector<16xf32>
    %443 = vector.multi_reduction <add>, %442, %cst_191 [1] : vector<16x64xf32> to vector<16xf32>
    %444 = vector.shape_cast %443 : vector<16xf32> to vector<16x1xf32>
    %cst_192 = arith.constant 6.400000e+01 : f32
    %445 = vector.broadcast %cst_192 : f32 to vector<16x1xf32>
    %446 = arith.divf %444, %445 : vector<16x1xf32>
    %447 = vector.broadcast %439 : vector<16x1xf32> to vector<16x64xf32>
    %448 = arith.subf %431, %447 : vector<16x64xf32>
    %cst_193 = arith.constant 9.99999996E-13 : f32
    %449 = vector.broadcast %cst_193 : f32 to vector<16x1xf32>
    %450 = arith.addf %446, %449 : vector<16x1xf32>
    %451 = math.rsqrt %450 : vector<16x1xf32>
    %452 = vector.broadcast %451 : vector<16x1xf32> to vector<16x64xf32>
    %453 = arith.mulf %448, %452 : vector<16x64xf32>
    %454 = vector.broadcast %433 : vector<1x64xf32> to vector<16x64xf32>
    %455 = arith.mulf %453, %454 : vector<16x64xf32>
    %456 = vector.broadcast %435 : vector<1x64xf32> to vector<16x64xf32>
    %457 = arith.addf %455, %456 : vector<16x64xf32>
    %458 = arith.truncf %457 : vector<16x64xf32> to vector<16x64xbf16>
    %c0_194 = arith.constant 0 : index
    %c0_195 = arith.constant 0 : index
    %459 = vector.load %arg20[%c0_194, %c0_195] : memref<64x64xbf16, #tpu.memory_space<vmem>>, vector<64x64xbf16>
    %cst_196 = arith.constant dense<0.000000e+00> : vector<16x64xf32>
    %460 = tpu.matmul %458, %459, %cst_196 {dimension_numbers = #tpu.dot_dimension_numbers<[1], [0], [0], [1], [0, 0, 1, 1], [], []>} : vector<16x64xbf16>, vector<64x64xbf16>, vector<16x64xf32> -> vector<16x64xf32>
    %c0_197 = arith.constant 0 : index
    %c0_198 = arith.constant 0 : index
    %461 = vector.load %arg21[%c0_197, %c0_198] : memref<1x64xf32, #tpu.memory_space<vmem>>, vector<1x64xf32>
    %462 = vector.broadcast %461 : vector<1x64xf32> to vector<16x64xf32>
    %463 = arith.addf %460, %462 : vector<16x64xf32>
    %464 = math.tanh %463 : vector<16x64xf32>
    %465 = arith.truncf %464 : vector<16x64xf32> to vector<16x64xbf16>
    %c0_199 = arith.constant 0 : index
    %c0_200 = arith.constant 0 : index
    %466 = vector.load %arg22[%c0_199, %c0_200] : memref<64x128xbf16, #tpu.memory_space<vmem>>, vector<64x128xbf16>
    %cst_201 = arith.constant dense<0.000000e+00> : vector<16x128xf32>
    %467 = tpu.matmul %465, %466, %cst_201 {dimension_numbers = #tpu.dot_dimension_numbers<[1], [0], [0], [1], [0, 0, 1, 1], [], []>} : vector<16x64xbf16>, vector<64x128xbf16>, vector<16x128xf32> -> vector<16x128xf32>
    %c0_202 = arith.constant 0 : index
    %c0_203 = arith.constant 0 : index
    %468 = vector.load %arg23[%c0_202, %c0_203] : memref<1x128xf32, #tpu.memory_space<vmem>>, vector<1x128xf32>
    %469 = vector.broadcast %468 : vector<1x128xf32> to vector<16x128xf32>
    %470 = arith.addf %467, %469 : vector<16x128xf32>
    %c0_204 = arith.constant 0 : index
    %c0_205 = arith.constant 0 : index
    %471 = vector.load %arg24[%c0_204, %c0_205] : memref<16x128xf32, #tpu.memory_space<vmem>>, vector<16x128xf32>
    tpu.vector_store %arg24[%c0_204, %c0_205], %470 {strides = array<i32>} : memref<16x128xf32, #tpu.memory_space<vmem>>, vector<16x128xf32>,
    return
  }
}

</mosaic_0001>

<bundles_post_ra>
// kernel: tpu_custom_call.1
= control target key start
LH: loop header
LB: loop body
LE: loop exit
PB: predicated region body
PF: predicated region fallthrough
CT: control target
= control target key end

     0   :  { %s5429_s0 = inlined_call_operand.hbm [shape: f32[16,64], index: 0, kind: input, shape index: {}]   ;;  %s5430_s1 = inlined_call_operand.hbm [shape: f32[16,16], index: 1, kind: input, shape index: {}]   ;;  %s5431_s2 = inlined_call_operand.hbm [shape: f32[1,64], index: 2, kind: input, shape index: {}]   ;;  %s5432_s3 = inlined_call_operand.hbm [shape: f32[1,64], index: 3, kind: input, shape index: {}]   ;;  %s5433_s4 = inlined_call_operand.vmem [shape: bf16[2,64,64], index: 4, kind: input, shape index: {}]   ;;  %s5434_s5 = inlined_call_operand.hbm [shape: f32[2,1,64], index: 5, kind: input, shape index: {}]   ;;  %s5435_s6 = inlined_call_operand.vmem [shape: bf16[2,64,64], index: 6, kind: input, shape index: {}]   ;;  %s5436_s7 = inlined_call_operand.hbm [shape: f32[2,1,64], index: 7, kind: input, shape index: {}]   ;;  %s5437_s8 = inlined_call_operand.vmem [shape: bf16[2,64,64], index: 8, kind: input, shape index: {}]   ;;  %s5438_s9 = inlined_call_operand.hbm [shape: f32[2,1,64], index: 9, kind: input, shape index: {}]   ;;  %s5439_s10 = inlined_call_operand.vmem [shape: bf16[2,64,64], index: 10, kind: input, shape index: {}]   ;;  %s5440_s11 = inlined_call_operand.hbm [shape: f32[2,1,64], index: 11, kind: input, shape index: {}]   ;;  %s5441_s12 = inlined_call_operand.hbm [shape: f32[2,1,64], index: 12, kind: input, shape index: {}]   ;;  %s5442_s13 = inlined_call_operand.hbm [shape: f32[2,1,64], index: 13, kind: input, shape index: {}]   ;;  %s5443_s14 = inlined_call_operand.vmem [shape: bf16[2,64,256], index: 14, kind: input, shape index: {}]   ;;  %s5444_s15 = inlined_call_operand.vmem [shape: f32[2,1,256], index: 15, kind: input, shape index: {}]   ;;  %s5445_s16 = inlined_call_operand.vmem [shape: bf16[2,256,64], index: 16, kind: input, shape index: {}]   ;;  %s5446_s17 = inlined_call_operand.hbm [shape: f32[2,1,64], index: 17, kind: input, shape index: {}]   ;;  %s5447_s18 = inlined_call_operand.hbm [shape: f32[2,1,64], index: 18, kind: input, shape index: {}]   ;;  %s5448_s19 = inlined_call_operand.hbm [shape: f32[2,1,64], index: 19, kind: input, shape index: {}]   ;;  %s5449_s20 = inlined_call_operand.vmem [shape: bf16[64,64], index: 20, kind: input, shape index: {}]   ;;  %s5450_s21 = inlined_call_operand.vmem [shape: f32[1,64], index: 21, kind: input, shape index: {}]   ;;  %s5451_s22 = inlined_call_operand.vmem [shape: bf16[64,128], index: 22, kind: input, shape index: {}]   ;;  %s5452_s23 = inlined_call_operand.vmem [shape: f32[1,128], index: 23, kind: input, shape index: {}]   ;;  %s5453_s24 = inlined_call_operand.hbm [shape: f32[16,128], index: 24, kind: output, shape index: {}]  }
   0x1   :  { %5470 = sst [smem:[#allocation32_spill]] %s5429_s0 }
   0x2   :  { %5471 = sst [smem:[#allocation33_spill]] %s5430_s1 }
   0x3   :  { %5472 = sst [smem:[#allocation34_spill]] %s5431_s2 }
   0x4   :  { %5473 = sst [smem:[#allocation35_spill]] %s5432_s3 }
   0x5   :  { %5474 = sst [smem:[#allocation36_spill]] %s5433_s4 }
   0x6   :  { %5475 = sst [smem:[#allocation37_spill]] %s5434_s5 }
   0x7   :  { %5476 = sst [smem:[#allocation38_spill]] %s5435_s6 }
   0x8   :  { %5477 = sst [smem:[#allocation39_spill]] %s5436_s7 }
   0x9   :  { %5478 = sst [smem:[#allocation40_spill]] %s5437_s8 }
   0xa   :  { %5479 = sst [smem:[#allocation41_spill]] %s5453_s24 }
   0xb   :  { %29 = vsyncpa [#allocation3], 0 }
   0xc   :  { %30 = vsyncpa [#allocation6], 0 }
   0xd   :  { %31 = vsyncpa [#allocation9], 0 }
   0xe   :  { %32 = vsyncpa [#allocation12], 0 }
   0xf   :  { %33 = vsyncpa [#allocation15], 0 }
  0x10   :  { %34 = vsyncpa [#allocation18], 0 }
  0x11   :  { %35 = vsyncpa [#allocation21], 0 }
  0x12   :  { %36 = vsyncpa [#allocation4], 0  ;;  %s4414_s5 = smov [#allocation5]   ;;  %s4415_s27 = smov [#allocation8]  }
  0x13   :  { %s54_s26 = sshll.u32 %s4414_s5, 4  ;;  %s77_s28 = sshll.u32 %s4415_s27, 4  ;;  %s55_s26 = int_to_ptr.vmem [resolvable:$true] %s54_s26  ;;  %s4563_s28 = int_to_ptr.vmem [resolvable:$true] %s77_s28 }
  0x14   :  { %s5480_s29 = sld [smem:[#allocation33_spill]] }
  0x1a   :  { %s4090_s0 = scalar_lea.hbm %s5480_s29, 256 }
  0x1b   :  { %p4091_p0 = scmp.ne.s32.totalorder %s5480_s29, %s4090_s0  ;;  %p4094_p1 = scmp.lt.u32.totalorder %s4090_s0, %s5480_s29 }
  0x1d   :  { %p4096_p2 = pnand %p4094_p1, %p4091_p0 }
  0x1f   :  { %4099 = shalt.err (!%p4096_p2)
}
  0x20   :  { %s4100_s8 = scalar_lea.vmem %s55_s26, 256  ;;  %p4105_p4 = scmp.lt.s32.totalorder %s55_s26, %s55_s26 }
  0x21   :  { %p4101_p3 = scmp.ne.s32.totalorder %s55_s26, %s4100_s8  ;;  %p4106_p5 = scmp.lt.s32.totalorder %s4100_s8, %s4100_s8 }
  0x23   :  { %p4107_p6 = por %p4106_p5, %p4105_p4 }
  0x25   :  { %p4108_p7 = pnand %p4107_p6, %p4101_p3 }
  0x27   :  { %4111 = shalt.err (!%p4108_p7)
}
  0x28   :  { %s5463_s4 = smov 128   ;;  %s5465_s1 = smov 8  }
  0x29   :  { %60 = dma.hbm_to_vmem [thread:$0]  %s5480_s29, 256, %s55_s26, [#allocation6], %s5463_s4, %s5463_s4, %s5465_s1  }
  0x2a   :  { %s5481_s0 = sld [smem:[#allocation35_spill]] }
  0x30   :  { %s4112_s7 = scalar_lea.hbm %s5481_s0, 16 }
  0x31   :  { %p4113_p8 = scmp.ne.s32.totalorder %s5481_s0, %s4112_s7  ;;  %p4116_p9 = scmp.lt.u32.totalorder %s4112_s7, %s5481_s0 }
  0x33   :  { %p4118_p10 = pnand %p4116_p9, %p4113_p8 }
  0x35   :  { %4121 = shalt.err (!%p4118_p10)
}
  0x36   :  { %s4122_s5 = scalar_lea.vmem %s4563_s28, 16  ;;  %s4126_s26 = scalar_lea.vmem %s4563_s28, 32 }
  0x37   :  { %p4123_p11 = scmp.ne.s32.totalorder %s4563_s28, %s4122_s5  ;;  %p4127_p12 = scmp.lt.s32.totalorder %s4563_s28, %s4563_s28 }
  0x38   :  { %p4128_p13 = scmp.lt.s32.totalorder %s4126_s26, %s4122_s5 }
  0x3a   :  { %p4129_p0 = por %p4128_p13, %p4127_p12 }
  0x3c   :  { %p4130_p1 = pnand %p4129_p0, %p4123_p11 }
  0x3e   :  { %4133 = shalt.err (!%p4130_p1)
}
  0x3f   :  { %80 = dma.hbm_to_vmem [thread:$0]  %s5481_s0, 16, %s4563_s28, [#allocation9]  }
  0x40   :  { %s4418_s6 = smov [#allocation11]   ;;  %s4419_s7 = smov [#allocation14]  }
  0x41   :  { %s102_s2 = sshll.u32 %s4418_s6, 4  ;;  %s130_s30 = sshll.u32 %s4419_s7, 4  ;;  %s103_s2 = int_to_ptr.vmem [resolvable:$true] %s102_s2  ;;  %s4598_s30 = int_to_ptr.vmem [resolvable:$true] %s130_s30 }
  0x42   :  { %s5482_s8 = sld [smem:[#allocation39_spill]] }
  0x48   :  { %s4134_s4 = scalar_lea.hbm %s5482_s8, 32 }
  0x49   :  { %p4135_p2 = scmp.ne.s32.totalorder %s5482_s8, %s4134_s4  ;;  %p4138_p3 = scmp.lt.u32.totalorder %s4134_s4, %s5482_s8 }
  0x4b   :  { %p4140_p4 = pnand %p4138_p3, %p4135_p2 }
  0x4d   :  { %4143 = shalt.err (!%p4140_p4)
}
  0x4e   :  { %s4144_s28 = scalar_lea.vmem %s103_s2, 32  ;;  %p4149_p6 = scmp.lt.s32.totalorder %s103_s2, %s103_s2 }
  0x4f   :  { %p4145_p5 = scmp.ne.s32.totalorder %s103_s2, %s4144_s28  ;;  %p4150_p7 = scmp.lt.s32.totalorder %s4144_s28, %s4144_s28 }
  0x51   :  { %p4151_p8 = por %p4150_p7, %p4149_p6 }
  0x53   :  { %p4152_p9 = pnand %p4151_p8, %p4145_p5 }
  0x55   :  { %4155 = shalt.err (!%p4152_p9)
}
  0x56   :  { %s5468_s0 = smov 16   ;;  %s4421_s29 = smov 1  }
  0x57   :  { %108 = dma.hbm_to_vmem [thread:$0]  %s5482_s8, 32, %s103_s2, [#allocation12], %s5468_s0, %s5468_s0, %s4421_s29  }
  0x58   :  { %s4156_s1 = scalar_lea.hbm %s5440_s11, 32 }
  0x59   :  { %p4157_p10 = scmp.ne.s32.totalorder %s5440_s11, %s4156_s1  ;;  %p4160_p11 = scmp.lt.u32.totalorder %s4156_s1, %s5440_s11 }
  0x5b   :  { %p4162_p12 = pnand %p4160_p11, %p4157_p10 }
  0x5d   :  { %4165 = shalt.err (!%p4162_p12)
}
  0x5e   :  { %s4166_s26 = scalar_lea.vmem %s4598_s30, 32  ;;  %p4171_p0 = scmp.lt.s32.totalorder %s4598_s30, %s4598_s30 }
  0x5f   :  { %p4167_p13 = scmp.ne.s32.totalorder %s4598_s30, %s4166_s26  ;;  %p4172_p1 = scmp.lt.s32.totalorder %s4166_s26, %s4166_s26 }
  0x61   :  { %p4173_p2 = por %p4172_p1, %p4171_p0 }
  0x63   :  { %p4174_p3 = pnand %p4173_p2, %p4167_p13 }
  0x65   :  { %4177 = shalt.err (!%p4174_p3)
}
  0x66   :  { %136 = dma.hbm_to_vmem [thread:$0]  %s5440_s11, 32, %s4598_s30, [#allocation15], %s5468_s0, %s5468_s0, %s4421_s29  }
  0x67   :  { %s4422_s28 = smov [#allocation17]   ;;  %s4423_s6 = smov [#allocation20]  }
  0x68   :  { %s154_s27 = sshll.u32 %s4422_s28, 4  ;;  %s184_s24 = sshll.u32 %s4423_s6, 4  ;;  %s155_s27 = int_to_ptr.vmem [resolvable:$true] %s154_s27  ;;  %s4635_s24 = int_to_ptr.vmem [resolvable:$true] %s184_s24 }
  0x69   :  { %s4178_s7 = scalar_lea.hbm %s5442_s13, 32 }
  0x6a   :  { %p4179_p4 = scmp.ne.s32.totalorder %s5442_s13, %s4178_s7  ;;  %p4182_p5 = scmp.lt.u32.totalorder %s4178_s7, %s5442_s13 }
  0x6c   :  { %p4184_p6 = pnand %p4182_p5, %p4179_p4 }
  0x6e   :  { %4187 = shalt.err (!%p4184_p6)
}
  0x6f   :  { %s4188_s11 = scalar_lea.vmem %s155_s27, 32  ;;  %p4193_p8 = scmp.lt.s32.totalorder %s155_s27, %s155_s27 }
  0x70   :  { %p4189_p7 = scmp.ne.s32.totalorder %s155_s27, %s4188_s11  ;;  %p4194_p9 = scmp.lt.s32.totalorder %s4188_s11, %s4188_s11 }
  0x72   :  { %p4195_p10 = por %p4194_p9, %p4193_p8 }
  0x74   :  { %p4196_p11 = pnand %p4195_p10, %p4189_p7 }
  0x76   :  { %4199 = shalt.err (!%p4196_p11)
}
  0x77   :  { %160 = dma.hbm_to_vmem [thread:$0]  %s5442_s13, 32, %s155_s27, [#allocation18], %s5468_s0, %s5468_s0, %s4421_s29  }
  0x78   :  { %s4200_s6 = scalar_lea.hbm %s5447_s18, 32 }
  0x79   :  { %p4201_p12 = scmp.ne.s32.totalorder %s5447_s18, %s4200_s6  ;;  %p4204_p13 = scmp.lt.u32.totalorder %s4200_s6, %s5447_s18 }
  0x7b   :  { %p4206_p0 = pnand %p4204_p13, %p4201_p12 }
  0x7d   :  { %4209 = shalt.err (!%p4206_p0)
}
  0x7e   :  { %s4210_s25 = scalar_lea.vmem %s4635_s24, 32  ;;  %p4215_p2 = scmp.lt.s32.totalorder %s4635_s24, %s4635_s24 }
  0x7f   :  { %p4211_p1 = scmp.ne.s32.totalorder %s4635_s24, %s4210_s25  ;;  %p4216_p3 = scmp.lt.s32.totalorder %s4210_s25, %s4210_s25 }
  0x81   :  { %p4217_p4 = por %p4216_p3, %p4215_p2 }
  0x83   :  { %p4218_p5 = pnand %p4217_p4, %p4211_p1 }
  0x85   :  { %4221 = shalt.err (!%p4218_p5)
}
  0x86   :  { %190 = dma.hbm_to_vmem [thread:$0]  %s5447_s18, 32, %s4635_s24, [#allocation21], %s5468_s0, %s5468_s0, %s4421_s29  }
  0x87   :  { %s4424_s5 = smov [#allocation2]   ;;  %s4425_s11 = smov [#allocation7]  }
  0x88   :  { %s42_s26 = sshll.u32 %s4424_s5, 4  ;;  %s67_s30 = sshll.u32 %s4425_s11, 4  ;;  %s43_s26 = int_to_ptr.vmem [resolvable:$true] %s42_s26  ;;  %s68_s30 = int_to_ptr.vmem [resolvable:$true] %s67_s30 }
  0x89   :  { %s5483_s28 = sld [smem:[#allocation32_spill]] }
  0x8f   :  { %s4222_s6 = scalar_lea.hbm %s5483_s28, 256 }
  0x90   :  { %p4223_p6 = scmp.ne.s32.totalorder %s5483_s28, %s4222_s6  ;;  %p4226_p7 = scmp.lt.u32.totalorder %s4222_s6, %s5483_s28 }
  0x92   :  { %p4228_p8 = pnand %p4226_p7, %p4223_p6 }
  0x94   :  { %4231 = shalt.err (!%p4228_p8)
}
  0x95   :  { %s4232_s18 = scalar_lea.vmem %s43_s26, 256  ;;  %p4237_p10 = scmp.lt.s32.totalorder %s43_s26, %s43_s26 }
  0x96   :  { %p4233_p9 = scmp.ne.s32.totalorder %s43_s26, %s4232_s18  ;;  %p4238_p11 = scmp.lt.s32.totalorder %s4232_s18, %s4232_s18 }
  0x98   :  { %p4239_p12 = por %p4238_p11, %p4237_p10 }
  0x9a   :  { %p4240_p13 = pnand %p4239_p12, %p4233_p9 }
  0x9c   :  { %4243 = shalt.err (!%p4240_p13)
}
  0x9d   :  { %s5484_s24 = smov 8   ;;  %s5485_s25 = smov 128  }
  0x9e   :  { %48 = dma.hbm_to_vmem [thread:$0]  %s5483_s28, 256, %s43_s26, [#allocation3], %s5485_s25, %s5485_s25, %s5484_s24  }
  0x9f   :  { %s5486_s2 = sld [smem:[#allocation34_spill]] }
  0xa5   :  { %s4244_s8 = scalar_lea.hbm %s5486_s2, 16 }
  0xa6   :  { %p4245_p0 = scmp.ne.s32.totalorder %s5486_s2, %s4244_s8  ;;  %p4248_p1 = scmp.lt.u32.totalorder %s4244_s8, %s5486_s2 }
  0xa8   :  { %p4250_p2 = pnand %p4248_p1, %p4245_p0 }
  0xaa   :  { %4253 = shalt.err (!%p4250_p2)
}
  0xab   :  { %s4254_s3 = scalar_lea.vmem %s68_s30, 16  ;;  %s4258_s18 = scalar_lea.vmem %s68_s30, 32 }
  0xac   :  { %p4255_p3 = scmp.ne.s32.totalorder %s68_s30, %s4254_s3  ;;  %p4259_p4 = scmp.lt.s32.totalorder %s68_s30, %s68_s30 }
  0xad   :  { %p4260_p5 = scmp.lt.s32.totalorder %s4258_s18, %s4254_s3 }
  0xaf   :  { %p4261_p6 = por %p4260_p5, %p4259_p4 }
  0xb1   :  { %p4262_p7 = pnand %p4261_p6, %p4255_p3 }
  0xb3   :  { %4265 = shalt.err (!%p4262_p7)
}
  0xb4   :  { %70 = dma.hbm_to_vmem [thread:$0]  %s5486_s2, 16, %s68_s30, [#allocation6]  }
  0xb5   :  { %s4426_s13 = smov [#allocation10]   ;;  %s4427_s5 = smov [#allocation13]  }
  0xb6   :  { %s88_s27 = sshll.u32 %s4426_s13, 4  ;;  %s116_s11 = sshll.u32 %s4427_s5, 4  ;;  %s89_s27 = int_to_ptr.vmem [resolvable:$true] %s88_s27  ;;  %s4699_s11 = int_to_ptr.vmem [resolvable:$true] %s116_s11 }
  0xb7   :  { %s5487_s4 = sld [smem:[#allocation37_spill]] }
  0xbd   :  { %s4266_s1 = scalar_lea.hbm %s5487_s4, 32 }
  0xbe   :  { %p4267_p8 = scmp.ne.s32.totalorder %s5487_s4, %s4266_s1  ;;  %p4270_p9 = scmp.lt.u32.totalorder %s4266_s1, %s5487_s4 }
  0xc0   :  { %p4272_p10 = pnand %p4270_p9, %p4267_p8 }
  0xc2   :  { %4275 = shalt.err (!%p4272_p10)
}
  0xc3   :  { %s4276_s30 = scalar_lea.vmem %s89_s27, 32  ;;  %p4281_p12 = scmp.lt.s32.totalorder %s89_s27, %s89_s27 }
  0xc4   :  { %p4277_p11 = scmp.ne.s32.totalorder %s89_s27, %s4276_s30  ;;  %p4282_p13 = scmp.lt.s32.totalorder %s4276_s30, %s4276_s30 }
  0xc6   :  { %p4283_p0 = por %p4282_p13, %p4281_p12 }
  0xc8   :  { %p4284_p1 = pnand %p4283_p0, %p4277_p11 }
  0xca   :  { %4287 = shalt.err (!%p4284_p1)
}
  0xcb   :  { %s5488_s2 = smov 16   ;;  %s4288_s0 = scalar_lea.hbm %s5438_s9, 32 }
  0xcc   :  { %94 = dma.hbm_to_vmem [thread:$0]  %s5487_s4, 32, %s89_s27, [#allocation9], %s5488_s2, %s5488_s2, %s4421_s29  }
  0xcd   :  { %p4289_p2 = scmp.ne.s32.totalorder %s5438_s9, %s4288_s0  ;;  %p4292_p3 = scmp.lt.u32.totalorder %s4288_s0, %s5438_s9 }
  0xcf   :  { %p4294_p4 = pnand %p4292_p3, %p4289_p2 }
  0xd1   :  { %4297 = shalt.err (!%p4294_p4)
}
  0xd2   :  { %s4298_s3 = scalar_lea.vmem %s4699_s11, 32  ;;  %p4303_p6 = scmp.lt.s32.totalorder %s4699_s11, %s4699_s11 }
  0xd3   :  { %p4299_p5 = scmp.ne.s32.totalorder %s4699_s11, %s4298_s3  ;;  %p4304_p7 = scmp.lt.s32.totalorder %s4298_s3, %s4298_s3 }
  0xd5   :  { %p4305_p8 = por %p4304_p7, %p4303_p6 }
  0xd7   :  { %p4306_p9 = pnand %p4305_p8, %p4299_p5 }
  0xd9   :  { %4309 = shalt.err (!%p4306_p9)
}
  0xda   :  { %122 = dma.hbm_to_vmem [thread:$0]  %s5438_s9, 32, %s4699_s11, [#allocation12], %s5488_s2, %s5488_s2, %s4421_s29  }
  0xdb   :  { %s4428_s18 = smov [#allocation16]   ;;  %s4429_s26 = smov [#allocation19]  }
  0xdc   :  { %s142_s30 = sshll.u32 %s4428_s18, 4  ;;  %s172_s28 = sshll.u32 %s4429_s26, 4  ;;  %s143_s30 = int_to_ptr.vmem [resolvable:$true] %s142_s30  ;;  %s4736_s28 = int_to_ptr.vmem [resolvable:$true] %s172_s28 }
  0xdd   :  { %s4310_s0 = scalar_lea.hbm %s5441_s12, 32 }
  0xde   :  { %p4311_p10 = scmp.ne.s32.totalorder %s5441_s12, %s4310_s0  ;;  %p4314_p11 = scmp.lt.u32.totalorder %s4310_s0, %s5441_s12 }
  0xe0   :  { %p4316_p12 = pnand %p4314_p11, %p4311_p10 }
  0xe2   :  { %4319 = shalt.err (!%p4316_p12)
}
  0xe3   :  { %s4320_s9 = scalar_lea.vmem %s143_s30, 32  ;;  %p4325_p0 = scmp.lt.s32.totalorder %s143_s30, %s143_s30 }
  0xe4   :  { %p4321_p13 = scmp.ne.s32.totalorder %s143_s30, %s4320_s9  ;;  %p4326_p1 = scmp.lt.s32.totalorder %s4320_s9, %s4320_s9 }
  0xe6   :  { %p4327_p2 = por %p4326_p1, %p4325_p0 }
  0xe8   :  { %p4328_p3 = pnand %p4327_p2, %p4321_p13 }
  0xea   :  { %4331 = shalt.err (!%p4328_p3)
}
  0xeb   :  { %148 = dma.hbm_to_vmem [thread:$0]  %s5441_s12, 32, %s143_s30, [#allocation15], %s5488_s2, %s5488_s2, %s4421_s29  }
  0xec   :  { %s4332_s18 = scalar_lea.hbm %s5446_s17, 32 }
  0xed   :  { %p4333_p4 = scmp.ne.s32.totalorder %s5446_s17, %s4332_s18  ;;  %p4336_p5 = scmp.lt.u32.totalorder %s4332_s18, %s5446_s17 }
  0xef   :  { %p4338_p6 = pnand %p4336_p5, %p4333_p4 }
  0xf1   :  { %4341 = shalt.err (!%p4338_p6)
}
  0xf2   :  { %s4342_s8 = scalar_lea.vmem %s4736_s28, 32  ;;  %p4347_p8 = scmp.lt.s32.totalorder %s4736_s28, %s4736_s28 }
  0xf3   :  { %p4343_p7 = scmp.ne.s32.totalorder %s4736_s28, %s4342_s8  ;;  %p4348_p9 = scmp.lt.s32.totalorder %s4342_s8, %s4342_s8 }
  0xf5   :  { %p4349_p10 = por %p4348_p9, %p4347_p8 }
  0xf7   :  { %p4350_p11 = pnand %p4349_p10, %p4343_p7 }
  0xf9   :  { %4353 = shalt.err (!%p4350_p11)
}
  0xfa   :  { %178 = dma.hbm_to_vmem [thread:$0]  %s5446_s17, 32, %s4736_s28, [#allocation18], %s5488_s2, %s5488_s2, %s4421_s29  }
  0xfb   :  { %s4430_s6 = smov [#allocation22]   ;;  %s4354_s11 = scalar_lea.hbm %s5448_s19, 32 }
  0xfc   :  { %s196_s1 = sshll.u32 %s4430_s6, 4  ;;  %p4355_p12 = scmp.ne.s32.totalorder %s5448_s19, %s4354_s11  ;;  %s197_s1 = int_to_ptr.vmem [resolvable:$true] %s196_s1 }
  0xfd   :  { %p4358_p13 = scmp.lt.u32.totalorder %s4354_s11, %s5448_s19 }
  0xff   :  { %p4360_p0 = pnand %p4358_p13, %p4355_p12 }
 0x101   :  { %4363 = shalt.err (!%p4360_p0)
}
 0x102   :  { %s4364_s26 = scalar_lea.vmem %s197_s1, 32  ;;  %p4369_p2 = scmp.lt.s32.totalorder %s197_s1, %s197_s1 }
 0x103   :  { %p4365_p1 = scmp.ne.s32.totalorder %s197_s1, %s4364_s26  ;;  %p4370_p3 = scmp.lt.s32.totalorder %s4364_s26, %s4364_s26 }
 0x105   :  { %p4371_p4 = por %p4370_p3, %p4369_p2 }
 0x107   :  { %p4372_p5 = pnand %p4371_p4, %p4365_p1 }
 0x109   :  { %4375 = shalt.err (!%p4372_p5)
}
 0x10a   :  { %202 = dma.hbm_to_vmem [thread:$0]  %s5448_s19, 32, %s197_s1, [#allocation21], %s5488_s2, %s5488_s2, %s4421_s29  }
 0x10b   :  { %4398 = dma.done.wait [#allocation3], 256  }
 0x10c   :  { %4399 = vsyncadd [#allocation3], 4294967040 }
 0x10d   :  { %4400 = dma.done.wait [#allocation6], 272  }
 0x10e   :  { %4401 = vsyncadd [#allocation6], 4294967024 }
 0x10f   :  { %4402 = dma.done.wait [#allocation9], 48  }
 0x110   :  { %4403 = vsyncadd [#allocation9], 4294967248 }
 0x111   :  { %4404 = dma.done.wait [#allocation12], 64  }
 0x112   :  { %4405 = vsyncadd [#allocation12], 4294967232 }
 0x113   :  { %4406 = dma.done.wait [#allocation15], 64  }
 0x114   :  { %4407 = vsyncadd [#allocation15], 4294967232 }
 0x115   :  { %4408 = dma.done.wait [#allocation18], 64  }
 0x116   :  { %4409 = vsyncadd [#allocation18], 4294967232 }
 0x117   :  { %4410 = dma.done.wait [#allocation21], 64  }
 0x118   :  { %4411 = vsyncadd [#allocation21], 4294967232  ;;  %vm255_vm0 = vcmask 523264   ;;  %v251_v0 = vld [vmem:[#allocation2] sm:$0xff]  ;;  %v252_v1 = vld [vmem:[#allocation2 + $0x8] sm:$0xff]  ;;  %s5489_s2 = sld [smem:[#allocation36_spill]] }
 0x119   :  { %v256_v2 = vsel %vm255_vm0, %v251_v0, 0.0  ;;  %v259_v3 = vsel %vm255_vm0, %v252_v1, 0.0  ;;  %v4431_v15 = vmov 0.0   ;;  %s5490_s0 = sld [smem:[#allocation38_spill]]  ;;  %vm4432_vm1 = vmmov 0   ;;  %s5491_s28 = sld [smem:[#allocation40_spill]] }
 0x11a   :  { %257 = vadd.xlane.f32.xlu0 %v256_v2  ;;  %3624 = vmatprep.subr.bf16.mxu0 %v4431_v15  ;;  %v3275_v31 = vld [vmem:[#allocation7] ss:$0 sm:$0xff]  ;;  %v3276_v35 = vld [vmem:[#allocation8] ss:$0 sm:$0xff]  ;;  %v3277_v44 = vld [vmem:[#allocation10] ss:$0 sm:$0xff] }
 0x11b   :  { %3636 = vmatprep.subr.bf16.mxu1 %v4431_v15  ;;  %3632 = vmatprep.mubr.msk.bf16.mxu0 %vm4432_vm1, %v4431_v15  ;;  %v3283_v46 = vld [vmem:[#allocation11] ss:$0 sm:$0xff]  ;;  %vm556_vm2 = vcmask 130048   ;;  %v3289_v61 = vld [vmem:[#allocation13] ss:$0 sm:$0xff]  ;;  %s4433_s30 = smov 112  }
 0x11c   :  { %3644 = vmatprep.mubr.msk.bf16.mxu1 %vm4432_vm1, %v4431_v15  ;;  %s4434_s6 = smov 96   ;;  %s4435_s3 = smov 80  }
 0x11d   :  { %s4437_s26 = smov [#allocation23]  }
 0x11e   :  { %260 = vadd.xlane.f32.xlu0 %v259_v3  ;;  %v3888_v14 = vld [vmem:[%s5489_s2] sm:$0xff]   ;;  %v3890_v17 = vld [vmem:[%s5489_s2 + $0x8] sm:$0xff]   ;;  %v3892_v19 = vld [vmem:[%s5489_s2 + $0x10] sm:$0xff]  }
 0x11f   :  { %v3889_v16 = vld [vmem:[%s5490_s0] sm:$0xff]   ;;  %3625 = vmatpush3.bf16.msra.mxu0 %v3888_v14  ;;  %v3891_v18 = vld [vmem:[%s5490_s0 + $0x8] sm:$0xff]   ;;  %v3893_v20 = vld [vmem:[%s5490_s0 + $0x10] sm:$0xff]  }
 0x120   :  { %3637 = vmatpush3.bf16.msra.mxu1 %v3889_v16  ;;  %3626 = vmatprep.subr.bf16.mxu0 %v4431_v15  ;;  %v3894_v21 = vld [vmem:[%s5489_s2 + $0x18] sm:$0xff]   ;;  %v3896_v39 = vld [vmem:[%s5491_s28] sm:$0xff]   ;;  %v3897_v41 = vld [vmem:[%s5491_s28 + $0x8] sm:$0xff]  }
 0x121   :  { %3638 = vmatprep.subr.bf16.mxu1 %v4431_v15  ;;  %v3895_v22 = vld [vmem:[%s5490_s0 + $0x18] sm:$0xff]   ;;  %v3898_v42 = vld [vmem:[%s5491_s28 + $0x10] sm:$0xff]  }
 0x122   :  { %v3899_v43 = vld [vmem:[%s5491_s28 + $0x18] sm:$0xff]  }
 0x123   :  { %3627 = vmatpush3.bf16.msra.mxu0 %v3890_v17 }
 0x124   :  { %3639 = vmatpush3.bf16.msra.mxu1 %v3891_v18  ;;  %3628 = vmatprep.subr.bf16.mxu0 %v4431_v15 }
 0x125   :  { %3640 = vmatprep.subr.bf16.mxu1 %v4431_v15 }
 0x127   :  { %3629 = vmatpush3.bf16.msra.mxu0 %v3892_v19 }
 0x128   :  { %3641 = vmatpush3.bf16.msra.mxu1 %v3893_v20  ;;  %3630 = vmatprep.subr.bf16.mxu0 %v4431_v15 }
 0x129   :  { %3642 = vmatprep.subr.bf16.mxu1 %v4431_v15 }
 0x12b   :  { %3631 = vmatpush3.bf16.msra.mxu0 %v3894_v21 }
 0x12c   :  { %3643 = vmatpush3.bf16.msra.mxu1 %v3895_v22  ;;  %3648 = vmatprep.subr.bf16.mxu0 %v4431_v15 }
 0x12d   :  { %3660 = vmatprep.subr.bf16.mxu1 %v4431_v15 }
 0x1a7   :  { %v258_v4 = vpop.xlane.xlu0 %257 }
 0x1a8   :  { %v263_v5 = vmul.f32 0.015625, %v258_v4 }
 0x1aa   :  { %v265_v6 = vsub.f32 %v251_v0, %v263_v5 }
 0x1ab   :  { %v261_v7 = vpop.xlane.xlu0 %260 }
 0x1ac   :  { %v264_v8 = vmul.f32 0.015625, %v261_v7  ;;  %v267_v9 = vmul.f32 %v265_v6, %v265_v6 }
 0x1ae   :  { %v266_v10 = vsub.f32 %v252_v1, %v264_v8  ;;  %v269_v11 = vsel %vm255_vm0, %v267_v9, 0.0 }
 0x1af   :  { %270 = vadd.xlane.f32.xlu1 %v269_v11 }
 0x1b0   :  { %v268_v12 = vmul.f32 %v266_v10, %v266_v10 }
 0x1b2   :  { %v272_v13 = vsel %vm255_vm0, %v268_v12, 0.0 }
 0x1b3   :  { %273 = vadd.xlane.f32.xlu1 %v272_v13 }
 0x23c   :  { %v271_v23 = vpop.xlane.xlu1 %270 }
 0x23d   :  { %v275_v24 = vmul.f32 0.015625, %v271_v23 }
 0x23f   :  { %v277_v25 = vadd.f32 1e-12, %v275_v24 }
 0x240   :  { %v274_v26 = vpop.xlane.xlu1 %273 }
 0x241   :  { %3984 = vrsqrt.f32 %v277_v25  ;;  %v276_v27 = vmul.f32 0.015625, %v274_v26 }
 0x243   :  { %v278_v28 = vadd.f32 1e-12, %v276_v27 }
 0x245   :  { %3986 = vrsqrt.f32 %v278_v28 }
 0x24b   :  { %v3985_v29 = vpop.eup %3984 }
 0x24c   :  { %v281_v30 = vmul.f32 %v3985_v29, %v265_v6  ;;  %v4876_v6 = vld [vmem:[#allocation5] sm:$0xff] }
 0x24e   :  { %v289_v34 = vmul.f32 %v3275_v31, %v281_v30 }
 0x24f   :  { %v3987_v32 = vpop.eup %3986 }
 0x250   :  { %v282_v33 = vmul.f32 %v3987_v32, %v266_v10  ;;  %v4830_v37 = vadd.f32 %v3276_v35, %v289_v34  ;;  %v4878_v10 = vld [vmem:[#allocation5 + $0x8] sm:$0xff] }
 0x252   :  { %v290_v36 = vmul.f32 %v3275_v31, %v282_v33 }
 0x254   :  { %v4832_v38 = vadd.f32 %v3276_v35, %v290_v36 }
 0x256   :  { %v301_v40 = vpack.c.bf16 %v4832_v38, %v4830_v37 }
 0x258   :  { %3633 = vmatmul.mubr.msk.bf16.vlgmr.msra.gmra.mrb[0].mxu0 %vm255_vm0, %v301_v40  ;;  %3645 = vmatmul.mubr.msk.bf16.vlgmr.msra.gmra.mrb[0].mxu1 %vm255_vm0, %v301_v40 }
 0x259   :  { %3649 = vmatpush3.bf16.msra.mxu0 %v3896_v39  ;;  %3656 = vmatprep.mubr.msk.bf16.mxu0 %vm4432_vm1, %v4431_v15 }
 0x25a   :  { %3650 = vmatprep.subr.bf16.mxu0 %v4431_v15  ;;  %3662 = vmatprep.mubr.msk.bf16.mxu1 %vm4432_vm1, %v4431_v15 }
 0x25d   :  { %3651 = vmatpush3.bf16.msra.mxu0 %v3897_v41 }
 0x25e   :  { %3652 = vmatprep.subr.bf16.mxu0 %v4431_v15 }
 0x261   :  { %3653 = vmatpush3.bf16.msra.mxu0 %v3898_v42 }
 0x262   :  { %3654 = vmatprep.subr.bf16.mxu0 %v4431_v15 }
 0x265   :  { %3655 = vmatpush3.bf16.msra.mxu0 %v3899_v43 }
 0x266   :  { %3684 = vmatprep.subr.bf16.mxu0 %v4431_v15 }
 0x268   :  { %3657 = vmatmul.mubr.msk.bf16.vlgmr.msra.gmra.mrb[4].mxu0 %vm255_vm0, %v301_v40 }
 0x269   :  { %3686 = vmatprep.mubr.msk.bf16.mxu0 %vm4432_vm1, %v4431_v15 }
 0x32b   :  { %v378_v45 = vpop.f32.mrb[0].mxu0  ;;  %v458_v47 = vpop.f32.mrb[0].mxu1 }
 0x32c   :  { %v3634_v48 = vpop.f32.mrb[1].mxu0  ;;  %v3646_v49 = vpop.f32.mrb[1].mxu1  ;;  %v379_v52 = vadd.f32 %v3277_v44, %v378_v45  ;;  %v459_v53 = vadd.f32 %v3283_v46, %v458_v47 }
 0x32d   :  { %v381_v50 = vpop.f32.mrb[2].mxu0  ;;  %v461_v51 = vpop.f32.mrb[2].mxu1 }
 0x32e   :  { %v382_v54 = vadd.f32 %v3277_v44, %v381_v50  ;;  %v462_v55 = vadd.f32 %v3283_v46, %v461_v51  ;;  %v3635_v56 = vpop.f32.mrb[3].mxu0  ;;  %v3647_v57 = vpop.f32.mrb[3].mxu1 }
 0x330   :  { %v4861_v58 = vpack.c.bf16 %v382_v54, %v379_v52  ;;  %v4863_v59 = vpack.c.bf16 %v462_v55, %v459_v53 }
 0x332   :  { %v561_v60 = vsel %vm556_vm2, %v4863_v59, 0 }
 0x333   :  { %3661 = vmatpush3.bf16.xpose.msra.mxu1 %v561_v60 }
 0x334   :  { %3666 = vmatprep.subr.bf16.mxu1 %v4431_v15 }
 0x33a   :  { %3663 = vmatmul.mubr.msk.bf16.vlgmr.msra.gmra.mrb[4].mxu1 %vm556_vm2, %v4861_v58 }
 0x33b   :  { %v538_v62 = vpop.f32.mrb[4].mxu0  ;;  %3668 = vmatprep.mubr.msk.bf16.mxu1 %vm4432_vm1, %v4431_v15 }
 0x33c   :  { %v3658_v63 = vpop.f32.mrb[5].mxu0  ;;  %v539_v1 = vadd.f32 %v3289_v61, %v538_v62 }
 0x33d   :  { %v541_v0 = vpop.f32.mrb[6].mxu0 }
 0x33e   :  { %v542_v2 = vadd.f32 %v3289_v61, %v541_v0  ;;  %v3659_v3 = vpop.f32.mrb[7].mxu0 }
 0x33f   :  { %v3901_v3 = vld [vmem:[%s5439_s10 + $0x8] sm:$0xff]  }
 0x340   :  { %v4872_v4 = vpack.c.bf16 %v542_v2, %v539_v1  ;;  %3685 = vmatpush3.bf16.msra.mxu0 %v3901_v3 }
 0x341   :  { %3696 = vmatprep.subr.bf16.mxu0 %v4431_v15 }
 0x342   :  { %3667 = vmatpush3.bf16.msra.mxu1 %v4872_v4 }
 0x343   :  { %3672 = vmatprep.subr.bf16.mxu1 %v4431_v15 }
 0x40d   :  { %v597_v5 = vpop.f32.mrb[4].mxu1 }
 0x40e   :  { %v604_v7 = vmul.f32 0.25, %v597_v5  ;;  %v3664_v8 = vpop.f32.mrb[5].mxu1 }
 0x40f   :  { %v600_v9 = vpop.f32.mrb[6].mxu1 }
 0x410   :  { %v605_v11 = vmul.f32 0.25, %v600_v9  ;;  %v3665_v12 = vpop.f32.mrb[7].mxu1  ;;  %v606_v13 = vadd.f32 %v604_v7, %v4876_v6 }
 0x412   :  { %v608_v14 = vsel %vm556_vm2, %v606_v13, -inf  ;;  %v607_v16 = vadd.f32 %v605_v11, %v4878_v10 }
 0x413   :  { %609 = vmax.xlane.f32.xlu0 %v608_v14  ;;  %v3900_v14 = vld [vmem:[%s5439_s10] sm:$0xff]  }
 0x414   :  { %v611_v17 = vsel %vm556_vm2, %v607_v16, -inf }
 0x415   :  { %612 = vmax.xlane.f32.xlu1 %v611_v17 }
 0x4a0   :  { %v610_v18 = vpop.xlane.xlu0 %609 }
 0x4a1   :  { %v614_v19 = vsub.f32 %v606_v13, %v610_v18 }
 0x4a2   :  { %v613_v20 = vpop.xlane.xlu1 %612 }
 0x4a3   :  { %v616_v21 = vmul.f32 1.442695, %v614_v19  ;;  %v615_v22 = vsub.f32 %v607_v16, %v613_v20 }
 0x4a5   :  { %3988 = vpow2.f32 %v616_v21  ;;  %v618_v23 = vmul.f32 1.442695, %v615_v22 }
 0x4a7   :  { %3990 = vpow2.f32 %v618_v23 }
 0x4af   :  { %v3989_v24 = vpop.eup %3988 }
 0x4b0   :  { %v620_v25 = vsel %vm556_vm2, %v3989_v24, 0.0 }
 0x4b1   :  { %v3991_v26 = vpop.eup %3990  ;;  %621 = vadd.xlane.f32.xlu0 %v620_v25 }
 0x4b2   :  { %v623_v27 = vsel %vm556_vm2, %v3991_v26, 0.0 }
 0x4b3   :  { %624 = vadd.xlane.f32.xlu1 %v623_v27 }
 0x4c4   :  { %677 = vrot.lane.b32.xlu1 %v4861_v58, %s4433_s30 }
 0x4c7   :  { %680 = vrot.lane.b32.xlu0 %v4863_v59, %s4433_s30 }
 0x53e   :  { %v622_v28 = vpop.xlane.xlu0 %621 }
 0x53f   :  { %3992 = vrcp.f32 %v622_v28 }
 0x540   :  { %v625_v29 = vpop.xlane.xlu1 %624 }
 0x541   :  { %3994 = vrcp.f32 %v625_v29 }
 0x542   :  { %v681_v34 = vpop.permute.xlu0 %680 }
 0x543   :  { %v686_v36 = vsel %vm556_vm2, %v681_v34, 0 }
 0x544   :  { %v678_v39 = vpop.permute.xlu1 %677 }
 0x549   :  { %v3993_v30 = vpop.eup %3992 }
 0x54a   :  { %v628_v32 = vmul.f32 %v3993_v30, %v3989_v24 }
 0x54b   :  { %v3995_v31 = vpop.eup %3994 }
 0x54c   :  { %v629_v33 = vmul.f32 %v3995_v31, %v3991_v26 }
 0x54e   :  { %v630_v35 = vpack.c.bf16 %v629_v33, %v628_v32 }
 0x550   :  { %3669 = vmatmul.mubr.msk.bf16.vlgmr.msra.gmra.mrb[8].mxu1 %vm556_vm2, %v630_v35 }
 0x551   :  { %3673 = vmatpush3.bf16.xpose.msra.mxu1 %v686_v36  ;;  %3674 = vmatprep.mubr.msk.bf16.mxu1 %vm4432_vm1, %v4431_v15 }
 0x552   :  { %3678 = vmatprep.subr.bf16.mxu1 %v4431_v15 }
 0x558   :  { %3675 = vmatmul.mubr.msk.bf16.vlgmr.msra.gmra.mrb[12].mxu1 %vm556_vm2, %v678_v39 }
 0x559   :  { %3680 = vmatprep.mubr.msk.bf16.mxu1 %vm4432_vm1, %v4431_v15 }
 0x623   :  { %v668_v40 = vpop.f32.mrb[8].mxu1 }
 0x624   :  { %v3670_v41 = vpop.f32.mrb[9].mxu1 }
 0x625   :  { %v671_v42 = vpop.f32.mrb[10].mxu1 }
 0x626   :  { %v675_v43 = vpack.c.bf16 %v671_v42, %v668_v40  ;;  %v3671_v44 = vpop.f32.mrb[11].mxu1 }
 0x62b   :  { %v722_v45 = vpop.f32.mrb[12].mxu1 }
 0x62c   :  { %v729_v46 = vmul.f32 0.25, %v722_v45  ;;  %v3676_v47 = vpop.f32.mrb[13].mxu1 }
 0x62d   :  { %v725_v48 = vpop.f32.mrb[14].mxu1 }
 0x62e   :  { %v730_v49 = vmul.f32 0.25, %v725_v48  ;;  %v3677_v50 = vpop.f32.mrb[15].mxu1  ;;  %v731_v51 = vadd.f32 %v729_v46, %v4876_v6 }
 0x630   :  { %v733_v52 = vsel %vm556_vm2, %v731_v51, -inf  ;;  %v732_v53 = vadd.f32 %v730_v49, %v4878_v10 }
 0x631   :  { %734 = vmax.xlane.f32.xlu1 %v733_v52 }
 0x632   :  { %v736_v54 = vsel %vm556_vm2, %v732_v53, -inf }
 0x633   :  { %737 = vmax.xlane.f32.xlu0 %v736_v54 }
 0x6be   :  { %v735_v55 = vpop.xlane.xlu1 %734 }
 0x6bf   :  { %v739_v56 = vsub.f32 %v731_v51, %v735_v55 }
 0x6c0   :  { %v738_v57 = vpop.xlane.xlu0 %737 }
 0x6c1   :  { %v741_v60 = vmul.f32 1.442695, %v739_v56  ;;  %v740_v61 = vsub.f32 %v732_v53, %v738_v57 }
 0x6c3   :  { %3996 = vpow2.f32 %v741_v60  ;;  %v743_v62 = vmul.f32 1.442695, %v740_v61 }
 0x6c5   :  { %3998 = vpow2.f32 %v743_v62 }
 0x6cd   :  { %v3997_v63 = vpop.eup %3996 }
 0x6ce   :  { %v745_v0 = vsel %vm556_vm2, %v3997_v63, 0.0 }
 0x6cf   :  { %v3999_v1 = vpop.eup %3998  ;;  %746 = vadd.xlane.f32.xlu0 %v745_v0 }
 0x6d0   :  { %v748_v2 = vsel %vm556_vm2, %v3999_v1, 0.0 }
 0x6d1   :  { %749 = vadd.xlane.f32.xlu1 %v748_v2 }
 0x6e2   :  { %907 = vrot.lane.b32.xlu1 %v4863_v59, %s4434_s6 }
 0x6e5   :  { %757 = vrot.lane.b32.xlu0 %v4872_v4, %s4433_s30 }
 0x6e6   :  { %905 = vrot.lane.b32.xlu1 %v4861_v58, %s4434_s6 }
 0x75c   :  { %v747_v5 = vpop.xlane.xlu0 %746 }
 0x75d   :  { %4000 = vrcp.f32 %v747_v5  ;;  %v3902_v5 = vld [vmem:[%s5439_s10 + $0x10] sm:$0xff]  }
 0x75e   :  { %v750_v7 = vpop.xlane.xlu1 %749 }
 0x75f   :  { %4002 = vrcp.f32 %v750_v7 }
 0x760   :  { %v758_v8 = vpop.permute.xlu0 %757 }
 0x761   :  { %3679 = vmatpush3.bf16.msra.mxu1 %v758_v8 }
 0x762   :  { %3690 = vmatprep.subr.bf16.mxu1 %v4431_v15  ;;  %v908_v19 = vpop.permute.xlu1 %907 }
 0x763   :  { %v913_v23 = vsel %vm556_vm2, %v908_v19, 0 }
 0x766   :  { %v906_v28 = vpop.permute.xlu1 %905 }
 0x767   :  { %v4001_v9 = vpop.eup %4000 }
 0x768   :  { %v753_v12 = vmul.f32 %v4001_v9, %v3997_v63 }
 0x769   :  { %v4003_v11 = vpop.eup %4002 }
 0x76a   :  { %v754_v13 = vmul.f32 %v4003_v11, %v3999_v1 }
 0x76c   :  { %v755_v16 = vpack.c.bf16 %v754_v13, %v753_v12 }
 0x76e   :  { %3681 = vmatmul.mubr.msk.bf16.vlgmr.msra.gmra.mrb[16].mxu1 %vm556_vm2, %v755_v16 }
 0x76f   :  { %3691 = vmatpush3.bf16.msra.mxu1 %v3900_v14  ;;  %3692 = vmatprep.mubr.msk.bf16.mxu1 %vm4432_vm1, %v4431_v15 }
 0x770   :  { %3702 = vmatprep.subr.bf16.mxu1 %v4431_v15 }
 0x776   :  { %3693 = vmatmul.mubr.msk.bf16.vlgmr.msra.gmra.mrb[20].mxu1 %vm556_vm2, %v675_v43 }
 0x777   :  { %3704 = vmatprep.mubr.msk.bf16.mxu1 %vm4432_vm1, %v4431_v15 }
 0x841   :  { %v797_v17 = vpop.f32.mrb[16].mxu1 }
 0x842   :  { %v3682_v18 = vpop.f32.mrb[17].mxu1 }
 0x843   :  { %v800_v20 = vpop.f32.mrb[18].mxu1 }
 0x844   :  { %v804_v21 = vpack.c.bf16 %v800_v20, %v797_v17  ;;  %v3683_v22 = vpop.f32.mrb[19].mxu1 }
 0x846   :  { %3687 = vmatmul.mubr.msk.bf16.vlgmr.msra.gmra.mrb[8].mxu0 %vm556_vm2, %v804_v21 }
 0x847   :  { %3697 = vmatpush3.bf16.xpose.msra.mxu0 %v913_v23  ;;  %3698 = vmatprep.mubr.msk.bf16.mxu0 %vm4432_vm1, %v4431_v15 }
 0x848   :  { %3708 = vmatprep.subr.bf16.mxu0 %v4431_v15 }
 0x849   :  { %v898_v24 = vpop.f32.mrb[20].mxu1 }
 0x84a   :  { %v3694_v25 = vpop.f32.mrb[21].mxu1 }
 0x84b   :  { %v901_v26 = vpop.f32.mrb[22].mxu1 }
 0x84c   :  { %v3695_v27 = vpop.f32.mrb[23].mxu1 }
 0x84e   :  { %3699 = vmatmul.mubr.msk.bf16.vlgmr.msra.gmra.mrb[12].mxu0 %vm556_vm2, %v906_v28 }
 0x84f   :  { %3710 = vmatprep.mubr.msk.bf16.mxu0 %vm4432_vm1, %v4431_v15  ;;  %3709 = vmatpush3.bf16.msra.mxu0 %v3902_v5 }
 0x850   :  { %3720 = vmatprep.subr.bf16.mxu0 %v4431_v15 }
 0x919   :  { %v848_v29 = vpop.f32.mrb[8].mxu0 }
 0x91a   :  { %v4933_v30 = vadd.f32 %v898_v24, %v848_v29  ;;  %v3688_v31 = vpop.f32.mrb[9].mxu0 }
 0x91b   :  { %v851_v32 = vpop.f32.mrb[10].mxu0 }
 0x91c   :  { %v4935_v33 = vadd.f32 %v901_v26, %v851_v32  ;;  %v3689_v34 = vpop.f32.mrb[11].mxu0 }
 0x921   :  { %v949_v35 = vpop.f32.mrb[12].mxu0 }
 0x922   :  { %v956_v36 = vmul.f32 0.25, %v949_v35  ;;  %v3700_v39 = vpop.f32.mrb[13].mxu0 }
 0x923   :  { %v952_v40 = vpop.f32.mrb[14].mxu0 }
 0x924   :  { %v957_v41 = vmul.f32 0.25, %v952_v40  ;;  %v3701_v42 = vpop.f32.mrb[15].mxu0  ;;  %v958_v43 = vadd.f32 %v956_v36, %v4876_v6 }
 0x926   :  { %v960_v44 = vsel %vm556_vm2, %v958_v43, -inf  ;;  %v959_v45 = vadd.f32 %v957_v41, %v4878_v10 }
 0x927   :  { %961 = vmax.xlane.f32.xlu1 %v960_v44 }
 0x928   :  { %v963_v46 = vsel %vm556_vm2, %v959_v45, -inf }
 0x929   :  { %964 = vmax.xlane.f32.xlu0 %v963_v46 }
 0x938   :  { %983 = vrot.lane.b32.xlu1 %v4872_v4, %s4434_s6 }
 0x93c   :  { %1083 = vrot.lane.b32.xlu1 %v4861_v58, %s4435_s3 }
 0x9b4   :  { %v962_v47 = vpop.xlane.xlu1 %961 }
 0x9b5   :  { %v966_v48 = vsub.f32 %v958_v43, %v962_v47 }
 0x9b6   :  { %v965_v49 = vpop.xlane.xlu0 %964 }
 0x9b7   :  { %v968_v50 = vmul.f32 1.442695, %v966_v48  ;;  %v967_v51 = vsub.f32 %v959_v45, %v965_v49 }
 0x9b8   :  { %v984_v52 = vpop.permute.xlu1 %983 }
 0x9b9   :  { %4004 = vpow2.f32 %v968_v50  ;;  %v970_v53 = vmul.f32 1.442695, %v967_v51  ;;  %3703 = vmatpush3.bf16.msra.mxu1 %v984_v52 }
 0x9ba   :  { %3714 = vmatprep.subr.bf16.mxu1 %v4431_v15 }
 0x9bb   :  { %4006 = vpow2.f32 %v970_v53 }
 0x9c3   :  { %v4005_v54 = vpop.eup %4004 }
 0x9c4   :  { %v972_v55 = vsel %vm556_vm2, %v4005_v54, 0.0 }
 0x9c5   :  { %v4007_v56 = vpop.eup %4006  ;;  %973 = vadd.xlane.f32.xlu0 %v972_v55 }
 0x9c6   :  { %v975_v57 = vsel %vm556_vm2, %v4007_v56, 0.0 }
 0x9c9   :  { %976 = vadd.xlane.f32.xlu0 %v975_v57 }
 0x9df   :  { %1085 = vrot.lane.b32.xlu0 %v4863_v59, %s4435_s3  ;;  %v1084_v59 = vpop.permute.xlu1 %1083 }
 0xa52   :  { %v974_v58 = vpop.xlane.xlu0 %973 }
 0xa53   :  { %4008 = vrcp.f32 %v974_v58 }
 0xa56   :  { %v977_v60 = vpop.xlane.xlu0 %976 }
 0xa57   :  { %4010 = vrcp.f32 %v977_v60 }
 0xa5a   :  { %v1086_v1 = vpop.permute.xlu0 %1085 }
 0xa5b   :  { %v1091_v3 = vsel %vm556_vm2, %v1086_v1, 0 }
 0xa5d   :  { %v4009_v61 = vpop.eup %4008 }
 0xa5e   :  { %v980_v63 = vmul.f32 %v4009_v61, %v4005_v54  ;;  %v3311_v54 = vld [vmem:[#allocation14] ss:$0 sm:$0xff] }
 0xa61   :  { %v4011_v62 = vpop.eup %4010 }
 0xa62   :  { %v981_v0 = vmul.f32 %v4011_v62, %v4007_v56 }
 0xa64   :  { %v982_v2 = vpack.c.bf16 %v981_v0, %v980_v63 }
 0xa66   :  { %3705 = vmatmul.mubr.msk.bf16.vlgmr.msra.gmra.mrb[24].mxu1 %vm556_vm2, %v982_v2 }
 0xa67   :  { %3715 = vmatpush3.bf16.xpose.msra.mxu1 %v1091_v3  ;;  %3716 = vmatprep.mubr.msk.bf16.mxu1 %vm4432_vm1, %v4431_v15 }
 0xa68   :  { %3726 = vmatprep.subr.bf16.mxu1 %v4431_v15 }
 0xa6e   :  { %3717 = vmatmul.mubr.msk.bf16.vlgmr.msra.gmra.mrb[28].mxu1 %vm556_vm2, %v1084_v59 }
 0xa6f   :  { %3728 = vmatprep.mubr.msk.bf16.mxu1 %vm4432_vm1, %v4431_v15 }
 0xb39   :  { %v1023_v7 = vpop.f32.mrb[24].mxu1 }
 0xb3a   :  { %v3706_v8 = vpop.f32.mrb[25].mxu1 }
 0xb3b   :  { %v1026_v9 = vpop.f32.mrb[26].mxu1 }
 0xb3c   :  { %v1030_v11 = vpack.c.bf16 %v1026_v9, %v1023_v7  ;;  %v3707_v12 = vpop.f32.mrb[27].mxu1 }
 0xb3e   :  { %3711 = vmatmul.mubr.msk.bf16.vlgmr.msra.gmra.mrb[16].mxu0 %vm556_vm2, %v1030_v11 }
 0xb3f   :  { %3722 = vmatprep.mubr.msk.bf16.mxu0 %vm4432_vm1, %v4431_v15 }
 0xb41   :  { %v1127_v13 = vpop.f32.mrb[28].mxu1 }
 0xb42   :  { %v1134_v14 = vmul.f32 0.25, %v1127_v13  ;;  %v3718_v16 = vpop.f32.mrb[29].mxu1 }
 0xb43   :  { %v1130_v17 = vpop.f32.mrb[30].mxu1  ;;  %v3909_v16 = vld [vmem:[%s5443_s14 + $0x14] ss:$8 sps:$4 sm:$0xff]  }
 0xb44   :  { %v1135_v18 = vmul.f32 0.25, %v1130_v17  ;;  %v3719_v19 = vpop.f32.mrb[31].mxu1  ;;  %v1136_v20 = vadd.f32 %v1134_v14, %v4876_v6  ;;  %v3904_v14 = vld [vmem:[%s5443_s14] ss:$8 sps:$4 sm:$0xff]   ;;  %v3907_v17 = vld [vmem:[%s5443_s14 + $0x10] ss:$8 sps:$4 sm:$0xff]  }
 0xb45   :  { %v3910_v19 = vld [vmem:[%s5443_s14 + $0x20] ss:$8 sps:$4 sm:$0xff]  }
 0xb46   :  { %v1138_v21 = vsel %vm556_vm2, %v1136_v20, -inf  ;;  %v1137_v22 = vadd.f32 %v1135_v18, %v4878_v10  ;;  %v3903_v10 = vld [vmem:[%s5439_s10 + $0x18] sm:$0xff]   ;;  %v3912_v18 = vld [vmem:[%s5443_s14 + $0x24] ss:$8 sps:$4 sm:$0xff]  }
 0xb47   :  { %1139 = vmax.xlane.f32.xlu1 %v1138_v21  ;;  %3727 = vmatpush3.bf16.msra.mxu1 %v3903_v10  ;;  %v3915_v21 = vld [vmem:[%s5443_s14 + $0x34] ss:$8 sps:$4 sm:$0xff]  }
 0xb48   :  { %v1141_v23 = vsel %vm556_vm2, %v1137_v22, -inf }
 0xb49   :  { %1142 = vmax.xlane.f32.xlu0 %v1141_v23 }
 0xbd4   :  { %v1140_v24 = vpop.xlane.xlu1 %1139 }
 0xbd5   :  { %v1144_v25 = vsub.f32 %v1136_v20, %v1140_v24  ;;  %v3913_v20 = vld [vmem:[%s5443_s14 + $0x30] ss:$8 sps:$4 sm:$0xff]  }
 0xbd6   :  { %v1143_v26 = vpop.xlane.xlu0 %1142 }
 0xbd7   :  { %v1146_v27 = vmul.f32 1.442695, %v1144_v25  ;;  %v1145_v28 = vsub.f32 %v1137_v22, %v1143_v26  ;;  %v4436_v22 = vmov 0  }
 0xbd9   :  { %4012 = vpow2.f32 %v1146_v27  ;;  %v1148_v29 = vmul.f32 1.442695, %v1145_v28 }
 0xbdb   :  { %4014 = vpow2.f32 %v1148_v29 }
 0xbe3   :  { %v4013_v31 = vpop.eup %4012 }
 0xbe4   :  { %v1150_v32 = vsel %vm556_vm2, %v4013_v31, 0.0 }
 0xbe5   :  { %v4015_v6 = vpop.eup %4014  ;;  %1151 = vadd.xlane.f32.xlu0 %v1150_v32  ;;  %v3312_v32 = vld [vmem:[#allocation16] ss:$0 sm:$0xff] }
 0xbe6   :  { %v1153_v34 = vsel %vm556_vm2, %v4015_v6, 0.0 }
 0xbe7   :  { %1154 = vadd.xlane.f32.xlu1 %v1153_v34 }
 0xbfb   :  { %1161 = vrot.lane.b32.xlu0 %v4872_v4, %s4435_s3 }
 0xc11   :  { %v1074_v35 = vpop.f32.mrb[16].mxu0 }
 0xc12   :  { %v1081_v36 = vadd.f32 %v1074_v35, %v4933_v30  ;;  %v3712_v39 = vpop.f32.mrb[17].mxu0  ;;  %v3313_v35 = vld [vmem:[#allocation17] ss:$0 sm:$0xff] }
 0xc13   :  { %v1077_v40 = vpop.f32.mrb[18].mxu0 }
 0xc14   :  { %v1082_v41 = vadd.f32 %v1077_v40, %v4935_v33  ;;  %v3713_v42 = vpop.f32.mrb[19].mxu0 }
 0xc15   :  { %v3916_v42 = vld [vmem:[%s5445_s16 + $0x40] sm:$0xff]  }
 0xc16   :  { %3531 = vmatprep.subr.bf16.mxu1 %v3916_v42 }
 0xc72   :  { %v1152_v43 = vpop.xlane.xlu0 %1151 }
 0xc73   :  { %4016 = vrcp.f32 %v1152_v43  ;;  %v3917_v43 = vld [vmem:[%s5445_s16] sm:$0xff]  }
 0xc74   :  { %v1155_v44 = vpop.xlane.xlu1 %1154 }
 0xc75   :  { %4018 = vrcp.f32 %v1155_v44  ;;  %v3918_v44 = vld [vmem:[%s5445_s16 + $0x48] sm:$0xff]  }
 0xc76   :  { %v1162_v45 = vpop.permute.xlu0 %1161 }
 0xc77   :  { %3721 = vmatpush3.bf16.msra.mxu0 %v1162_v45  ;;  %v3919_v45 = vld [vmem:[%s5445_s16 + $0x8] sm:$0xff]  }
 0xc7d   :  { %v4017_v4 = vpop.eup %4016 }
 0xc7e   :  { %v1158_v47 = vmul.f32 %v4017_v4, %v4013_v31  ;;  %v3920_v4 = vld [vmem:[%s5445_s16 + $0x50] sm:$0xff]  }
 0xc7f   :  { %v4019_v46 = vpop.eup %4018 }
 0xc80   :  { %v1159_v48 = vmul.f32 %v4019_v46, %v4015_v6  ;;  %v3921_v46 = vld [vmem:[%s5445_s16 + $0x10] sm:$0xff]  }
 0xc82   :  { %v1160_v49 = vpack.c.bf16 %v1159_v48, %v1158_v47  ;;  %v3922_v47 = vld [vmem:[%s5445_s16 + $0x58] sm:$0xff]  }
 0xc83   :  { %v3923_v48 = vld [vmem:[%s5445_s16 + $0x18] sm:$0xff]  }
 0xc84   :  { %3723 = vmatmul.mubr.msk.bf16.vlgmr.msra.gmra.mrb[20].mxu0 %vm556_vm2, %v1160_v49  ;;  %v3924_v49 = vld [vmem:[%s5445_s16 + $0x60] sm:$0xff]  }
 0xc85   :  { %1412 = vmatprep.mubr.bf16.mxu0 %v4436_v22 }
 0xd57   :  { %v1201_v50 = vpop.f32.mrb[20].mxu0 }
 0xd58   :  { %v3724_v30 = vpop.f32.mrb[21].mxu0 }
 0xd59   :  { %v1204_v51 = vpop.f32.mrb[22].mxu0  ;;  %v3926_v30 = vld [vmem:[%s5445_s16 + $0x68] sm:$0xff]  }
 0xd5a   :  { %v1208_v52 = vpack.c.bf16 %v1204_v51, %v1201_v50  ;;  %v3725_v53 = vpop.f32.mrb[23].mxu0  ;;  %v3925_v50 = vld [vmem:[%s5445_s16 + $0x20] sm:$0xff]   ;;  %v3927_v51 = vld [vmem:[%s5445_s16 + $0x28] sm:$0xff]  }
 0xd5b   :  { %v3929_v53 = vld [vmem:[%s5445_s16 + $0x30] sm:$0xff]  }
 0xd5c   :  { %3729 = vmatmul.mubr.msk.bf16.vlgmr.msra.gmra.mrb[32].mxu1 %vm556_vm2, %v1208_v52  ;;  %v3928_v52 = vld [vmem:[%s5445_s16 + $0x70] sm:$0xff]  }
 0xd5d   :  { %3532 = vmatpush3.bf16.msra.mxu1 %v3917_v43 }
 0xd5e   :  { %3533 = vmatprep.subr.bf16.mxu1 %v3918_v44 }
 0xd61   :  { %3534 = vmatpush3.bf16.msra.mxu1 %v3919_v45 }
 0xd62   :  { %3535 = vmatprep.subr.bf16.mxu1 %v3920_v4 }
 0xd65   :  { %3536 = vmatpush3.bf16.msra.mxu1 %v3921_v46 }
 0xd66   :  { %3537 = vmatprep.subr.bf16.mxu1 %v3922_v47 }
 0xd69   :  { %3538 = vmatpush3.bf16.msra.mxu1 %v3923_v48 }
 0xd6a   :  { %3539 = vmatprep.subr.bf16.mxu1 %v3924_v49 }
 0xd6d   :  { %3540 = vmatpush3.bf16.msra.mxu1 %v3925_v50 }
 0xd6e   :  { %3541 = vmatprep.subr.bf16.mxu1 %v3926_v30  ;;  %v3323_v30 = vld [vmem:[#allocation19] ss:$0 sm:$0xff] }
 0xd71   :  { %3542 = vmatpush3.bf16.msra.mxu1 %v3927_v51 }
 0xd72   :  { %3543 = vmatprep.subr.bf16.mxu1 %v3928_v52 }
 0xd75   :  { %3544 = vmatpush3.bf16.msra.mxu1 %v3929_v53 }
 0xe2f   :  { %v1252_v33 = vpop.f32.mrb[32].mxu1 }
 0xe30   :  { %v1259_v55 = vadd.f32 %v1252_v33, %v1081_v36  ;;  %v3730_v56 = vpop.f32.mrb[33].mxu1  ;;  %v3930_v33 = vld [vmem:[%s5445_s16 + $0x78] sm:$0xff]  }
 0xe31   :  { %v1255_v57 = vpop.f32.mrb[34].mxu1  ;;  %3545 = vmatprep.subr.bf16.mxu1 %v3930_v33 }
 0xe32   :  { %v1268_v58 = vadd.f32 %v3311_v54, %v1259_v55  ;;  %v1260_v60 = vadd.f32 %v1255_v57, %v1082_v41  ;;  %v3731_v61 = vpop.f32.mrb[35].mxu1  ;;  %v1327_v55 = vlaneseq }
 0xe34   :  { %v1269_v62 = vadd.f32 %v3311_v54, %v1260_v60  ;;  %v1270_v63 = vadd.f32 %v1268_v58, %v4830_v37  ;;  %v3931_v54 = vld [vmem:[%s5445_s16 + $0x38] sm:$0xff]   ;;  %v5070_v56 = vshrl.u32 %v1327_v55, 7  ;;  %v1325_v58 = vld [vmem:[%s5444_s15] sm:$0x3] }
 0xe35   :  { %3546 = vmatpush3.bf16.msra.mxu1 %v3931_v54 }
 0xe36   :  { %v1274_v0 = vsel %vm255_vm0, %v1270_v63, 0.0  ;;  %v1271_v1 = vadd.f32 %v1269_v62, %v4832_v38  ;;  %v3906_v38 = vld [vmem:[%s5443_s14 + $0x4] ss:$8 sps:$4 sm:$0xff]   ;;  %3756 = vmatprep.subr.bf16.mxu1 %v4431_v15  ;;  %v1329_v57 = vsub.s32 0, %v5070_v56  ;;  %v1333_v60 = vsub.s32 1, %v5070_v56 }
 0xe37   :  { %1275 = vadd.xlane.f32.xlu1 %v1274_v0  ;;  %1380 = vmatprep.subr.bf16.mxu0 %v3906_v38 }
 0xe38   :  { %v1277_v2 = vsel %vm255_vm0, %v1271_v1, 0.0  ;;  %1381 = vmatpush1.bf16.msra.mxu0 %v3904_v14  ;;  %v1330_v61 = vrot.slane %v1325_v58, %v1329_v57  ;;  %v1334_v62 = vrot.slane %v1325_v58, %v1333_v60 }
 0xe39   :  { %1382 = vmatprep.subr.bf16.mxu0 %v3909_v16 }
 0xe3b   :  { %1278 = vadd.xlane.f32.xlu1 %v1277_v2 }
 0xe3c   :  { %1383 = vmatpush1.bf16.msra.mxu0 %v3907_v17 }
 0xe3d   :  { %1384 = vmatprep.subr.bf16.mxu0 %v3912_v18 }
 0xe40   :  { %1385 = vmatpush1.bf16.msra.mxu0 %v3910_v19 }
 0xe41   :  { %1386 = vmatprep.subr.bf16.mxu0 %v3915_v21 }
 0xe44   :  { %1387 = vmatpush1.bf16.msra.mxu0 %v3913_v20 }
 0xe45   :  { %3732 = vmatprep.subr.bf16.mxu0 %v4431_v15 }
 0xec4   :  { %v1276_v3 = vpop.xlane.xlu1 %1275 }
 0xec5   :  { %v1280_v59 = vmul.f32 0.015625, %v1276_v3 }
 0xec7   :  { %v1282_v5 = vsub.f32 %v1270_v63, %v1280_v59 }
 0xec8   :  { %v1279_v7 = vpop.xlane.xlu1 %1278 }
 0xec9   :  { %v1281_v8 = vmul.f32 0.015625, %v1279_v7  ;;  %v1284_v9 = vmul.f32 %v1282_v5, %v1282_v5 }
 0xecb   :  { %v1283_v11 = vsub.f32 %v1271_v1, %v1281_v8  ;;  %v1286_v12 = vsel %vm255_vm0, %v1284_v9, 0.0 }
 0xecc   :  { %1287 = vadd.xlane.f32.xlu1 %v1286_v12 }
 0xecd   :  { %v1285_v13 = vmul.f32 %v1283_v11, %v1283_v11 }
 0xecf   :  { %v1289_v37 = vsel %vm255_vm0, %v1285_v13, 0.0 }
 0xed0   :  { %1290 = vadd.xlane.f32.xlu1 %v1289_v37 }
 0xf59   :  { %v1288_v23 = vpop.xlane.xlu1 %1287 }
 0xf5a   :  { %v1292_v24 = vmul.f32 0.015625, %v1288_v23 }
 0xf5c   :  { %v1294_v25 = vadd.f32 1e-12, %v1292_v24 }
 0xf5d   :  { %v1291_v26 = vpop.xlane.xlu1 %1290 }
 0xf5e   :  { %4020 = vrsqrt.f32 %v1294_v25  ;;  %v1293_v27 = vmul.f32 0.015625, %v1291_v26 }
 0xf60   :  { %v1295_v28 = vadd.f32 1e-12, %v1293_v27 }
 0xf62   :  { %4022 = vrsqrt.f32 %v1295_v28 }
 0xf68   :  { %v4021_v29 = vpop.eup %4020 }
 0xf69   :  { %v1298_v31 = vmul.f32 %v4021_v29, %v1282_v5 }
 0xf6b   :  { %v1306_v34 = vmul.f32 %v3312_v32, %v1298_v31 }
 0xf6c   :  { %v4023_v6 = vpop.eup %4022 }
 0xf6d   :  { %v1299_v10 = vmul.f32 %v4023_v6, %v1283_v11  ;;  %v5012_v39 = vadd.f32 %v3313_v35, %v1306_v34 }
 0xf6f   :  { %v1307_v36 = vmul.f32 %v3312_v32, %v1299_v10 }
 0xf71   :  { %v5014_v40 = vadd.f32 %v3313_v35, %v1307_v36 }
 0xf73   :  { %v1316_v41 = vpack.c.bf16 %v5014_v40, %v5012_v39 }
 0xf75   :  { %3322 = vmatmul.mubr.msk.bf16.vlgmr.msra.gmra.mrb[24].mxu0 %vm255_vm0, %v1316_v41 }
 0xf76   :  { %3740 = vmatprep.mubr.msk.bf16.mxu0 %vm4432_vm1, %v4431_v15 }
0x1048   :  { %v1414_v63 = vpop.f32.mrb[24].mxu0 }
0x1049   :  { %v1415_v0 = vadd.f32 %v1414_v63, %v1330_v61  ;;  %v1416_v1 = vpop.f32.mrb[25].mxu0 }
0x104a   :  { %v1417_v2 = vadd.f32 %v1416_v1, %v1334_v62  ;;  %v1418_v3 = vpop.f32.mrb[26].mxu0 }
0x104b   :  { %v1427_v59 = vmul.f32 0.044715, %v1415_v0  ;;  %v1419_v5 = vadd.f32 %v1418_v3, %v1330_v61  ;;  %v1420_v7 = vpop.f32.mrb[27].mxu0  ;;  %v1423_v35 = vmul.f32 0.5, %v1415_v0 }
0x104c   :  { %v1428_v8 = vmul.f32 0.044715, %v1417_v2  ;;  %v1421_v9 = vadd.f32 %v1420_v7, %v1334_v62  ;;  %v1424_v42 = vmul.f32 0.5, %v1417_v2 }
0x104d   :  { %v1431_v11 = vmul.f32 %v1427_v59, %v1415_v0  ;;  %v1429_v12 = vmul.f32 0.044715, %v1419_v5  ;;  %v1425_v36 = vmul.f32 0.5, %v1419_v5 }
0x104e   :  { %v1432_v13 = vmul.f32 %v1428_v8, %v1417_v2  ;;  %v1430_v37 = vmul.f32 0.044715, %v1421_v9  ;;  %v1426_v43 = vmul.f32 0.5, %v1421_v9 }
0x104f   :  { %v1435_v38 = vmul.f32 %v1431_v11, %v1415_v0  ;;  %v1433_v14 = vmul.f32 %v1429_v12, %v1419_v5  ;;  %v3933_v12 = vld [vmem:[%s5491_s28 + $0x20] sm:$0xff]  }
0x1050   :  { %v1436_v16 = vmul.f32 %v1432_v13, %v1417_v2  ;;  %v1434_v17 = vmul.f32 %v1430_v37, %v1421_v9  ;;  %v3934_v13 = vld [vmem:[%s5489_s2 + $0x28] sm:$0xff]  }
0x1051   :  { %v1439_v18 = vadd.f32 %v1435_v38, %v1415_v0  ;;  %v1437_v19 = vmul.f32 %v1433_v14, %v1419_v5  ;;  %v3935_v37 = vld [vmem:[%s5491_s28 + $0x28] sm:$0xff]   ;;  %v3936_v38 = vld [vmem:[%s5489_s2 + $0x30] sm:$0xff]  }
0x1052   :  { %v1438_v20 = vmul.f32 %v1434_v17, %v1421_v9  ;;  %v1440_v21 = vadd.f32 %v1436_v16, %v1417_v2  ;;  %v3937_v14 = vld [vmem:[%s5491_s28 + $0x30] sm:$0xff]   ;;  %v3938_v16 = vld [vmem:[%s5489_s2 + $0x38] sm:$0xff]  }
0x1053   :  { %v1443_v23 = vmul.f32 0.7978846, %v1439_v18  ;;  %v1441_v24 = vadd.f32 %v1437_v19, %v1419_v5  ;;  %v3939_v17 = vld [vmem:[%s5491_s28 + $0x38] sm:$0xff]  }
0x1054   :  { %v1442_v25 = vadd.f32 %v1438_v20, %v1421_v9  ;;  %v1444_v26 = vmul.f32 0.7978846, %v1440_v21 }
0x1055   :  { %4024 = vtanh.f32 %v1443_v23  ;;  %v1445_v27 = vmul.f32 0.7978846, %v1441_v24 }
0x1056   :  { %v1446_v28 = vmul.f32 0.7978846, %v1442_v25  ;;  %4026 = vtanh.f32 %v1444_v26 }
0x1057   :  { %4028 = vtanh.f32 %v1445_v27  ;;  %v3340_v27 = vld [vmem:[#allocation20] ss:$0 sm:$0xff] }
0x1058   :  { %4030 = vtanh.f32 %v1446_v28 }
0x105f   :  { %v4025_v29 = vpop.eup %4024 }
0x1060   :  { %v4027_v31 = vpop.eup %4026  ;;  %v1451_v32 = vadd.f32 1.0, %v4025_v29 }
0x1061   :  { %v4029_v6 = vpop.eup %4028  ;;  %v1452_v34 = vadd.f32 1.0, %v4027_v31 }
0x1062   :  { %v4031_v10 = vpop.eup %4030  ;;  %v1453_v41 = vadd.f32 1.0, %v4029_v6  ;;  %v1455_v45 = vmul.f32 %v1451_v32, %v1423_v35  ;;  %v3341_v32 = vld [vmem:[#allocation22] ss:$0 sm:$0xff]  ;;  %v3940_v35 = vld [vmem:[%s5490_s0 + $0x20] sm:$0xff]  }
0x1063   :  { %v1454_v44 = vadd.f32 1.0, %v4031_v10  ;;  %v1456_v46 = vmul.f32 %v1452_v34, %v1424_v42  ;;  %v3942_v42 = vld [vmem:[%s5490_s0 + $0x30] sm:$0xff]  }
0x1064   :  { %v1457_v4 = vmul.f32 %v1453_v41, %v1425_v36  ;;  %v3941_v41 = vld [vmem:[%s5490_s0 + $0x28] sm:$0xff]  }
0x1065   :  { %v1458_v47 = vmul.f32 %v1454_v44, %v1426_v43  ;;  %v3943_v43 = vld [vmem:[%s5490_s0 + $0x38] sm:$0xff]   ;;  %v3350_v44 = vld [vmem:[#allocation10 + $0x1] ss:$0 sm:$0xff] }
0x1066   :  { %v1459_v48 = vpack.c.bf16 %v1457_v4, %v1455_v45  ;;  %v3378_v4 = vld [vmem:[#allocation13 + $0x1] ss:$0 sm:$0xff] }
0x1067   :  { %v1460_v49 = vpack.c.bf16 %v1458_v47, %v1456_v46 }
0x1069   :  { %1628 = vmatprep.mubr.bf16.mxu1 %v1460_v49 }
0x106a   :  { %1629 = vmatmul.mubr.bf16.vlgmr.msra.gmra.mrb[36].mxu1 %v1459_v48 }
0x106b   :  { %3764 = vmatprep.mubr.msk.bf16.mxu1 %vm4432_vm1, %v4431_v15  ;;  %3757 = vmatpush3.bf16.msra.mxu1 %v3933_v12 }
0x106c   :  { %3758 = vmatprep.subr.bf16.mxu1 %v4431_v15 }
0x106f   :  { %3759 = vmatpush3.bf16.msra.mxu1 %v3935_v37 }
0x1070   :  { %3760 = vmatprep.subr.bf16.mxu1 %v4431_v15 }
0x1073   :  { %3761 = vmatpush3.bf16.msra.mxu1 %v3937_v14 }
0x1074   :  { %3762 = vmatprep.subr.bf16.mxu1 %v4431_v15 }
0x1077   :  { %3763 = vmatpush3.bf16.msra.mxu1 %v3939_v17  ;;  %v5180_v17 = vld [vmem:[#allocation5 + $0x8] sm:$0xff] }
0x1078   :  { %3774 = vmatprep.subr.bf16.mxu1 %v4431_v15 }
0x113d   :  { %v3547_v50 = vpop.f32.mrb[36].mxu1 }
0x113e   :  { %v3548_v51 = vpop.f32.mrb[37].mxu1 }
0x113f   :  { %v3549_v52 = vadd.f32 %v3548_v51, %v3547_v50  ;;  %v3550_v53 = vpop.f32.mrb[38].mxu1 }
0x1140   :  { %v3551_v33 = vpop.f32.mrb[39].mxu1 }
0x1141   :  { %v1631_v54 = vadd.f32 %v3549_v52, %v3323_v30  ;;  %v3552_v55 = vadd.f32 %v3551_v33, %v3550_v53 }
0x1143   :  { %v1634_v58 = vadd.f32 %v3552_v55, %v3323_v30  ;;  %v1637_v61 = vadd.f32 %v1631_v54, %v5012_v39 }
0x1145   :  { %v1641_v62 = vsel %vm255_vm0, %v1637_v61, 0.0  ;;  %v1638_v63 = vadd.f32 %v1634_v58, %v5014_v40  ;;  %v3932_v40 = vld [vmem:[%s5489_s2 + $0x20] sm:$0xff]  }
0x1146   :  { %1642 = vadd.xlane.f32.xlu1 %v1641_v62  ;;  %3733 = vmatpush3.bf16.msra.mxu0 %v3932_v40 }
0x1147   :  { %v1644_v0 = vsel %vm255_vm0, %v1638_v63, 0.0  ;;  %3734 = vmatprep.subr.bf16.mxu0 %v4431_v15 }
0x114a   :  { %1645 = vadd.xlane.f32.xlu1 %v1644_v0  ;;  %3735 = vmatpush3.bf16.msra.mxu0 %v3934_v13 }
0x114b   :  { %3736 = vmatprep.subr.bf16.mxu0 %v4431_v15 }
0x114e   :  { %3737 = vmatpush3.bf16.msra.mxu0 %v3936_v38  ;;  %v5176_v38 = vld [vmem:[#allocation5] sm:$0xff] }
0x114f   :  { %3738 = vmatprep.subr.bf16.mxu0 %v4431_v15 }
0x1152   :  { %3739 = vmatpush3.bf16.msra.mxu0 %v3938_v16 }
0x1153   :  { %3744 = vmatprep.subr.bf16.mxu0 %v4431_v15 }
0x11d3   :  { %v1643_v1 = vpop.xlane.xlu1 %1642 }
0x11d4   :  { %v1647_v2 = vmul.f32 0.015625, %v1643_v1 }
0x11d6   :  { %v1649_v3 = vsub.f32 %v1637_v61, %v1647_v2  ;;  %v3364_v61 = vld [vmem:[#allocation11 + $0x1] ss:$0 sm:$0xff] }
0x11d7   :  { %v1646_v59 = vpop.xlane.xlu1 %1645 }
0x11d8   :  { %v1648_v5 = vmul.f32 0.015625, %v1646_v59  ;;  %v1651_v7 = vmul.f32 %v1649_v3, %v1649_v3 }
0x11da   :  { %v1650_v8 = vsub.f32 %v1638_v63, %v1648_v5  ;;  %v1653_v9 = vsel %vm255_vm0, %v1651_v7, 0.0 }
0x11db   :  { %1654 = vadd.xlane.f32.xlu0 %v1653_v9 }
0x11dc   :  { %v1652_v11 = vmul.f32 %v1650_v8, %v1650_v8 }
0x11de   :  { %v1656_v39 = vsel %vm255_vm0, %v1652_v11, 0.0 }
0x11df   :  { %1657 = vadd.xlane.f32.xlu1 %v1656_v39 }
0x1268   :  { %v1655_v18 = vpop.xlane.xlu0 %1654 }
0x1269   :  { %v1659_v19 = vmul.f32 0.015625, %v1655_v18 }
0x126b   :  { %v1661_v20 = vadd.f32 1e-12, %v1659_v19 }
0x126c   :  { %v1658_v21 = vpop.xlane.xlu1 %1657 }
0x126d   :  { %4032 = vrsqrt.f32 %v1661_v20  ;;  %v1660_v23 = vmul.f32 0.015625, %v1658_v21 }
0x126f   :  { %v1662_v24 = vadd.f32 1e-12, %v1660_v23 }
0x1271   :  { %4034 = vrsqrt.f32 %v1662_v24 }
0x1277   :  { %v4033_v25 = vpop.eup %4032 }
0x1278   :  { %v1665_v26 = vmul.f32 %v4033_v25, %v1649_v3 }
0x127a   :  { %v1673_v29 = vmul.f32 %v3340_v27, %v1665_v26 }
0x127b   :  { %v4035_v28 = vpop.eup %4034 }
0x127c   :  { %v1666_v31 = vmul.f32 %v4035_v28, %v1650_v8  ;;  %v5121_v34 = vadd.f32 %v3341_v32, %v1673_v29 }
0x127e   :  { %v1674_v6 = vmul.f32 %v3340_v27, %v1666_v31 }
0x1280   :  { %v5123_v10 = vadd.f32 %v3341_v32, %v1674_v6 }
0x1282   :  { %v1683_v36 = vpack.c.bf16 %v5123_v10, %v5121_v34 }
0x1284   :  { %3741 = vmatmul.mubr.msk.bf16.vlgmr.msra.gmra.mrb[28].mxu0 %vm255_vm0, %v1683_v36  ;;  %3765 = vmatmul.mubr.msk.bf16.vlgmr.msra.gmra.mrb[40].mxu1 %vm255_vm0, %v1683_v36 }
0x1285   :  { %3745 = vmatpush3.bf16.msra.mxu0 %v3940_v35  ;;  %3752 = vmatprep.mubr.msk.bf16.mxu0 %vm4432_vm1, %v4431_v15 }
0x1286   :  { %3746 = vmatprep.subr.bf16.mxu0 %v4431_v15  ;;  %3776 = vmatprep.mubr.msk.bf16.mxu1 %vm4432_vm1, %v4431_v15 }
0x1289   :  { %3747 = vmatpush3.bf16.msra.mxu0 %v3941_v41 }
0x128a   :  { %3748 = vmatprep.subr.bf16.mxu0 %v4431_v15 }
0x128d   :  { %3749 = vmatpush3.bf16.msra.mxu0 %v3942_v42 }
0x128e   :  { %3750 = vmatprep.subr.bf16.mxu0 %v4431_v15 }
0x1291   :  { %3751 = vmatpush3.bf16.msra.mxu0 %v3943_v43 }
0x1292   :  { %3768 = vmatprep.subr.bf16.mxu0 %v4431_v15 }
0x1294   :  { %3753 = vmatmul.mubr.msk.bf16.vlgmr.msra.gmra.mrb[32].mxu0 %vm255_vm0, %v1683_v36 }
0x1295   :  { %3770 = vmatprep.mubr.msk.bf16.mxu0 %vm4432_vm1, %v4431_v15 }
0x1357   :  { %v1762_v45 = vpop.f32.mrb[28].mxu0  ;;  %v1926_v46 = vpop.f32.mrb[40].mxu1 }
0x1358   :  { %v3742_v47 = vpop.f32.mrb[29].mxu0  ;;  %v3766_v48 = vpop.f32.mrb[41].mxu1  ;;  %v1763_v30 = vadd.f32 %v3350_v44, %v1762_v45  ;;  %v1927_v51 = vadd.f32 %v3378_v4, %v1926_v46 }
0x1359   :  { %v1765_v49 = vpop.f32.mrb[30].mxu0  ;;  %v1929_v50 = vpop.f32.mrb[42].mxu1 }
0x135a   :  { %v1766_v52 = vadd.f32 %v3350_v44, %v1765_v49  ;;  %v1930_v53 = vadd.f32 %v3378_v4, %v1929_v50  ;;  %v3743_v33 = vpop.f32.mrb[31].mxu0  ;;  %v3767_v54 = vpop.f32.mrb[43].mxu1 }
0x135c   :  { %v5152_v55 = vpack.c.bf16 %v1766_v52, %v1763_v30  ;;  %v5154_v58 = vpack.c.bf16 %v1930_v53, %v1927_v51 }
0x135e   :  { %3775 = vmatpush3.bf16.msra.mxu1 %v5154_v58 }
0x135f   :  { %3786 = vmatprep.subr.bf16.mxu1 %v4431_v15 }
0x1367   :  { %v1844_v62 = vpop.f32.mrb[32].mxu0 }
0x1368   :  { %v3754_v63 = vpop.f32.mrb[33].mxu0  ;;  %v1845_v1 = vadd.f32 %v3364_v61, %v1844_v62 }
0x1369   :  { %v1847_v0 = vpop.f32.mrb[34].mxu0 }
0x136a   :  { %v1848_v2 = vadd.f32 %v3364_v61, %v1847_v0  ;;  %v3755_v3 = vpop.f32.mrb[35].mxu0 }
0x136b   :  { %v3945_v3 = vld [vmem:[%s5439_s10 + $0x28] sm:$0xff]  }
0x136c   :  { %v5158_v59 = vpack.c.bf16 %v1848_v2, %v1845_v1 }
0x136e   :  { %2068 = vrot.lane.b32.xlu1 %v5158_v59, %s4433_s30  ;;  %v1949_v5 = vsel %vm556_vm2, %v5158_v59, 0 }
0x136f   :  { %3769 = vmatpush3.bf16.xpose.msra.mxu0 %v1949_v5 }
0x1370   :  { %3780 = vmatprep.subr.bf16.mxu0 %v4431_v15 }
0x1372   :  { %2065 = vrot.lane.b32.xlu1 %v5152_v55, %s4433_s30 }
0x1376   :  { %3771 = vmatmul.mubr.msk.bf16.vlgmr.msra.gmra.mrb[36].mxu0 %vm556_vm2, %v5152_v55 }
0x1377   :  { %3782 = vmatprep.mubr.msk.bf16.mxu0 %vm4432_vm1, %v4431_v15 }
0x13e0   :  { %v2069_v7 = vpop.permute.xlu1 %2068 }
0x13e1   :  { %v2074_v8 = vsel %vm556_vm2, %v2069_v7, 0 }
0x13e2   :  { %3781 = vmatpush3.bf16.xpose.msra.mxu0 %v2074_v8 }
0x13e3   :  { %3792 = vmatprep.subr.bf16.mxu0 %v4431_v15 }
0x13e4   :  { %v2066_v9 = vpop.permute.xlu1 %2065 }
0x13e9   :  { %3783 = vmatmul.mubr.msk.bf16.vlgmr.msra.gmra.mrb[40].mxu0 %vm556_vm2, %v2066_v9 }
0x13ea   :  { %3794 = vmatprep.mubr.msk.bf16.mxu0 %vm4432_vm1, %v4431_v15  ;;  %3793 = vmatpush3.bf16.msra.mxu0 %v3945_v3 }
0x13eb   :  { %3804 = vmatprep.subr.bf16.mxu0 %v4431_v15 }
0x1449   :  { %v1985_v11 = vpop.f32.mrb[36].mxu0 }
0x144a   :  { %v1992_v39 = vmul.f32 0.25, %v1985_v11  ;;  %v3772_v40 = vpop.f32.mrb[37].mxu0 }
0x144b   :  { %v1988_v12 = vpop.f32.mrb[38].mxu0 }
0x144c   :  { %v1993_v13 = vmul.f32 0.25, %v1988_v12  ;;  %v3773_v37 = vpop.f32.mrb[39].mxu0  ;;  %v1994_v14 = vadd.f32 %v5176_v38, %v1992_v39  ;;  %v3944_v12 = vld [vmem:[%s5439_s10 + $0x20] sm:$0xff]  }
0x144e   :  { %v1996_v16 = vsel %vm556_vm2, %v1994_v14, -inf  ;;  %v1995_v18 = vadd.f32 %v5180_v17, %v1993_v13 }
0x144f   :  { %1997 = vmax.xlane.f32.xlu1 %v1996_v16 }
0x1450   :  { %v1999_v19 = vsel %vm556_vm2, %v1995_v18, -inf }
0x1451   :  { %2000 = vmax.xlane.f32.xlu0 %v1999_v19 }
0x1460   :  { %2295 = vrot.lane.b32.xlu1 %v5158_v59, %s4434_s6 }
0x1464   :  { %2293 = vrot.lane.b32.xlu1 %v5152_v55, %s4434_s6 }
0x14bc   :  { %v2110_v20 = vpop.f32.mrb[40].mxu0 }
0x14bd   :  { %v2117_v21 = vmul.f32 0.25, %v2110_v20  ;;  %v3784_v23 = vpop.f32.mrb[41].mxu0 }
0x14be   :  { %v2113_v24 = vpop.f32.mrb[42].mxu0 }
0x14bf   :  { %v2118_v25 = vmul.f32 0.25, %v2113_v24  ;;  %v3785_v26 = vpop.f32.mrb[43].mxu0  ;;  %v2119_v27 = vadd.f32 %v5176_v38, %v2117_v21 }
0x14c1   :  { %v2121_v28 = vsel %vm556_vm2, %v2119_v27, -inf  ;;  %v2120_v29 = vadd.f32 %v5180_v17, %v2118_v25 }
0x14c2   :  { %2122 = vmax.xlane.f32.xlu0 %v2121_v28 }
0x14c3   :  { %v2124_v31 = vsel %vm556_vm2, %v2120_v29, -inf }
0x14c6   :  { %2125 = vmax.xlane.f32.xlu0 %v2124_v31 }
0x14dc   :  { %v1998_v32 = vpop.xlane.xlu1 %1997 }
0x14dd   :  { %v2002_v6 = vsub.f32 %v1994_v14, %v1998_v32 }
0x14de   :  { %v2001_v35 = vpop.xlane.xlu0 %2000 }
0x14df   :  { %v2004_v36 = vmul.f32 1.442695, %v2002_v6  ;;  %v2003_v41 = vsub.f32 %v1995_v18, %v2001_v35 }
0x14e0   :  { %v2296_v23 = vpop.permute.xlu1 %2295 }
0x14e1   :  { %4036 = vpow2.f32 %v2004_v36  ;;  %v2006_v42 = vmul.f32 1.442695, %v2003_v41 }
0x14e3   :  { %4038 = vpow2.f32 %v2006_v42 }
0x14e4   :  { %v2294_v28 = vpop.permute.xlu1 %2293 }
0x14eb   :  { %v4037_v43 = vpop.eup %4036 }
0x14ec   :  { %v2008_v44 = vsel %vm556_vm2, %v4037_v43, 0.0 }
0x14ed   :  { %v4039_v45 = vpop.eup %4038  ;;  %2009 = vadd.xlane.f32.xlu0 %v2008_v44 }
0x14ee   :  { %v2011_v4 = vsel %vm556_vm2, %v4039_v45, 0.0 }
0x14f1   :  { %2012 = vadd.xlane.f32.xlu0 %v2011_v4 }
0x154f   :  { %v2123_v46 = vpop.xlane.xlu0 %2122 }
0x1550   :  { %v2127_v47 = vsub.f32 %v2119_v27, %v2123_v46  ;;  %v2301_v27 = vsel %vm556_vm2, %v2296_v23, 0 }
0x1552   :  { %v2129_v48 = vmul.f32 1.442695, %v2127_v47 }
0x1553   :  { %v2126_v49 = vpop.xlane.xlu0 %2125 }
0x1554   :  { %4040 = vpow2.f32 %v2129_v48  ;;  %v2128_v50 = vsub.f32 %v2120_v29, %v2126_v49 }
0x1556   :  { %v2131_v30 = vmul.f32 1.442695, %v2128_v50 }
0x1558   :  { %4042 = vpow2.f32 %v2131_v30 }
0x155e   :  { %v4041_v51 = vpop.eup %4040 }
0x155f   :  { %v2133_v52 = vsel %vm556_vm2, %v4041_v51, 0.0 }
0x1560   :  { %2134 = vadd.xlane.f32.xlu0 %v2133_v52 }
0x1562   :  { %v4043_v53 = vpop.eup %4042 }
0x1563   :  { %v2136_v33 = vsel %vm556_vm2, %v4043_v53, 0.0 }
0x1564   :  { %2137 = vadd.xlane.f32.xlu0 %v2136_v33 }
0x157a   :  { %2145 = vrot.lane.b32.xlu0 %v5154_v58, %s4433_s30  ;;  %v2010_v54 = vpop.xlane.xlu0 %2009 }
0x157b   :  { %4044 = vrcp.f32 %v2010_v54 }
0x157e   :  { %v2013_v61 = vpop.xlane.xlu0 %2012 }
0x157f   :  { %4046 = vrcp.f32 %v2013_v61 }
0x1585   :  { %v4045_v62 = vpop.eup %4044 }
0x1586   :  { %v2016_v0 = vmul.f32 %v4045_v62, %v4037_v43 }
0x1589   :  { %v4047_v63 = vpop.eup %4046 }
0x158a   :  { %v2017_v1 = vmul.f32 %v4047_v63, %v4039_v45 }
0x158c   :  { %v2018_v2 = vpack.c.bf16 %v2017_v1, %v2016_v0 }
0x158e   :  { %3777 = vmatmul.mubr.msk.bf16.vlgmr.msra.gmra.mrb[44].mxu1 %vm556_vm2, %v2018_v2 }
0x158f   :  { %3788 = vmatprep.mubr.msk.bf16.mxu1 %vm4432_vm1, %v4431_v15 }
0x15ed   :  { %v2135_v5 = vpop.xlane.xlu0 %2134 }
0x15ee   :  { %4048 = vrcp.f32 %v2135_v5 }
0x15f1   :  { %v2138_v7 = vpop.xlane.xlu0 %2137 }
0x15f2   :  { %4050 = vrcp.f32 %v2138_v7 }
0x15f5   :  { %v2146_v8 = vpop.permute.xlu0 %2145 }
0x15f6   :  { %3787 = vmatpush3.bf16.msra.mxu1 %v2146_v8 }
0x15f7   :  { %3798 = vmatprep.subr.bf16.mxu1 %v4431_v15 }
0x15f8   :  { %v4049_v9 = vpop.eup %4048 }
0x15f9   :  { %v2141_v39 = vmul.f32 %v4049_v9, %v4041_v51 }
0x15fc   :  { %v4051_v11 = vpop.eup %4050 }
0x15fd   :  { %v2142_v40 = vmul.f32 %v4051_v11, %v4043_v53 }
0x15ff   :  { %v2143_v13 = vpack.c.bf16 %v2142_v40, %v2141_v39 }
0x1601   :  { %3789 = vmatmul.mubr.msk.bf16.vlgmr.msra.gmra.mrb[48].mxu1 %vm556_vm2, %v2143_v13 }
0x1602   :  { %3799 = vmatpush3.bf16.msra.mxu1 %v3944_v12  ;;  %3800 = vmatprep.mubr.msk.bf16.mxu1 %vm4432_vm1, %v4431_v15 }
0x1603   :  { %3810 = vmatprep.subr.bf16.mxu1 %v4431_v15 }
0x1661   :  { %v2056_v37 = vpop.f32.mrb[44].mxu1 }
0x1662   :  { %v3778_v14 = vpop.f32.mrb[45].mxu1 }
0x1663   :  { %v2059_v16 = vpop.f32.mrb[46].mxu1 }
0x1664   :  { %v2063_v18 = vpack.c.bf16 %v2059_v16, %v2056_v37  ;;  %v3779_v19 = vpop.f32.mrb[47].mxu1  ;;  %v3946_v37 = vld [vmem:[%s5439_s10 + $0x30] sm:$0xff]  }
0x1666   :  { %3801 = vmatmul.mubr.msk.bf16.vlgmr.msra.gmra.mrb[52].mxu1 %vm556_vm2, %v2063_v18 }
0x1667   :  { %3812 = vmatprep.mubr.msk.bf16.mxu1 %vm4432_vm1, %v4431_v15 }
0x16d4   :  { %v2185_v20 = vpop.f32.mrb[48].mxu1 }
0x16d5   :  { %v3790_v21 = vpop.f32.mrb[49].mxu1 }
0x16d6   :  { %v2188_v24 = vpop.f32.mrb[50].mxu1 }
0x16d7   :  { %v2192_v25 = vpack.c.bf16 %v2188_v24, %v2185_v20  ;;  %v3791_v26 = vpop.f32.mrb[51].mxu1 }
0x16d9   :  { %3795 = vmatmul.mubr.msk.bf16.vlgmr.msra.gmra.mrb[44].mxu0 %vm556_vm2, %v2192_v25 }
0x16da   :  { %3805 = vmatpush3.bf16.xpose.msra.mxu0 %v2301_v27  ;;  %3806 = vmatprep.mubr.msk.bf16.mxu0 %vm4432_vm1, %v4431_v15 }
0x16db   :  { %3816 = vmatprep.subr.bf16.mxu0 %v4431_v15 }
0x16e1   :  { %3807 = vmatmul.mubr.msk.bf16.vlgmr.msra.gmra.mrb[48].mxu0 %vm556_vm2, %v2294_v28 }
0x16e2   :  { %3818 = vmatprep.mubr.msk.bf16.mxu0 %vm4432_vm1, %v4431_v15  ;;  %3817 = vmatpush3.bf16.msra.mxu0 %v3946_v37 }
0x16e3   :  { %3828 = vmatprep.subr.bf16.mxu0 %v4431_v15 }
0x1739   :  { %v2286_v29 = vpop.f32.mrb[52].mxu1 }
0x173a   :  { %v3802_v31 = vpop.f32.mrb[53].mxu1 }
0x173b   :  { %v2289_v32 = vpop.f32.mrb[54].mxu1 }
0x173c   :  { %v3803_v6 = vpop.f32.mrb[55].mxu1 }
0x17ac   :  { %v2236_v35 = vpop.f32.mrb[44].mxu0 }
0x17ad   :  { %v5224_v36 = vadd.f32 %v2286_v29, %v2236_v35  ;;  %v3796_v41 = vpop.f32.mrb[45].mxu0 }
0x17ae   :  { %v2239_v42 = vpop.f32.mrb[46].mxu0 }
0x17af   :  { %v5226_v43 = vadd.f32 %v2289_v32, %v2239_v42  ;;  %v3797_v44 = vpop.f32.mrb[47].mxu0 }
0x17b4   :  { %v2337_v45 = vpop.f32.mrb[48].mxu0 }
0x17b5   :  { %v2344_v4 = vmul.f32 0.25, %v2337_v45  ;;  %v3808_v46 = vpop.f32.mrb[49].mxu0 }
0x17b6   :  { %v2340_v47 = vpop.f32.mrb[50].mxu0 }
0x17b7   :  { %v2345_v48 = vmul.f32 0.25, %v2340_v47  ;;  %v3809_v49 = vpop.f32.mrb[51].mxu0  ;;  %v2346_v50 = vadd.f32 %v5176_v38, %v2344_v4 }
0x17b9   :  { %v2348_v30 = vsel %vm556_vm2, %v2346_v50, -inf  ;;  %v2347_v51 = vadd.f32 %v5180_v17, %v2345_v48 }
0x17ba   :  { %2349 = vmax.xlane.f32.xlu0 %v2348_v30 }
0x17bb   :  { %v2351_v52 = vsel %vm556_vm2, %v2347_v51, -inf }
0x17bc   :  { %2352 = vmax.xlane.f32.xlu1 %v2351_v52 }
0x17cd   :  { %2473 = vrot.lane.b32.xlu1 %v5158_v59, %s4435_s3 }
0x17d1   :  { %2471 = vrot.lane.b32.xlu1 %v5152_v55, %s4435_s3 }
0x1847   :  { %v2350_v53 = vpop.xlane.xlu0 %2349 }
0x1848   :  { %v2354_v33 = vsub.f32 %v2346_v50, %v2350_v53 }
0x1849   :  { %v2353_v54 = vpop.xlane.xlu1 %2352 }
0x184a   :  { %v2356_v61 = vmul.f32 1.442695, %v2354_v33  ;;  %v2355_v62 = vsub.f32 %v2347_v51, %v2353_v54 }
0x184c   :  { %4052 = vpow2.f32 %v2356_v61  ;;  %v2358_v63 = vmul.f32 1.442695, %v2355_v62 }
0x184d   :  { %v2474_v39 = vpop.permute.xlu1 %2473 }
0x184e   :  { %4054 = vpow2.f32 %v2358_v63  ;;  %v2479_v12 = vsel %vm556_vm2, %v2474_v39, 0 }
0x1851   :  { %v2472_v13 = vpop.permute.xlu1 %2471 }
0x1856   :  { %v4053_v0 = vpop.eup %4052 }
0x1857   :  { %v2360_v1 = vsel %vm556_vm2, %v4053_v0, 0.0 }
0x1858   :  { %v4055_v2 = vpop.eup %4054  ;;  %2361 = vadd.xlane.f32.xlu0 %v2360_v1 }
0x1859   :  { %v2363_v3 = vsel %vm556_vm2, %v4055_v2, 0.0 }
0x185c   :  { %2364 = vadd.xlane.f32.xlu0 %v2363_v3 }
0x1872   :  { %2371 = vrot.lane.b32.xlu0 %v5154_v58, %s4434_s6 }
0x18e5   :  { %v2362_v55 = vpop.xlane.xlu0 %2361 }
0x18e6   :  { %4056 = vrcp.f32 %v2362_v55 }
0x18e9   :  { %v2365_v59 = vpop.xlane.xlu0 %2364 }
0x18ea   :  { %4058 = vrcp.f32 %v2365_v59  ;;  %v3408_v59 = vld [vmem:[#allocation14 + $0x1] ss:$0 sm:$0xff] }
0x18ed   :  { %v2372_v5 = vpop.permute.xlu0 %2371 }
0x18ee   :  { %3811 = vmatpush3.bf16.msra.mxu1 %v2372_v5 }
0x18ef   :  { %3822 = vmatprep.subr.bf16.mxu1 %v4431_v15 }
0x18f0   :  { %v4057_v7 = vpop.eup %4056 }
0x18f1   :  { %v2368_v9 = vmul.f32 %v4057_v7, %v4053_v0 }
0x18f4   :  { %v4059_v8 = vpop.eup %4058 }
0x18f5   :  { %v2369_v11 = vmul.f32 %v4059_v8, %v4055_v2 }
0x18f7   :  { %v2370_v40 = vpack.c.bf16 %v2369_v11, %v2368_v9 }
0x18f9   :  { %3813 = vmatmul.mubr.msk.bf16.vlgmr.msra.gmra.mrb[56].mxu1 %vm556_vm2, %v2370_v40 }
0x18fa   :  { %3823 = vmatpush3.bf16.xpose.msra.mxu1 %v2479_v12  ;;  %3824 = vmatprep.mubr.msk.bf16.mxu1 %vm4432_vm1, %v4431_v15 }
0x18fb   :  { %3834 = vmatprep.subr.bf16.mxu1 %v4431_v15 }
0x1901   :  { %3825 = vmatmul.mubr.msk.bf16.vlgmr.msra.gmra.mrb[60].mxu1 %vm556_vm2, %v2472_v13 }
0x1902   :  { %3836 = vmatprep.mubr.msk.bf16.mxu1 %vm4432_vm1, %v4431_v15 }
0x19cc   :  { %v2411_v14 = vpop.f32.mrb[56].mxu1 }
0x19cd   :  { %v3814_v16 = vpop.f32.mrb[57].mxu1 }
0x19ce   :  { %v2414_v18 = vpop.f32.mrb[58].mxu1 }
0x19cf   :  { %v2418_v19 = vpack.c.bf16 %v2414_v18, %v2411_v14  ;;  %v3815_v20 = vpop.f32.mrb[59].mxu1 }
0x19d1   :  { %3819 = vmatmul.mubr.msk.bf16.vlgmr.msra.gmra.mrb[52].mxu0 %vm556_vm2, %v2418_v19 }
0x19d2   :  { %3830 = vmatprep.mubr.msk.bf16.mxu0 %vm4432_vm1, %v4431_v15 }
0x19d4   :  { %v2515_v21 = vpop.f32.mrb[60].mxu1 }
0x19d5   :  { %v2522_v23 = vmul.f32 0.25, %v2515_v21  ;;  %v3826_v24 = vpop.f32.mrb[61].mxu1 }
0x19d6   :  { %v2518_v25 = vpop.f32.mrb[62].mxu1 }
0x19d7   :  { %v2523_v26 = vmul.f32 0.25, %v2518_v25  ;;  %v3827_v27 = vpop.f32.mrb[63].mxu1  ;;  %v2524_v28 = vadd.f32 %v5176_v38, %v2522_v23 }
0x19d8   :  { %v3953_v27 = vld [vmem:[%s5443_s14 + $0x54] ss:$8 sps:$4 sm:$0xff]  }
0x19d9   :  { %v2526_v29 = vsel %vm556_vm2, %v2524_v28, -inf  ;;  %v2525_v31 = vadd.f32 %v5180_v17, %v2523_v26  ;;  %v3948_v26 = vld [vmem:[%s5443_s14 + $0x40] ss:$8 sps:$4 sm:$0xff]  }
0x19da   :  { %2527 = vmax.xlane.f32.xlu1 %v2526_v29  ;;  %v3956_v29 = vld [vmem:[%s5443_s14 + $0x64] ss:$8 sps:$4 sm:$0xff]  }
0x19db   :  { %v2529_v32 = vsel %vm556_vm2, %v2525_v31, -inf }
0x19dc   :  { %2530 = vmax.xlane.f32.xlu0 %v2529_v32  ;;  %v3957_v32 = vld [vmem:[%s5443_s14 + $0x70] ss:$8 sps:$4 sm:$0xff]  }
0x19eb   :  { %2549 = vrot.lane.b32.xlu1 %v5154_v58, %s4435_s3  ;;  %v3947_v58 = vld [vmem:[%s5439_s10 + $0x38] sm:$0xff]  }
0x19ec   :  { %3835 = vmatpush3.bf16.msra.mxu1 %v3947_v58 }
0x1a67   :  { %v2528_v6 = vpop.xlane.xlu1 %2527 }
0x1a68   :  { %v2532_v35 = vsub.f32 %v2524_v28, %v2528_v6  ;;  %v3951_v28 = vld [vmem:[%s5443_s14 + $0x50] ss:$8 sps:$4 sm:$0xff]   ;;  %v3959_v6 = vld [vmem:[%s5443_s14 + $0x74] ss:$8 sps:$4 sm:$0xff]  }
0x1a69   :  { %v2531_v41 = vpop.xlane.xlu0 %2530 }
0x1a6a   :  { %v2534_v42 = vmul.f32 1.442695, %v2532_v35  ;;  %v2533_v44 = vsub.f32 %v2525_v31, %v2531_v41  ;;  %v3954_v31 = vld [vmem:[%s5443_s14 + $0x60] ss:$8 sps:$4 sm:$0xff]  }
0x1a6b   :  { %v2550_v45 = vpop.permute.xlu1 %2549 }
0x1a6c   :  { %4060 = vpow2.f32 %v2534_v42  ;;  %v2536_v4 = vmul.f32 1.442695, %v2533_v44  ;;  %3829 = vmatpush3.bf16.msra.mxu0 %v2550_v45 }
0x1a6e   :  { %4062 = vpow2.f32 %v2536_v4 }
0x1a76   :  { %v4061_v38 = vpop.eup %4060 }
0x1a77   :  { %v2538_v17 = vsel %vm556_vm2, %v4061_v38, 0.0 }
0x1a78   :  { %v4063_v46 = vpop.eup %4062  ;;  %2539 = vadd.xlane.f32.xlu0 %v2538_v17 }
0x1a79   :  { %v2541_v47 = vsel %vm556_vm2, %v4063_v46, 0.0 }
0x1a7c   :  { %2542 = vadd.xlane.f32.xlu0 %v2541_v47 }
0x1aa4   :  { %v2462_v48 = vpop.f32.mrb[52].mxu0 }
0x1aa5   :  { %v2469_v49 = vadd.f32 %v2462_v48, %v5224_v36  ;;  %v3820_v50 = vpop.f32.mrb[53].mxu0 }
0x1aa6   :  { %v2465_v30 = vpop.f32.mrb[54].mxu0 }
0x1aa7   :  { %v2470_v51 = vadd.f32 %v2465_v30, %v5226_v43  ;;  %v3821_v52 = vpop.f32.mrb[55].mxu0 }
0x1b05   :  { %v2540_v53 = vpop.xlane.xlu0 %2539 }
0x1b06   :  { %4064 = vrcp.f32 %v2540_v53  ;;  %v3960_v53 = vld [vmem:[%s5445_s16 + $0xc0] sm:$0xff]  }
0x1b07   :  { %3592 = vmatprep.subr.bf16.mxu1 %v3960_v53 }
0x1b09   :  { %v2543_v33 = vpop.xlane.xlu0 %2542 }
0x1b0a   :  { %4066 = vrcp.f32 %v2543_v33  ;;  %v3961_v33 = vld [vmem:[%s5445_s16 + $0x80] sm:$0xff]  }
0x1b10   :  { %v4065_v54 = vpop.eup %4064 }
0x1b11   :  { %v2546_v62 = vmul.f32 %v4065_v54, %v4061_v38  ;;  %v3962_v54 = vld [vmem:[%s5445_s16 + $0xc8] sm:$0xff]  }
0x1b14   :  { %v4067_v61 = vpop.eup %4066 }
0x1b15   :  { %v2547_v63 = vmul.f32 %v4067_v61, %v4063_v46  ;;  %v3409_v46 = vld [vmem:[#allocation16 + $0x1] ss:$0 sm:$0xff] }
0x1b16   :  { %v3963_v61 = vld [vmem:[%s5445_s16 + $0x88] sm:$0xff]  }
0x1b17   :  { %v2548_v0 = vpack.c.bf16 %v2547_v63, %v2546_v62  ;;  %v3964_v62 = vld [vmem:[%s5445_s16 + $0xd0] sm:$0xff]  }
0x1b18   :  { %v3965_v63 = vld [vmem:[%s5445_s16 + $0x90] sm:$0xff]  }
0x1b19   :  { %3831 = vmatmul.mubr.msk.bf16.vlgmr.msra.gmra.mrb[56].mxu0 %vm556_vm2, %v2548_v0  ;;  %v3966_v0 = vld [vmem:[%s5445_s16 + $0xd8] sm:$0xff]  }
0x1b1a   :  { %2805 = vmatprep.mubr.bf16.mxu0 %v4436_v22 }
0x1bec   :  { %v2589_v1 = vpop.f32.mrb[56].mxu0 }
0x1bed   :  { %v3832_v36 = vpop.f32.mrb[57].mxu0 }
0x1bee   :  { %v2592_v2 = vpop.f32.mrb[58].mxu0  ;;  %v3968_v36 = vld [vmem:[%s5445_s16 + $0xe0] sm:$0xff]  }
0x1bef   :  { %v2596_v3 = vpack.c.bf16 %v2592_v2, %v2589_v1  ;;  %v3833_v55 = vpop.f32.mrb[59].mxu0  ;;  %v3967_v1 = vld [vmem:[%s5445_s16 + $0x98] sm:$0xff]   ;;  %v3969_v2 = vld [vmem:[%s5445_s16 + $0xa0] sm:$0xff]  }
0x1bf0   :  { %v3971_v55 = vld [vmem:[%s5445_s16 + $0xa8] sm:$0xff]  }
0x1bf1   :  { %3837 = vmatmul.mubr.msk.bf16.vlgmr.msra.gmra.mrb[64].mxu1 %vm556_vm2, %v2596_v3  ;;  %v3970_v3 = vld [vmem:[%s5445_s16 + $0xe8] sm:$0xff]  }
0x1bf2   :  { %3593 = vmatpush3.bf16.msra.mxu1 %v3961_v33 }
0x1bf3   :  { %3594 = vmatprep.subr.bf16.mxu1 %v3962_v54 }
0x1bf6   :  { %3595 = vmatpush3.bf16.msra.mxu1 %v3963_v61 }
0x1bf7   :  { %3596 = vmatprep.subr.bf16.mxu1 %v3964_v62 }
0x1bfa   :  { %3597 = vmatpush3.bf16.msra.mxu1 %v3965_v63  ;;  %v3461_v63 = vld [vmem:[#allocation19 + $0x1] ss:$0 sm:$0xff] }
0x1bfb   :  { %3598 = vmatprep.subr.bf16.mxu1 %v3966_v0 }
0x1bfe   :  { %3599 = vmatpush3.bf16.msra.mxu1 %v3967_v1 }
0x1bff   :  { %3600 = vmatprep.subr.bf16.mxu1 %v3968_v36 }
0x1c02   :  { %3601 = vmatpush3.bf16.msra.mxu1 %v3969_v2 }
0x1c03   :  { %3602 = vmatprep.subr.bf16.mxu1 %v3970_v3 }
0x1c06   :  { %3603 = vmatpush3.bf16.msra.mxu1 %v3971_v55 }
0x1cc4   :  { %v2640_v43 = vpop.f32.mrb[64].mxu1 }
0x1cc5   :  { %v2647_v5 = vadd.f32 %v2640_v43, %v2469_v49  ;;  %v3838_v7 = vpop.f32.mrb[65].mxu1  ;;  %v3410_v49 = vld [vmem:[#allocation17 + $0x1] ss:$0 sm:$0xff]  ;;  %v3972_v43 = vld [vmem:[%s5445_s16 + $0xf0] sm:$0xff]  }
0x1cc6   :  { %v2643_v8 = vpop.f32.mrb[66].mxu1  ;;  %3604 = vmatprep.subr.bf16.mxu1 %v3972_v43  ;;  %v3975_v7 = vld [vmem:[%s5445_s16 + $0xb8] sm:$0xff]  }
0x1cc7   :  { %v2657_v9 = vadd.f32 %v3408_v59, %v2647_v5  ;;  %v2648_v11 = vadd.f32 %v2643_v8, %v2470_v51  ;;  %v3839_v39 = vpop.f32.mrb[67].mxu1  ;;  %v3974_v5 = vld [vmem:[%s5445_s16 + $0xf8] sm:$0xff]   ;;  %v3419_v8 = vld [vmem:[%s5444_s15 + $0x2] sm:$0x3] }
0x1cc9   :  { %v2658_v40 = vadd.f32 %v3408_v59, %v2648_v11  ;;  %v2659_v12 = vadd.f32 %v2657_v9, %v5121_v34  ;;  %v3973_v59 = vld [vmem:[%s5445_s16 + $0xb0] sm:$0xff]   ;;  %v2723_v9 = vrot.slane %v3419_v8, %v1329_v57  ;;  %v2727_v11 = vrot.slane %v3419_v8, %v1333_v60 }
0x1cca   :  { %3605 = vmatpush3.bf16.msra.mxu1 %v3973_v59 }
0x1ccb   :  { %v2665_v22 = vsel %vm255_vm0, %v2659_v12, 0.0  ;;  %v2660_v13 = vadd.f32 %v2658_v40, %v5123_v10  ;;  %v3950_v10 = vld [vmem:[%s5443_s14 + $0x44] ss:$8 sps:$4 sm:$0xff]   ;;  %3606 = vmatprep.subr.bf16.mxu1 %v3974_v5 }
0x1ccc   :  { %2666 = vadd.xlane.f32.xlu0 %v2665_v22  ;;  %2773 = vmatprep.subr.bf16.mxu0 %v3950_v10 }
0x1ccd   :  { %v2668_v37 = vsel %vm255_vm0, %v2660_v13, 0.0  ;;  %2774 = vmatpush1.bf16.msra.mxu0 %v3948_v26 }
0x1cce   :  { %2775 = vmatprep.subr.bf16.mxu0 %v3953_v27  ;;  %3607 = vmatpush3.bf16.msra.mxu1 %v3975_v7 }
0x1cd0   :  { %2669 = vadd.xlane.f32.xlu0 %v2668_v37 }
0x1cd1   :  { %2776 = vmatpush1.bf16.msra.mxu0 %v3951_v28 }
0x1cd2   :  { %2777 = vmatprep.subr.bf16.mxu0 %v3956_v29 }
0x1cd5   :  { %2778 = vmatpush1.bf16.msra.mxu0 %v3954_v31 }
0x1cd6   :  { %2779 = vmatprep.subr.bf16.mxu0 %v3959_v6 }
0x1cd9   :  { %2780 = vmatpush1.bf16.msra.mxu0 %v3957_v32 }
0x1cda   :  { %3840 = vmatprep.subr.bf16.mxu0 %v4431_v15 }
0x1d59   :  { %v2667_v14 = vpop.xlane.xlu0 %2666 }
0x1d5a   :  { %v2671_v16 = vmul.f32 0.015625, %v2667_v14 }
0x1d5c   :  { %v2673_v18 = vsub.f32 %v2659_v12, %v2671_v16 }
0x1d5d   :  { %v2670_v19 = vpop.xlane.xlu0 %2669 }
0x1d5e   :  { %v2672_v20 = vmul.f32 0.015625, %v2670_v19  ;;  %v2675_v21 = vmul.f32 %v2673_v18, %v2673_v18 }
0x1d60   :  { %v2674_v23 = vsub.f32 %v2660_v13, %v2672_v20  ;;  %v2677_v24 = vsel %vm255_vm0, %v2675_v21, 0.0 }
0x1d61   :  { %2678 = vadd.xlane.f32.xlu0 %v2677_v24 }
0x1d62   :  { %v2676_v25 = vmul.f32 %v2674_v23, %v2674_v23 }
0x1d64   :  { %v2680_v34 = vsel %vm255_vm0, %v2676_v25, 0.0 }
0x1d65   :  { %2681 = vadd.xlane.f32.xlu0 %v2680_v34 }
0x1dee   :  { %v2679_v35 = vpop.xlane.xlu0 %2678 }
0x1def   :  { %v2683_v41 = vmul.f32 0.015625, %v2679_v35 }
0x1df1   :  { %v2685_v42 = vadd.f32 1e-12, %v2683_v41 }
0x1df2   :  { %v2682_v44 = vpop.xlane.xlu0 %2681 }
0x1df3   :  { %4068 = vrsqrt.f32 %v2685_v42  ;;  %v2684_v45 = vmul.f32 0.015625, %v2682_v44 }
0x1df5   :  { %v2686_v4 = vadd.f32 1e-12, %v2684_v45 }
0x1df7   :  { %4070 = vrsqrt.f32 %v2686_v4 }
0x1dfd   :  { %v4069_v38 = vpop.eup %4068 }
0x1dfe   :  { %v2689_v17 = vmul.f32 %v4069_v38, %v2673_v18 }
0x1e00   :  { %v2697_v58 = vmul.f32 %v3409_v46, %v2689_v17 }
0x1e01   :  { %v4071_v47 = vpop.eup %4070 }
0x1e02   :  { %v2690_v48 = vmul.f32 %v4071_v47, %v2674_v23  ;;  %v5303_v30 = vadd.f32 %v3410_v49, %v2697_v58 }
0x1e04   :  { %v2698_v50 = vmul.f32 %v3409_v46, %v2690_v48 }
0x1e06   :  { %v5305_v51 = vadd.f32 %v3410_v49, %v2698_v50 }
0x1e08   :  { %v2707_v52 = vpack.c.bf16 %v5305_v51, %v5303_v30 }
0x1e0a   :  { %3428 = vmatmul.mubr.msk.bf16.vlgmr.msra.gmra.mrb[60].mxu0 %vm255_vm0, %v2707_v52 }
0x1e0b   :  { %3848 = vmatprep.mubr.msk.bf16.mxu0 %vm4432_vm1, %v4431_v15 }
0x1edd   :  { %v2807_v39 = vpop.f32.mrb[60].mxu0 }
0x1ede   :  { %v2808_v40 = vadd.f32 %v2807_v39, %v2723_v9  ;;  %v2809_v12 = vpop.f32.mrb[61].mxu0 }
0x1edf   :  { %v2810_v22 = vadd.f32 %v2809_v12, %v2727_v11  ;;  %v2811_v13 = vpop.f32.mrb[62].mxu0 }
0x1ee0   :  { %v2820_v37 = vmul.f32 0.044715, %v2808_v40  ;;  %v2812_v14 = vadd.f32 %v2811_v13, %v2723_v9  ;;  %v2813_v16 = vpop.f32.mrb[63].mxu0  ;;  %v2816_v17 = vmul.f32 0.5, %v2808_v40 }
0x1ee1   :  { %v2821_v18 = vmul.f32 0.044715, %v2810_v22  ;;  %v2814_v19 = vadd.f32 %v2813_v16, %v2727_v11  ;;  %v2817_v58 = vmul.f32 0.5, %v2810_v22  ;;  %v3977_v16 = vld [vmem:[%s5449_s20 + $0x8] sm:$0xff]  }
0x1ee2   :  { %v2824_v20 = vmul.f32 %v2820_v37, %v2808_v40  ;;  %v2822_v21 = vmul.f32 0.044715, %v2812_v14  ;;  %v2818_v46 = vmul.f32 0.5, %v2812_v14 }
0x1ee3   :  { %v2825_v23 = vmul.f32 %v2821_v18, %v2810_v22  ;;  %v2823_v24 = vmul.f32 0.044715, %v2814_v19  ;;  %v2819_v48 = vmul.f32 0.5, %v2814_v19  ;;  %v3978_v18 = vld [vmem:[%s5449_s20 + $0x10] sm:$0xff]  }
0x1ee4   :  { %v2828_v25 = vmul.f32 %v2824_v20, %v2808_v40  ;;  %v2826_v34 = vmul.f32 %v2822_v21, %v2812_v14 }
0x1ee5   :  { %v2829_v57 = vmul.f32 %v2825_v23, %v2810_v22  ;;  %v2827_v10 = vmul.f32 %v2823_v24, %v2814_v19 }
0x1ee6   :  { %v2832_v56 = vadd.f32 %v2828_v25, %v2808_v40  ;;  %v2830_v60 = vmul.f32 %v2826_v34, %v2812_v14 }
0x1ee7   :  { %v2831_v26 = vmul.f32 %v2827_v10, %v2814_v19  ;;  %v2833_v27 = vadd.f32 %v2829_v57, %v2810_v22 }
0x1ee8   :  { %v2836_v28 = vmul.f32 0.7978846, %v2832_v56  ;;  %v2834_v29 = vadd.f32 %v2830_v60, %v2812_v14  ;;  %v3478_v56 = vld [vmem:[#allocation20 + $0x1] ss:$0 sm:$0xff] }
0x1ee9   :  { %v2835_v31 = vadd.f32 %v2831_v26, %v2814_v19  ;;  %v2837_v32 = vmul.f32 0.7978846, %v2833_v27  ;;  %v3979_v19 = vld [vmem:[%s5449_s20 + $0x18] sm:$0xff]  }
0x1eea   :  { %4072 = vtanh.f32 %v2836_v28  ;;  %v2838_v6 = vmul.f32 0.7978846, %v2834_v29  ;;  %v3479_v28 = vld [vmem:[#allocation22 + $0x1] ss:$0 sm:$0xff] }
0x1eeb   :  { %v2839_v35 = vmul.f32 0.7978846, %v2835_v31  ;;  %4074 = vtanh.f32 %v2837_v32 }
0x1eec   :  { %4076 = vtanh.f32 %v2838_v6 }
0x1eed   :  { %4078 = vtanh.f32 %v2839_v35  ;;  %v3980_v35 = vld [vmem:[%s5451_s22] sm:$0xff]  }
0x1ef4   :  { %v4073_v41 = vpop.eup %4072 }
0x1ef5   :  { %v4075_v42 = vpop.eup %4074  ;;  %v2844_v44 = vadd.f32 1.0, %v4073_v41  ;;  %v3981_v41 = vld [vmem:[%s5451_s22 + $0x8] sm:$0xff]  }
0x1ef6   :  { %v4077_v45 = vpop.eup %4076  ;;  %v2845_v4 = vadd.f32 1.0, %v4075_v42  ;;  %v3982_v42 = vld [vmem:[%s5451_s22 + $0x10] sm:$0xff]  }
0x1ef7   :  { %v4079_v38 = vpop.eup %4078  ;;  %v2846_v47 = vadd.f32 1.0, %v4077_v45  ;;  %v2848_v50 = vmul.f32 %v2844_v44, %v2816_v17  ;;  %v3983_v44 = vld [vmem:[%s5451_s22 + $0x18] sm:$0xff]   ;;  %v3480_v45 = vld [vmem:[%s5450_s21] ss:$0 sm:$0xff]  ;;  %s3257_s21 = sshll.u32 %s4437_s26, 4  ;;  %s3258_s21 = int_to_ptr.vmem [resolvable:$true] %s3257_s21 }
0x1ef8   :  { %v2847_v49 = vadd.f32 1.0, %v4079_v38  ;;  %v2849_v53 = vmul.f32 %v2845_v4, %v2817_v58  ;;  %s4376_s17 = scalar_lea.vmem %s3258_s21, 256  ;;  %p4381_p7 = scmp.lt.s32.totalorder %s3258_s21, %s3258_s21 }
0x1ef9   :  { %v2850_v52 = vmul.f32 %v2846_v47, %v2818_v46  ;;  %p4377_p6 = scmp.ne.s32.totalorder %s3258_s21, %s4376_s17  ;;  %p4382_p8 = scmp.lt.s32.totalorder %s4376_s17, %s4376_s17 }
0x1efa   :  { %v2851_v33 = vmul.f32 %v2847_v49, %v2819_v48 }
0x1efb   :  { %v2852_v54 = vpack.c.bf16 %v2850_v52, %v2848_v50  ;;  %p4383_p9 = por %p4382_p8, %p4381_p7 }
0x1efc   :  { %v2853_v61 = vpack.c.bf16 %v2851_v33, %v2849_v53 }
0x1efd   :  { %p4384_p10 = pnand %p4383_p9, %p4377_p6 }
0x1efe   :  { %3023 = vmatprep.mubr.bf16.mxu1 %v2853_v61 }
0x1eff   :  { %3024 = vmatmul.mubr.bf16.vlgmr.msra.gmra.mrb[68].mxu1 %v2852_v54 }
0x1fd2   :  { %v3608_v62 = vpop.f32.mrb[68].mxu1 }
0x1fd3   :  { %v3609_v0 = vpop.f32.mrb[69].mxu1 }
0x1fd4   :  { %v3610_v1 = vadd.f32 %v3609_v0, %v3608_v62  ;;  %v3611_v36 = vpop.f32.mrb[70].mxu1 }
0x1fd5   :  { %v3612_v2 = vpop.f32.mrb[71].mxu1 }
0x1fd6   :  { %v3026_v3 = vadd.f32 %v3610_v1, %v3461_v63  ;;  %v3613_v55 = vadd.f32 %v3612_v2, %v3611_v36 }
0x1fd8   :  { %v3029_v43 = vadd.f32 %v3613_v55, %v3461_v63  ;;  %v3032_v59 = vadd.f32 %v3026_v3, %v5303_v30 }
0x1fda   :  { %v3038_v5 = vsel %vm255_vm0, %v3032_v59, 0.0  ;;  %v3033_v7 = vadd.f32 %v3029_v43, %v5305_v51  ;;  %v3976_v51 = vld [vmem:[%s5449_s20] sm:$0xff]  }
0x1fdb   :  { %3039 = vadd.xlane.f32.xlu1 %v3038_v5  ;;  %3841 = vmatpush3.bf16.msra.mxu0 %v3976_v51 }
0x1fdc   :  { %v3041_v8 = vsel %vm255_vm0, %v3033_v7, 0.0  ;;  %3842 = vmatprep.subr.bf16.mxu0 %v4431_v15 }
0x1fdd   :  { %3042 = vadd.xlane.f32.xlu0 %v3041_v8 }
0x1fdf   :  { %3843 = vmatpush3.bf16.msra.mxu0 %v3977_v16 }
0x1fe0   :  { %3844 = vmatprep.subr.bf16.mxu0 %v4431_v15 }
0x1fe3   :  { %3845 = vmatpush3.bf16.msra.mxu0 %v3978_v18 }
0x1fe4   :  { %3846 = vmatprep.subr.bf16.mxu0 %v4431_v15 }
0x1fe7   :  { %3847 = vmatpush3.bf16.msra.mxu0 %v3979_v19 }
0x1fe8   :  { %3852 = vmatprep.subr.bf16.mxu0 %v4431_v15 }
0x2068   :  { %v3040_v9 = vpop.xlane.xlu1 %3039 }
0x2069   :  { %v3044_v11 = vmul.f32 0.015625, %v3040_v9 }
0x206a   :  { %v3043_v39 = vpop.xlane.xlu0 %3042 }
0x206b   :  { %v3046_v40 = vsub.f32 %v3032_v59, %v3044_v11  ;;  %v3045_v12 = vmul.f32 0.015625, %v3043_v39 }
0x206d   :  { %v3047_v22 = vsub.f32 %v3033_v7, %v3045_v12  ;;  %v3048_v13 = vmul.f32 %v3046_v40, %v3046_v40 }
0x206f   :  { %v3050_v37 = vsel %vm255_vm0, %v3048_v13, 0.0  ;;  %v3049_v14 = vmul.f32 %v3047_v22, %v3047_v22 }
0x2070   :  { %3051 = vadd.xlane.f32.xlu0 %v3050_v37 }
0x2071   :  { %v3053_v30 = vsel %vm255_vm0, %v3049_v14, 0.0 }
0x2074   :  { %3054 = vadd.xlane.f32.xlu0 %v3053_v30 }
0x20fd   :  { %v3052_v20 = vpop.xlane.xlu0 %3051 }
0x20fe   :  { %v3056_v21 = vmul.f32 0.015625, %v3052_v20 }
0x2100   :  { %v3058_v23 = vadd.f32 1e-12, %v3056_v21 }
0x2101   :  { %v3055_v24 = vpop.xlane.xlu0 %3054 }
0x2102   :  { %4080 = vrsqrt.f32 %v3058_v23  ;;  %v3057_v25 = vmul.f32 0.015625, %v3055_v24 }
0x2104   :  { %v3059_v34 = vadd.f32 1e-12, %v3057_v25 }
0x2106   :  { %4082 = vrsqrt.f32 %v3059_v34 }
0x210c   :  { %v4081_v57 = vpop.eup %4080 }
0x210d   :  { %v3062_v10 = vmul.f32 %v4081_v57, %v3046_v40 }
0x210f   :  { %v3070_v26 = vmul.f32 %v3478_v56, %v3062_v10 }
0x2110   :  { %v4083_v60 = vpop.eup %4082 }
0x2111   :  { %v3063_v27 = vmul.f32 %v4083_v60, %v3047_v22  ;;  %v3078_v31 = vadd.f32 %v3479_v28, %v3070_v26 }
0x2113   :  { %v3071_v29 = vmul.f32 %v3478_v56, %v3063_v27 }
0x2115   :  { %v3079_v32 = vadd.f32 %v3479_v28, %v3071_v29 }
0x2117   :  { %v3080_v6 = vpack.c.bf16 %v3079_v32, %v3078_v31 }
0x2119   :  { %3849 = vmatmul.mubr.msk.bf16.vlgmr.msra.gmra.mrb[64].mxu0 %vm255_vm0, %v3080_v6 }
0x211a   :  { %3860 = vmatprep.mubr.msk.bf16.mxu0 %vm4432_vm1, %v4431_v15  ;;  %3853 = vmatpush3.bf16.msra.mxu0 %v3980_v35 }
0x211b   :  { %3854 = vmatprep.subr.bf16.mxu0 %v4431_v15 }
0x211e   :  { %3855 = vmatpush3.bf16.msra.mxu0 %v3981_v41 }
0x211f   :  { %3856 = vmatprep.subr.bf16.mxu0 %v4431_v15 }
0x2122   :  { %3857 = vmatpush3.bf16.msra.mxu0 %v3982_v42 }
0x2123   :  { %3858 = vmatprep.subr.bf16.mxu0 %v4431_v15  ;;  %v3486_v15 = vld [vmem:[%s5452_s23] ss:$0 sm:$0xff] }
0x2126   :  { %3859 = vmatpush3.bf16.msra.mxu0 %v3983_v44 }
0x21ec   :  { %v3157_v4 = vpop.f32.mrb[64].mxu0 }
0x21ed   :  { %v3158_v38 = vadd.f32 %v3480_v45, %v3157_v4  ;;  %v3850_v17 = vpop.f32.mrb[65].mxu0 }
0x21ee   :  { %v3160_v46 = vpop.f32.mrb[66].mxu0 }
0x21ef   :  { %v3161_v47 = vadd.f32 %v3480_v45, %v3160_v46  ;;  %v3851_v58 = vpop.f32.mrb[67].mxu0  ;;  %4084 = vtanh.f32 %v3158_v38 }
0x21f1   :  { %4086 = vtanh.f32 %v3161_v47 }
0x21f9   :  { %v4085_v48 = vpop.eup %4084 }
0x21fb   :  { %v4087_v49 = vpop.eup %4086 }
0x21fc   :  { %v3166_v50 = vpack.c.bf16 %v4087_v49, %v4085_v48 }
0x21fe   :  { %3861 = vmatmul.mubr.msk.bf16.vlgmr.msra.gmra.mrb[68].mxu0 %vm255_vm0, %v3166_v50 }
0x22d1   :  { %v3243_v52 = vpop.f32.mrb[68].mxu0 }
0x22d2   :  { %v3244_v53 = vadd.f32 %v3486_v15, %v3243_v52  ;;  %v3862_v33 = vpop.f32.mrb[69].mxu0 }
0x22d3   :  { %v3246_v54 = vpop.f32.mrb[70].mxu0 }
0x22d4   :  { %3250 = vst [vmem:[#allocation23] sm:$0xff] %v3244_v53  ;;  %v3247_v61 = vadd.f32 %v3486_v15, %v3246_v54  ;;  %v3863_v62 = vpop.f32.mrb[71].mxu0 }
0x22d6   :  { %3251 = vst [vmem:[#allocation23 + $0x8] sm:$0xff] %v3247_v61 }
0x22d7   :  { %4387 = shalt.err (!%p4384_p10)
}
0x22d8   :  { %s5492_s10 = sld [smem:[#allocation41_spill]] }
0x22de   :  { %s4388_s19 = scalar_lea.hbm %s5492_s10, 256 }
0x22df   :  { %p4389_p11 = scmp.ne.s32.totalorder %s5492_s10, %s4388_s19  ;;  %p4392_p12 = scmp.lt.u32.totalorder %s4388_s19, %s5492_s10 }
0x22e1   :  { %p4394_p13 = pnand %p4392_p12, %p4389_p11 }
0x22e3   :  { %4397 = shalt.err (!%p4394_p13)
}
0x22e4   :  { %3263 = dma.vmem_to_hbm [thread:$0]  %s3258_s21, 256, %s5492_s10, [#allocation4], %s5485_s25, %s5485_s25, %s5484_s24  }
0x22e5   :  { %4412 = dma.done.wait [#allocation4], 256  }
0x22e6   :  { %4413 = vsyncadd [#allocation4], 4294967040 }
0x22e7   :  { %3267 = vsyncpa [#allocation3], 1 }
0x22e8   :  { %3268 = vsyncpa [#allocation6], 1 }
0x22e9   :  { %3269 = vsyncpa [#allocation9], 1 }
0x22ea   :  { %3270 = vsyncpa [#allocation12], 1 }
0x22eb   :  { %3271 = vsyncpa [#allocation15], 1 }
0x22ec   :  { %3272 = vsyncpa [#allocation18], 1 }
0x22ed   :  { %3273 = vsyncpa [#allocation21], 1 }
0x22ee   :  { %3274 = vsyncpa [#allocation4], 1 }

</bundles_post_ra>
